<compile_context>
chip_gen: v5e
topology: v5e:2x2
jax: 0.10.0
libtpu: 0.0.40
codegen_flags: <defaults>
</compile_context>

<pallas_src>
import jax
import jax.numpy as jnp
import numpy as np
from jax.experimental import pallas as pl
from jax.experimental.pallas import tpu as pltpu


def _make_bottleneck_kernel(H, W, Cin, Cmid, Cout):
    Wp = W + 2
    HW = H * W
    HWp = H * Wp

    def kernel(x_ref, w1_ref, b1_ref, w2_ref, b2_ref, w3_ref, b3_ref,
               out_ref, mid_ref):
        # Zero the padded scratch every step (halo + tail stay zero; the
        # interior is overwritten below).  Unconditional so it is correct even
        # when the batch grid axis is sharded across TensorCores (megacore).
        mid_ref[...] = jnp.zeros_like(mid_ref)

        x = x_ref[...]                                         # (HW, Cin) f32

        # ---- conv1 (1x1) + bn1 + relu  (bn1 scale folded into w1) --------
        a1 = jnp.dot(x.astype(jnp.bfloat16), w1_ref[...],
                     preferred_element_type=jnp.float32)       # (HW, Cmid)
        a1 = jnp.maximum(a1 + b1_ref[...], 0.0)

        # Scatter into the zero-padded, width-padded flat scratch: spatial
        # pixel (h, w) lives at flat row (h + 1) * Wp + (w + 1).
        for h in range(H):
            mid_ref[pl.ds((h + 1) * Wp + 1, W), :] = a1[h * W:(h + 1) * W, :]

        # ---- conv2 (3x3, grouped as block-diag dense) + bn2 + relu -------
        # Tap (kh, kw) of a stride-1 / pad-1 conv is a contiguous flat slice
        # of the padded scratch starting at kh*Wp + kw.  Accumulator rows
        # h*Wp + w with w >= W are junk and are never read back.
        acc2 = jnp.broadcast_to(b2_ref[...], (HWp, Cmid))      # init with bias
        for kh in range(3):
            for kw in range(3):
                patch = mid_ref[pl.ds(kh * Wp + kw, HWp), :]
                acc2 = acc2 + jnp.dot(patch.astype(jnp.bfloat16),
                                      w2_ref[kh * 3 + kw],
                                      preferred_element_type=jnp.float32)
        a2 = jnp.maximum(acc2, 0.0)                            # (HWp, Cmid)

        # ---- conv3 (1x1) + bn3  (bn3 scale folded into w3) ---------------
        a3 = jnp.dot(a2.astype(jnp.bfloat16), w3_ref[...],
                     preferred_element_type=jnp.float32) + b3_ref[...]

        # ---- residual add + relu; drop the junk width-pad columns --------
        for h in range(H):
            row = a3[h * Wp:h * Wp + W, :] + x[h * W:(h + 1) * W, :]
            out_ref[pl.ds(h * W, W), :] = jnp.maximum(row, 0.0).astype(out_ref.dtype)

    return kernel


@jax.jit
def bottleneck_forward(x_nchw, w1, b1, w2, b2, w3, b3):
    N, Cin, H, W = x_nchw.shape
    Cmid = w1.shape[1]
    Cout = w3.shape[1]
    assert Cin == Cout, "downsample=None requires inplanes == planes*4"
    HW, Wp = H * W, W + 2
    HWp = H * Wp

    # Layout: NCHW (PyTorch) -> NHWC (channels on lanes), flatten spatial.
    x = jnp.transpose(x_nchw, (0, 2, 3, 1)).reshape(N, HW, Cin)

    kernel = _make_bottleneck_kernel(H, W, Cin, Cmid, Cout)

    flops = 2 * N * (HW * Cin * Cmid + 9 * HWp * Cmid * Cmid + HWp * Cmid * Cout)
    bytes_accessed = (N * HW * Cin * 4 + N * HW * Cout * 4
                      + w1.size * 2 + w2.size * 2 + w3.size * 2
                      + (b1.size + b2.size + b3.size) * 4)

    out = pl.pallas_call(
        kernel,
        out_shape=jax.ShapeDtypeStruct((N, HW, Cout), jnp.float32),
        grid_spec=pltpu.PrefetchScalarGridSpec(
            num_scalar_prefetch=0,
            grid=(N,),
            in_specs=[
                pl.BlockSpec((None, HW, Cin), lambda n: (n, 0, 0)),   # x (+ residual)
                pl.BlockSpec((Cin, Cmid), lambda n: (0, 0)),          # w1 (bf16)
                pl.BlockSpec((1, Cmid), lambda n: (0, 0)),            # b1 (f32)
                pl.BlockSpec((9, Cmid, Cmid), lambda n: (0, 0, 0)),   # w2 (bf16)
                pl.BlockSpec((1, Cmid), lambda n: (0, 0)),            # b2 (f32)
                pl.BlockSpec((Cmid, Cout), lambda n: (0, 0)),         # w3 (bf16)
                pl.BlockSpec((1, Cout), lambda n: (0, 0)),            # b3 (f32)
            ],
            out_specs=pl.BlockSpec((None, HW, Cout), lambda n: (n, 0, 0)),
            # Width-padded flat scratch for the conv2 input, plus one extra
            # padded row so the kh=2 taps never index past the end.
            scratch_shapes=[pltpu.VMEM(((H + 3) * Wp, Cmid), jnp.float32)],
        ),
        compiler_params=pltpu.CompilerParams(
            dimension_semantics=("parallel",),
            vmem_limit_bytes=32 * 1024 * 1024),
        cost_estimate=pl.CostEstimate(flops=flops, transcendentals=0,
                                      bytes_accessed=bytes_accessed),
    )(x, w1, b1, w2, b2, w3, b3)

    out = out.reshape(N, H, W, Cout)
    return jnp.transpose(out, (0, 3, 1, 2))


def init_bottleneck_params(key, inplanes, planes, num_group):
    """Synthetic Bottleneck params with BN folded into scale/bias and scales
    pre-multiplied into the (bf16) conv weights."""
    cmid = planes * 2
    cout = planes * 4
    assert inplanes == cout, "downsample=None requires inplanes == planes*4"
    assert cmid % num_group == 0
    cg = cmid // num_group
    eps = 1e-5

    ks = jax.random.split(key, 15)
    w1_pt = jax.random.normal(ks[0], (cmid, inplanes, 1, 1), jnp.float32) * 0.1
    w2_pt = jax.random.normal(ks[1], (cmid, cg, 3, 3), jnp.float32) * 0.1
    w3_pt = jax.random.normal(ks[2], (cout, cmid, 1, 1), jnp.float32) * 0.1

    def bn_fold(kg, kb, km, kv, c):
        gamma = 1.0 + 0.1 * jax.random.normal(kg, (c,), jnp.float32)
        beta = 0.1 * jax.random.normal(kb, (c,), jnp.float32)
        mean = 0.1 * jax.random.normal(km, (c,), jnp.float32)
        var = jnp.abs(jax.random.normal(kv, (c,), jnp.float32)) + 1.0
        scale = gamma / jnp.sqrt(var + eps)
        bias = beta - mean * scale
        return scale, bias

    s1, bb1 = bn_fold(ks[3], ks[4], ks[5], ks[6], cmid)
    s2, bb2 = bn_fold(ks[7], ks[8], ks[9], ks[10], cmid)
    s3, bb3 = bn_fold(ks[11], ks[12], ks[13], ks[14], cout)

    # conv1 1x1: fold bn1 scale into output channels -> (Cin, Cmid) bf16.
    w1 = (w1_pt[:, :, 0, 0] * s1[:, None]).T.astype(jnp.bfloat16)

    # conv2 grouped 3x3 -> block-diagonal dense (9, Cmid, Cmid), bn2 folded.
    # Dense is the right form here: group width cg << 128 (MXU lane tile).
    w2_hwio = jnp.transpose(w2_pt, (2, 3, 1, 0)) * s2[None, None, None, :]
    w2_dense = jnp.zeros((3, 3, cmid, cmid), jnp.float32)
    for g in range(num_group):
        w2_dense = w2_dense.at[:, :, g * cg:(g + 1) * cg,
                               g * cg:(g + 1) * cg].set(
            w2_hwio[:, :, :, g * cg:(g + 1) * cg])
    w2 = w2_dense.reshape(9, cmid, cmid).astype(jnp.bfloat16)

    # conv3 1x1: fold bn3 scale -> (Cmid, Cout) bf16.
    w3 = (w3_pt[:, :, 0, 0] * s3[:, None]).T.astype(jnp.bfloat16)

    return dict(w1=w1, b1=bb1.reshape(1, cmid),
                w2=w2, b2=bb2.reshape(1, cmid),
                w3=w3, b3=bb3.reshape(1, cout))


def _reference_forward(x_nchw, w1, b1, w2, b2, w3, b3):
    """Pure-JAX reference using the same folded (bf16-rounded) weights."""
    x = jnp.transpose(x_nchw, (0, 2, 3, 1))                     # NHWC
    w1f = w1.astype(jnp.float32)
    w2f = w2.astype(jnp.float32).reshape(3, 3, w2.shape[1], w2.shape[2])
    w3f = w3.astype(jnp.float32)
    o = jnp.maximum(jnp.einsum('nhwc,cd->nhwd', x, w1f) + b1[0], 0.0)
    o = jax.lax.conv_general_dilated(
        o, w2f, window_strides=(1, 1), padding="SAME",
        dimension_numbers=("NHWC", "HWIO", "NHWC"))
    o = jnp.maximum(o + b2[0], 0.0)
    o = jnp.einsum('nhwc,cd->nhwd', o, w3f) + b3[0]
    o = jnp.maximum(o + x, 0.0)
    return jnp.transpose(o, (0, 3, 1, 2))


if __name__ == "__main__":
    # Bottleneck with downsample=None => inplanes == planes*4.
    # planes=64 keeps all channel counts multiples of 128 (lane-dense).
    N, planes, num_group = 2, 64, 32
    inplanes = planes * 4          # 256
    H = W = 16

    key = jax.random.PRNGKey(0)
    kx, kp = jax.random.split(key)
    x = jax.random.normal(kx, (N, inplanes, H, W), jnp.float32)   # NCHW input

    p = init_bottleneck_params(kp, inplanes, planes, num_group)

    out = bottleneck_forward(x, p["w1"], p["b1"], p["w2"], p["b2"],
                             p["w3"], p["b3"])
    out = jax.block_until_ready(out)

    ref = _reference_forward(x, p["w1"], p["b1"], p["w2"], p["b2"],
                             p["w3"], p["b3"])
    assert out.shape == (N, planes * 4, H, W)
    err = float(np.max(np.abs(np.asarray(out) - np.asarray(ref))))
    assert np.allclose(np.asarray(out), np.asarray(ref),
                       rtol=3e-2, atol=3e-2), f"max abs err {err}"

    print("KERNEL_OK")
</pallas_src>

<mosaic_0001>
module attributes {stable_mosaic.version = 11 : i64} {
  func.func @kernel(%arg0: i32, %arg1: memref<1x256x256xf32, #tpu.memory_space<vmem>>, %arg2: memref<256x128xbf16, #tpu.memory_space<vmem>>, %arg3: memref<1x128xf32, #tpu.memory_space<vmem>>, %arg4: memref<9x128x128xbf16, #tpu.memory_space<vmem>>, %arg5: memref<1x128xf32, #tpu.memory_space<vmem>>, %arg6: memref<128x256xbf16, #tpu.memory_space<vmem>>, %arg7: memref<1x256xf32, #tpu.memory_space<vmem>>, %arg8: memref<1x256x256xf32, #tpu.memory_space<vmem>>, %arg9: memref<342x128xf32, #tpu.memory_space<vmem>>) attributes {dimension_semantics = [#tpu.dimension_semantics<parallel>], iteration_bounds = array<i64: 2>, scalar_prefetch = 0 : i64, scratch_operands = 1 : i64, tpu.core_type = #tpu.core_type<tc>, window_params = [{transform_indices = @transform_0, window_bounds = array<i64: 1, 256, 256>}, {pipeline_mode = #tpu.pipeline_mode<synchronous>, transform_indices = @transform_1, window_bounds = array<i64: 256, 128>}, {pipeline_mode = #tpu.pipeline_mode<synchronous>, transform_indices = @transform_2, window_bounds = array<i64: 1, 128>}, {pipeline_mode = #tpu.pipeline_mode<synchronous>, transform_indices = @transform_3, window_bounds = array<i64: 9, 128, 128>}, {pipeline_mode = #tpu.pipeline_mode<synchronous>, transform_indices = @transform_4, window_bounds = array<i64: 1, 128>}, {pipeline_mode = #tpu.pipeline_mode<synchronous>, transform_indices = @transform_5, window_bounds = array<i64: 128, 256>}, {pipeline_mode = #tpu.pipeline_mode<synchronous>, transform_indices = @transform_6, window_bounds = array<i64: 1, 256>}, {transform_indices = @transform_7, window_bounds = array<i64: 1, 256, 256>}]} {
    %cst = arith.constant 0.000000e+00 : f32
    %0 = vector.broadcast %cst : f32 to vector<342x128xf32>
    %c0 = arith.constant 0 : index
    %c0_0 = arith.constant 0 : index
    %1 = vector.load %arg9[%c0, %c0_0] : memref<342x128xf32, #tpu.memory_space<vmem>>, vector<342x128xf32>
    tpu.vector_store %arg9[%c0, %c0_0], %0 {strides = array<i32>} : memref<342x128xf32, #tpu.memory_space<vmem>>, vector<342x128xf32>,
    %c0_1 = arith.constant 0 : index
    %c0_2 = arith.constant 0 : index
    %c0_3 = arith.constant 0 : index
    %2 = vector.load %arg1[%c0_1, %c0_2, %c0_3] : memref<1x256x256xf32, #tpu.memory_space<vmem>>, vector<1x256x256xf32>
    %3 = vector.shape_cast %2 : vector<1x256x256xf32> to vector<256x256xf32>
    %4 = arith.truncf %3 : vector<256x256xf32> to vector<256x256xbf16>
    %c0_4 = arith.constant 0 : index
    %c0_5 = arith.constant 0 : index
    %5 = vector.load %arg2[%c0_4, %c0_5] : memref<256x128xbf16, #tpu.memory_space<vmem>>, vector<256x128xbf16>
    %cst_6 = arith.constant dense<0.000000e+00> : vector<256x128xf32>
    %6 = tpu.matmul %4, %5, %cst_6 {dimension_numbers = #tpu.dot_dimension_numbers<[1], [0], [0], [1], [0, 0, 1, 1], [], []>} : vector<256x256xbf16>, vector<256x128xbf16>, vector<256x128xf32> -> vector<256x128xf32>
    %c0_7 = arith.constant 0 : index
    %c0_8 = arith.constant 0 : index
    %7 = vector.load %arg3[%c0_7, %c0_8] : memref<1x128xf32, #tpu.memory_space<vmem>>, vector<1x128xf32>
    %8 = vector.broadcast %7 : vector<1x128xf32> to vector<256x128xf32>
    %9 = arith.addf %6, %8 : vector<256x128xf32>
    %cst_9 = arith.constant 0.000000e+00 : f32
    %10 = vector.broadcast %cst_9 : f32 to vector<256x128xf32>
    %11 = arith.maximumf %9, %10 : vector<256x128xf32>
    %12 = vector.extract_strided_slice %11 {offsets = [0, 0], sizes = [16, 128], strides = [1, 1]} : vector<256x128xf32> to vector<16x128xf32>
    %c19 = arith.constant 19 : index
    %c0_10 = arith.constant 0 : index
    %13 = vector.load %arg9[%c19, %c0_10] : memref<342x128xf32, #tpu.memory_space<vmem>>, vector<16x128xf32>
    tpu.vector_store %arg9[%c19, %c0_10], %12 {strides = array<i32>} : memref<342x128xf32, #tpu.memory_space<vmem>>, vector<16x128xf32>,
    %14 = vector.extract_strided_slice %11 {offsets = [16, 0], sizes = [16, 128], strides = [1, 1]} : vector<256x128xf32> to vector<16x128xf32>
    %c37 = arith.constant 37 : index
    %c0_11 = arith.constant 0 : index
    %15 = vector.load %arg9[%c37, %c0_11] : memref<342x128xf32, #tpu.memory_space<vmem>>, vector<16x128xf32>
    tpu.vector_store %arg9[%c37, %c0_11], %14 {strides = array<i32>} : memref<342x128xf32, #tpu.memory_space<vmem>>, vector<16x128xf32>,
    %16 = vector.extract_strided_slice %11 {offsets = [32, 0], sizes = [16, 128], strides = [1, 1]} : vector<256x128xf32> to vector<16x128xf32>
    %c55 = arith.constant 55 : index
    %c0_12 = arith.constant 0 : index
    %17 = vector.load %arg9[%c55, %c0_12] : memref<342x128xf32, #tpu.memory_space<vmem>>, vector<16x128xf32>
    tpu.vector_store %arg9[%c55, %c0_12], %16 {strides = array<i32>} : memref<342x128xf32, #tpu.memory_space<vmem>>, vector<16x128xf32>,
    %18 = vector.extract_strided_slice %11 {offsets = [48, 0], sizes = [16, 128], strides = [1, 1]} : vector<256x128xf32> to vector<16x128xf32>
    %c73 = arith.constant 73 : index
    %c0_13 = arith.constant 0 : index
    %19 = vector.load %arg9[%c73, %c0_13] : memref<342x128xf32, #tpu.memory_space<vmem>>, vector<16x128xf32>
    tpu.vector_store %arg9[%c73, %c0_13], %18 {strides = array<i32>} : memref<342x128xf32, #tpu.memory_space<vmem>>, vector<16x128xf32>,
    %20 = vector.extract_strided_slice %11 {offsets = [64, 0], sizes = [16, 128], strides = [1, 1]} : vector<256x128xf32> to vector<16x128xf32>
    %c91 = arith.constant 91 : index
    %c0_14 = arith.constant 0 : index
    %21 = vector.load %arg9[%c91, %c0_14] : memref<342x128xf32, #tpu.memory_space<vmem>>, vector<16x128xf32>
    tpu.vector_store %arg9[%c91, %c0_14], %20 {strides = array<i32>} : memref<342x128xf32, #tpu.memory_space<vmem>>, vector<16x128xf32>,
    %22 = vector.extract_strided_slice %11 {offsets = [80, 0], sizes = [16, 128], strides = [1, 1]} : vector<256x128xf32> to vector<16x128xf32>
    %c109 = arith.constant 109 : index
    %c0_15 = arith.constant 0 : index
    %23 = vector.load %arg9[%c109, %c0_15] : memref<342x128xf32, #tpu.memory_space<vmem>>, vector<16x128xf32>
    tpu.vector_store %arg9[%c109, %c0_15], %22 {strides = array<i32>} : memref<342x128xf32, #tpu.memory_space<vmem>>, vector<16x128xf32>,
    %24 = vector.extract_strided_slice %11 {offsets = [96, 0], sizes = [16, 128], strides = [1, 1]} : vector<256x128xf32> to vector<16x128xf32>
    %c127 = arith.constant 127 : index
    %c0_16 = arith.constant 0 : index
    %25 = vector.load %arg9[%c127, %c0_16] : memref<342x128xf32, #tpu.memory_space<vmem>>, vector<16x128xf32>
    tpu.vector_store %arg9[%c127, %c0_16], %24 {strides = array<i32>} : memref<342x128xf32, #tpu.memory_space<vmem>>, vector<16x128xf32>,
    %26 = vector.extract_strided_slice %11 {offsets = [112, 0], sizes = [16, 128], strides = [1, 1]} : vector<256x128xf32> to vector<16x128xf32>
    %c145 = arith.constant 145 : index
    %c0_17 = arith.constant 0 : index
    %27 = vector.load %arg9[%c145, %c0_17] : memref<342x128xf32, #tpu.memory_space<vmem>>, vector<16x128xf32>
    tpu.vector_store %arg9[%c145, %c0_17], %26 {strides = array<i32>} : memref<342x128xf32, #tpu.memory_space<vmem>>, vector<16x128xf32>,
    %28 = vector.extract_strided_slice %11 {offsets = [128, 0], sizes = [16, 128], strides = [1, 1]} : vector<256x128xf32> to vector<16x128xf32>
    %c163 = arith.constant 163 : index
    %c0_18 = arith.constant 0 : index
    %29 = vector.load %arg9[%c163, %c0_18] : memref<342x128xf32, #tpu.memory_space<vmem>>, vector<16x128xf32>
    tpu.vector_store %arg9[%c163, %c0_18], %28 {strides = array<i32>} : memref<342x128xf32, #tpu.memory_space<vmem>>, vector<16x128xf32>,
    %30 = vector.extract_strided_slice %11 {offsets = [144, 0], sizes = [16, 128], strides = [1, 1]} : vector<256x128xf32> to vector<16x128xf32>
    %c181 = arith.constant 181 : index
    %c0_19 = arith.constant 0 : index
    %31 = vector.load %arg9[%c181, %c0_19] : memref<342x128xf32, #tpu.memory_space<vmem>>, vector<16x128xf32>
    tpu.vector_store %arg9[%c181, %c0_19], %30 {strides = array<i32>} : memref<342x128xf32, #tpu.memory_space<vmem>>, vector<16x128xf32>,
    %32 = vector.extract_strided_slice %11 {offsets = [160, 0], sizes = [16, 128], strides = [1, 1]} : vector<256x128xf32> to vector<16x128xf32>
    %c199 = arith.constant 199 : index
    %c0_20 = arith.constant 0 : index
    %33 = vector.load %arg9[%c199, %c0_20] : memref<342x128xf32, #tpu.memory_space<vmem>>, vector<16x128xf32>
    tpu.vector_store %arg9[%c199, %c0_20], %32 {strides = array<i32>} : memref<342x128xf32, #tpu.memory_space<vmem>>, vector<16x128xf32>,
    %34 = vector.extract_strided_slice %11 {offsets = [176, 0], sizes = [16, 128], strides = [1, 1]} : vector<256x128xf32> to vector<16x128xf32>
    %c217 = arith.constant 217 : index
    %c0_21 = arith.constant 0 : index
    %35 = vector.load %arg9[%c217, %c0_21] : memref<342x128xf32, #tpu.memory_space<vmem>>, vector<16x128xf32>
    tpu.vector_store %arg9[%c217, %c0_21], %34 {strides = array<i32>} : memref<342x128xf32, #tpu.memory_space<vmem>>, vector<16x128xf32>,
    %36 = vector.extract_strided_slice %11 {offsets = [192, 0], sizes = [16, 128], strides = [1, 1]} : vector<256x128xf32> to vector<16x128xf32>
    %c235 = arith.constant 235 : index
    %c0_22 = arith.constant 0 : index
    %37 = vector.load %arg9[%c235, %c0_22] : memref<342x128xf32, #tpu.memory_space<vmem>>, vector<16x128xf32>
    tpu.vector_store %arg9[%c235, %c0_22], %36 {strides = array<i32>} : memref<342x128xf32, #tpu.memory_space<vmem>>, vector<16x128xf32>,
    %38 = vector.extract_strided_slice %11 {offsets = [208, 0], sizes = [16, 128], strides = [1, 1]} : vector<256x128xf32> to vector<16x128xf32>
    %c253 = arith.constant 253 : index
    %c0_23 = arith.constant 0 : index
    %39 = vector.load %arg9[%c253, %c0_23] : memref<342x128xf32, #tpu.memory_space<vmem>>, vector<16x128xf32>
    tpu.vector_store %arg9[%c253, %c0_23], %38 {strides = array<i32>} : memref<342x128xf32, #tpu.memory_space<vmem>>, vector<16x128xf32>,
    %40 = vector.extract_strided_slice %11 {offsets = [224, 0], sizes = [16, 128], strides = [1, 1]} : vector<256x128xf32> to vector<16x128xf32>
    %c271 = arith.constant 271 : index
    %c0_24 = arith.constant 0 : index
    %41 = vector.load %arg9[%c271, %c0_24] : memref<342x128xf32, #tpu.memory_space<vmem>>, vector<16x128xf32>
    tpu.vector_store %arg9[%c271, %c0_24], %40 {strides = array<i32>} : memref<342x128xf32, #tpu.memory_space<vmem>>, vector<16x128xf32>,
    %42 = vector.extract_strided_slice %11 {offsets = [240, 0], sizes = [16, 128], strides = [1, 1]} : vector<256x128xf32> to vector<16x128xf32>
    %c289 = arith.constant 289 : index
    %c0_25 = arith.constant 0 : index
    %43 = vector.load %arg9[%c289, %c0_25] : memref<342x128xf32, #tpu.memory_space<vmem>>, vector<16x128xf32>
    tpu.vector_store %arg9[%c289, %c0_25], %42 {strides = array<i32>} : memref<342x128xf32, #tpu.memory_space<vmem>>, vector<16x128xf32>,
    %c0_26 = arith.constant 0 : index
    %c0_27 = arith.constant 0 : index
    %44 = vector.load %arg5[%c0_26, %c0_27] : memref<1x128xf32, #tpu.memory_space<vmem>>, vector<1x128xf32>
    %45 = vector.shape_cast %44 : vector<1x128xf32> to vector<1x128xf32>
    %46 = vector.broadcast %45 : vector<1x128xf32> to vector<288x128xf32>
    %c0_28 = arith.constant 0 : index
    %c0_29 = arith.constant 0 : index
    %47 = vector.load %arg9[%c0_28, %c0_29] : memref<342x128xf32, #tpu.memory_space<vmem>>, vector<288x128xf32>
    %48 = arith.truncf %47 : vector<288x128xf32> to vector<288x128xbf16>
    %c0_30 = arith.constant 0 : index
    %c0_31 = arith.constant 0 : index
    %c0_32 = arith.constant 0 : index
    %49 = vector.load %arg4[%c0_30, %c0_31, %c0_32] : memref<9x128x128xbf16, #tpu.memory_space<vmem>>, vector<1x128x128xbf16>
    %50 = vector.shape_cast %49 : vector<1x128x128xbf16> to vector<128x128xbf16>
    %cst_33 = arith.constant dense<0.000000e+00> : vector<288x128xf32>
    %51 = tpu.matmul %48, %50, %cst_33 {dimension_numbers = #tpu.dot_dimension_numbers<[1], [0], [0], [1], [0, 0, 1, 1], [], []>} : vector<288x128xbf16>, vector<128x128xbf16>, vector<288x128xf32> -> vector<288x128xf32>
    %52 = arith.addf %46, %51 : vector<288x128xf32>
    %c1 = arith.constant 1 : index
    %c0_34 = arith.constant 0 : index
    %53 = vector.load %arg9[%c1, %c0_34] : memref<342x128xf32, #tpu.memory_space<vmem>>, vector<288x128xf32>
    %54 = arith.truncf %53 : vector<288x128xf32> to vector<288x128xbf16>
    %c1_35 = arith.constant 1 : index
    %c0_36 = arith.constant 0 : index
    %c0_37 = arith.constant 0 : index
    %55 = vector.load %arg4[%c1_35, %c0_36, %c0_37] : memref<9x128x128xbf16, #tpu.memory_space<vmem>>, vector<1x128x128xbf16>
    %56 = vector.shape_cast %55 : vector<1x128x128xbf16> to vector<128x128xbf16>
    %cst_38 = arith.constant dense<0.000000e+00> : vector<288x128xf32>
    %57 = tpu.matmul %54, %56, %cst_38 {dimension_numbers = #tpu.dot_dimension_numbers<[1], [0], [0], [1], [0, 0, 1, 1], [], []>} : vector<288x128xbf16>, vector<128x128xbf16>, vector<288x128xf32> -> vector<288x128xf32>
    %58 = arith.addf %52, %57 : vector<288x128xf32>
    %c2 = arith.constant 2 : index
    %c0_39 = arith.constant 0 : index
    %59 = vector.load %arg9[%c2, %c0_39] : memref<342x128xf32, #tpu.memory_space<vmem>>, vector<288x128xf32>
    %60 = arith.truncf %59 : vector<288x128xf32> to vector<288x128xbf16>
    %c2_40 = arith.constant 2 : index
    %c0_41 = arith.constant 0 : index
    %c0_42 = arith.constant 0 : index
    %61 = vector.load %arg4[%c2_40, %c0_41, %c0_42] : memref<9x128x128xbf16, #tpu.memory_space<vmem>>, vector<1x128x128xbf16>
    %62 = vector.shape_cast %61 : vector<1x128x128xbf16> to vector<128x128xbf16>
    %cst_43 = arith.constant dense<0.000000e+00> : vector<288x128xf32>
    %63 = tpu.matmul %60, %62, %cst_43 {dimension_numbers = #tpu.dot_dimension_numbers<[1], [0], [0], [1], [0, 0, 1, 1], [], []>} : vector<288x128xbf16>, vector<128x128xbf16>, vector<288x128xf32> -> vector<288x128xf32>
    %64 = arith.addf %58, %63 : vector<288x128xf32>
    %c18 = arith.constant 18 : index
    %c0_44 = arith.constant 0 : index
    %65 = vector.load %arg9[%c18, %c0_44] : memref<342x128xf32, #tpu.memory_space<vmem>>, vector<288x128xf32>
    %66 = arith.truncf %65 : vector<288x128xf32> to vector<288x128xbf16>
    %c3 = arith.constant 3 : index
    %c0_45 = arith.constant 0 : index
    %c0_46 = arith.constant 0 : index
    %67 = vector.load %arg4[%c3, %c0_45, %c0_46] : memref<9x128x128xbf16, #tpu.memory_space<vmem>>, vector<1x128x128xbf16>
    %68 = vector.shape_cast %67 : vector<1x128x128xbf16> to vector<128x128xbf16>
    %cst_47 = arith.constant dense<0.000000e+00> : vector<288x128xf32>
    %69 = tpu.matmul %66, %68, %cst_47 {dimension_numbers = #tpu.dot_dimension_numbers<[1], [0], [0], [1], [0, 0, 1, 1], [], []>} : vector<288x128xbf16>, vector<128x128xbf16>, vector<288x128xf32> -> vector<288x128xf32>
    %70 = arith.addf %64, %69 : vector<288x128xf32>
    %c19_48 = arith.constant 19 : index
    %c0_49 = arith.constant 0 : index
    %71 = vector.load %arg9[%c19_48, %c0_49] : memref<342x128xf32, #tpu.memory_space<vmem>>, vector<288x128xf32>
    %72 = arith.truncf %71 : vector<288x128xf32> to vector<288x128xbf16>
    %c4 = arith.constant 4 : index
    %c0_50 = arith.constant 0 : index
    %c0_51 = arith.constant 0 : index
    %73 = vector.load %arg4[%c4, %c0_50, %c0_51] : memref<9x128x128xbf16, #tpu.memory_space<vmem>>, vector<1x128x128xbf16>
    %74 = vector.shape_cast %73 : vector<1x128x128xbf16> to vector<128x128xbf16>
    %cst_52 = arith.constant dense<0.000000e+00> : vector<288x128xf32>
    %75 = tpu.matmul %72, %74, %cst_52 {dimension_numbers = #tpu.dot_dimension_numbers<[1], [0], [0], [1], [0, 0, 1, 1], [], []>} : vector<288x128xbf16>, vector<128x128xbf16>, vector<288x128xf32> -> vector<288x128xf32>
    %76 = arith.addf %70, %75 : vector<288x128xf32>
    %c20 = arith.constant 20 : index
    %c0_53 = arith.constant 0 : index
    %77 = vector.load %arg9[%c20, %c0_53] : memref<342x128xf32, #tpu.memory_space<vmem>>, vector<288x128xf32>
    %78 = arith.truncf %77 : vector<288x128xf32> to vector<288x128xbf16>
    %c5 = arith.constant 5 : index
    %c0_54 = arith.constant 0 : index
    %c0_55 = arith.constant 0 : index
    %79 = vector.load %arg4[%c5, %c0_54, %c0_55] : memref<9x128x128xbf16, #tpu.memory_space<vmem>>, vector<1x128x128xbf16>
    %80 = vector.shape_cast %79 : vector<1x128x128xbf16> to vector<128x128xbf16>
    %cst_56 = arith.constant dense<0.000000e+00> : vector<288x128xf32>
    %81 = tpu.matmul %78, %80, %cst_56 {dimension_numbers = #tpu.dot_dimension_numbers<[1], [0], [0], [1], [0, 0, 1, 1], [], []>} : vector<288x128xbf16>, vector<128x128xbf16>, vector<288x128xf32> -> vector<288x128xf32>
    %82 = arith.addf %76, %81 : vector<288x128xf32>
    %c36 = arith.constant 36 : index
    %c0_57 = arith.constant 0 : index
    %83 = vector.load %arg9[%c36, %c0_57] : memref<342x128xf32, #tpu.memory_space<vmem>>, vector<288x128xf32>
    %84 = arith.truncf %83 : vector<288x128xf32> to vector<288x128xbf16>
    %c6 = arith.constant 6 : index
    %c0_58 = arith.constant 0 : index
    %c0_59 = arith.constant 0 : index
    %85 = vector.load %arg4[%c6, %c0_58, %c0_59] : memref<9x128x128xbf16, #tpu.memory_space<vmem>>, vector<1x128x128xbf16>
    %86 = vector.shape_cast %85 : vector<1x128x128xbf16> to vector<128x128xbf16>
    %cst_60 = arith.constant dense<0.000000e+00> : vector<288x128xf32>
    %87 = tpu.matmul %84, %86, %cst_60 {dimension_numbers = #tpu.dot_dimension_numbers<[1], [0], [0], [1], [0, 0, 1, 1], [], []>} : vector<288x128xbf16>, vector<128x128xbf16>, vector<288x128xf32> -> vector<288x128xf32>
    %88 = arith.addf %82, %87 : vector<288x128xf32>
    %c37_61 = arith.constant 37 : index
    %c0_62 = arith.constant 0 : index
    %89 = vector.load %arg9[%c37_61, %c0_62] : memref<342x128xf32, #tpu.memory_space<vmem>>, vector<288x128xf32>
    %90 = arith.truncf %89 : vector<288x128xf32> to vector<288x128xbf16>
    %c7 = arith.constant 7 : index
    %c0_63 = arith.constant 0 : index
    %c0_64 = arith.constant 0 : index
    %91 = vector.load %arg4[%c7, %c0_63, %c0_64] : memref<9x128x128xbf16, #tpu.memory_space<vmem>>, vector<1x128x128xbf16>
    %92 = vector.shape_cast %91 : vector<1x128x128xbf16> to vector<128x128xbf16>
    %cst_65 = arith.constant dense<0.000000e+00> : vector<288x128xf32>
    %93 = tpu.matmul %90, %92, %cst_65 {dimension_numbers = #tpu.dot_dimension_numbers<[1], [0], [0], [1], [0, 0, 1, 1], [], []>} : vector<288x128xbf16>, vector<128x128xbf16>, vector<288x128xf32> -> vector<288x128xf32>
    %94 = arith.addf %88, %93 : vector<288x128xf32>
    %c38 = arith.constant 38 : index
    %c0_66 = arith.constant 0 : index
    %95 = vector.load %arg9[%c38, %c0_66] : memref<342x128xf32, #tpu.memory_space<vmem>>, vector<288x128xf32>
    %96 = arith.truncf %95 : vector<288x128xf32> to vector<288x128xbf16>
    %c8 = arith.constant 8 : index
    %c0_67 = arith.constant 0 : index
    %c0_68 = arith.constant 0 : index
    %97 = vector.load %arg4[%c8, %c0_67, %c0_68] : memref<9x128x128xbf16, #tpu.memory_space<vmem>>, vector<1x128x128xbf16>
    %98 = vector.shape_cast %97 : vector<1x128x128xbf16> to vector<128x128xbf16>
    %cst_69 = arith.constant dense<0.000000e+00> : vector<288x128xf32>
    %99 = tpu.matmul %96, %98, %cst_69 {dimension_numbers = #tpu.dot_dimension_numbers<[1], [0], [0], [1], [0, 0, 1, 1], [], []>} : vector<288x128xbf16>, vector<128x128xbf16>, vector<288x128xf32> -> vector<288x128xf32>
    %100 = arith.addf %94, %99 : vector<288x128xf32>
    %cst_70 = arith.constant 0.000000e+00 : f32
    %101 = vector.broadcast %cst_70 : f32 to vector<288x128xf32>
    %102 = arith.maximumf %100, %101 : vector<288x128xf32>
    %103 = arith.truncf %102 : vector<288x128xf32> to vector<288x128xbf16>
    %c0_71 = arith.constant 0 : index
    %c0_72 = arith.constant 0 : index
    %104 = vector.load %arg6[%c0_71, %c0_72] : memref<128x256xbf16, #tpu.memory_space<vmem>>, vector<128x256xbf16>
    %cst_73 = arith.constant dense<0.000000e+00> : vector<288x256xf32>
    %105 = tpu.matmul %103, %104, %cst_73 {dimension_numbers = #tpu.dot_dimension_numbers<[1], [0], [0], [1], [0, 0, 1, 1], [], []>} : vector<288x128xbf16>, vector<128x256xbf16>, vector<288x256xf32> -> vector<288x256xf32>
    %c0_74 = arith.constant 0 : index
    %c0_75 = arith.constant 0 : index
    %106 = vector.load %arg7[%c0_74, %c0_75] : memref<1x256xf32, #tpu.memory_space<vmem>>, vector<1x256xf32>
    %107 = vector.broadcast %106 : vector<1x256xf32> to vector<288x256xf32>
    %108 = arith.addf %105, %107 : vector<288x256xf32>
    %109 = vector.extract_strided_slice %108 {offsets = [0, 0], sizes = [16, 256], strides = [1, 1]} : vector<288x256xf32> to vector<16x256xf32>
    %110 = vector.extract_strided_slice %3 {offsets = [0, 0], sizes = [16, 256], strides = [1, 1]} : vector<256x256xf32> to vector<16x256xf32>
    %111 = arith.addf %109, %110 : vector<16x256xf32>
    %cst_76 = arith.constant 0.000000e+00 : f32
    %112 = vector.broadcast %cst_76 : f32 to vector<16x256xf32>
    %113 = arith.maximumf %111, %112 : vector<16x256xf32>
    %c0_77 = arith.constant 0 : index
    %c0_78 = arith.constant 0 : index
    %c0_79 = arith.constant 0 : index
    %114 = vector.load %arg8[%c0_77, %c0_78, %c0_79] : memref<1x256x256xf32, #tpu.memory_space<vmem>>, vector<1x16x256xf32>
    %115 = vector.shape_cast %114 : vector<1x16x256xf32> to vector<16x256xf32>
    %116 = vector.shape_cast %113 : vector<16x256xf32> to vector<1x16x256xf32>
    tpu.vector_store %arg8[%c0_77, %c0_78, %c0_79], %116 {strides = array<i32>} : memref<1x256x256xf32, #tpu.memory_space<vmem>>, vector<1x16x256xf32>,
    %117 = vector.extract_strided_slice %108 {offsets = [18, 0], sizes = [16, 256], strides = [1, 1]} : vector<288x256xf32> to vector<16x256xf32>
    %118 = vector.extract_strided_slice %3 {offsets = [16, 0], sizes = [16, 256], strides = [1, 1]} : vector<256x256xf32> to vector<16x256xf32>
    %119 = arith.addf %117, %118 : vector<16x256xf32>
    %cst_80 = arith.constant 0.000000e+00 : f32
    %120 = vector.broadcast %cst_80 : f32 to vector<16x256xf32>
    %121 = arith.maximumf %119, %120 : vector<16x256xf32>
    %c0_81 = arith.constant 0 : index
    %c16 = arith.constant 16 : index
    %c0_82 = arith.constant 0 : index
    %122 = vector.load %arg8[%c0_81, %c16, %c0_82] : memref<1x256x256xf32, #tpu.memory_space<vmem>>, vector<1x16x256xf32>
    %123 = vector.shape_cast %122 : vector<1x16x256xf32> to vector<16x256xf32>
    %124 = vector.shape_cast %121 : vector<16x256xf32> to vector<1x16x256xf32>
    tpu.vector_store %arg8[%c0_81, %c16, %c0_82], %124 {strides = array<i32>} : memref<1x256x256xf32, #tpu.memory_space<vmem>>, vector<1x16x256xf32>,
    %125 = vector.extract_strided_slice %108 {offsets = [36, 0], sizes = [16, 256], strides = [1, 1]} : vector<288x256xf32> to vector<16x256xf32>
    %126 = vector.extract_strided_slice %3 {offsets = [32, 0], sizes = [16, 256], strides = [1, 1]} : vector<256x256xf32> to vector<16x256xf32>
    %127 = arith.addf %125, %126 : vector<16x256xf32>
    %cst_83 = arith.constant 0.000000e+00 : f32
    %128 = vector.broadcast %cst_83 : f32 to vector<16x256xf32>
    %129 = arith.maximumf %127, %128 : vector<16x256xf32>
    %c0_84 = arith.constant 0 : index
    %c32 = arith.constant 32 : index
    %c0_85 = arith.constant 0 : index
    %130 = vector.load %arg8[%c0_84, %c32, %c0_85] : memref<1x256x256xf32, #tpu.memory_space<vmem>>, vector<1x16x256xf32>
    %131 = vector.shape_cast %130 : vector<1x16x256xf32> to vector<16x256xf32>
    %132 = vector.shape_cast %129 : vector<16x256xf32> to vector<1x16x256xf32>
    tpu.vector_store %arg8[%c0_84, %c32, %c0_85], %132 {strides = array<i32>} : memref<1x256x256xf32, #tpu.memory_space<vmem>>, vector<1x16x256xf32>,
    %133 = vector.extract_strided_slice %108 {offsets = [54, 0], sizes = [16, 256], strides = [1, 1]} : vector<288x256xf32> to vector<16x256xf32>
    %134 = vector.extract_strided_slice %3 {offsets = [48, 0], sizes = [16, 256], strides = [1, 1]} : vector<256x256xf32> to vector<16x256xf32>
    %135 = arith.addf %133, %134 : vector<16x256xf32>
    %cst_86 = arith.constant 0.000000e+00 : f32
    %136 = vector.broadcast %cst_86 : f32 to vector<16x256xf32>
    %137 = arith.maximumf %135, %136 : vector<16x256xf32>
    %c0_87 = arith.constant 0 : index
    %c48 = arith.constant 48 : index
    %c0_88 = arith.constant 0 : index
    %138 = vector.load %arg8[%c0_87, %c48, %c0_88] : memref<1x256x256xf32, #tpu.memory_space<vmem>>, vector<1x16x256xf32>
    %139 = vector.shape_cast %138 : vector<1x16x256xf32> to vector<16x256xf32>
    %140 = vector.shape_cast %137 : vector<16x256xf32> to vector<1x16x256xf32>
    tpu.vector_store %arg8[%c0_87, %c48, %c0_88], %140 {strides = array<i32>} : memref<1x256x256xf32, #tpu.memory_space<vmem>>, vector<1x16x256xf32>,
    %141 = vector.extract_strided_slice %108 {offsets = [72, 0], sizes = [16, 256], strides = [1, 1]} : vector<288x256xf32> to vector<16x256xf32>
    %142 = vector.extract_strided_slice %3 {offsets = [64, 0], sizes = [16, 256], strides = [1, 1]} : vector<256x256xf32> to vector<16x256xf32>
    %143 = arith.addf %141, %142 : vector<16x256xf32>
    %cst_89 = arith.constant 0.000000e+00 : f32
    %144 = vector.broadcast %cst_89 : f32 to vector<16x256xf32>
    %145 = arith.maximumf %143, %144 : vector<16x256xf32>
    %c0_90 = arith.constant 0 : index
    %c64 = arith.constant 64 : index
    %c0_91 = arith.constant 0 : index
    %146 = vector.load %arg8[%c0_90, %c64, %c0_91] : memref<1x256x256xf32, #tpu.memory_space<vmem>>, vector<1x16x256xf32>
    %147 = vector.shape_cast %146 : vector<1x16x256xf32> to vector<16x256xf32>
    %148 = vector.shape_cast %145 : vector<16x256xf32> to vector<1x16x256xf32>
    tpu.vector_store %arg8[%c0_90, %c64, %c0_91], %148 {strides = array<i32>} : memref<1x256x256xf32, #tpu.memory_space<vmem>>, vector<1x16x256xf32>,
    %149 = vector.extract_strided_slice %108 {offsets = [90, 0], sizes = [16, 256], strides = [1, 1]} : vector<288x256xf32> to vector<16x256xf32>
    %150 = vector.extract_strided_slice %3 {offsets = [80, 0], sizes = [16, 256], strides = [1, 1]} : vector<256x256xf32> to vector<16x256xf32>
    %151 = arith.addf %149, %150 : vector<16x256xf32>
    %cst_92 = arith.constant 0.000000e+00 : f32
    %152 = vector.broadcast %cst_92 : f32 to vector<16x256xf32>
    %153 = arith.maximumf %151, %152 : vector<16x256xf32>
    %c0_93 = arith.constant 0 : index
    %c80 = arith.constant 80 : index
    %c0_94 = arith.constant 0 : index
    %154 = vector.load %arg8[%c0_93, %c80, %c0_94] : memref<1x256x256xf32, #tpu.memory_space<vmem>>, vector<1x16x256xf32>
    %155 = vector.shape_cast %154 : vector<1x16x256xf32> to vector<16x256xf32>
    %156 = vector.shape_cast %153 : vector<16x256xf32> to vector<1x16x256xf32>
    tpu.vector_store %arg8[%c0_93, %c80, %c0_94], %156 {strides = array<i32>} : memref<1x256x256xf32, #tpu.memory_space<vmem>>, vector<1x16x256xf32>,
    %157 = vector.extract_strided_slice %108 {offsets = [108, 0], sizes = [16, 256], strides = [1, 1]} : vector<288x256xf32> to vector<16x256xf32>
    %158 = vector.extract_strided_slice %3 {offsets = [96, 0], sizes = [16, 256], strides = [1, 1]} : vector<256x256xf32> to vector<16x256xf32>
    %159 = arith.addf %157, %158 : vector<16x256xf32>
    %cst_95 = arith.constant 0.000000e+00 : f32
    %160 = vector.broadcast %cst_95 : f32 to vector<16x256xf32>
    %161 = arith.maximumf %159, %160 : vector<16x256xf32>
    %c0_96 = arith.constant 0 : index
    %c96 = arith.constant 96 : index
    %c0_97 = arith.constant 0 : index
    %162 = vector.load %arg8[%c0_96, %c96, %c0_97] : memref<1x256x256xf32, #tpu.memory_space<vmem>>, vector<1x16x256xf32>
    %163 = vector.shape_cast %162 : vector<1x16x256xf32> to vector<16x256xf32>
    %164 = vector.shape_cast %161 : vector<16x256xf32> to vector<1x16x256xf32>
    tpu.vector_store %arg8[%c0_96, %c96, %c0_97], %164 {strides = array<i32>} : memref<1x256x256xf32, #tpu.memory_space<vmem>>, vector<1x16x256xf32>,
    %165 = vector.extract_strided_slice %108 {offsets = [126, 0], sizes = [16, 256], strides = [1, 1]} : vector<288x256xf32> to vector<16x256xf32>
    %166 = vector.extract_strided_slice %3 {offsets = [112, 0], sizes = [16, 256], strides = [1, 1]} : vector<256x256xf32> to vector<16x256xf32>
    %167 = arith.addf %165, %166 : vector<16x256xf32>
    %cst_98 = arith.constant 0.000000e+00 : f32
    %168 = vector.broadcast %cst_98 : f32 to vector<16x256xf32>
    %169 = arith.maximumf %167, %168 : vector<16x256xf32>
    %c0_99 = arith.constant 0 : index
    %c112 = arith.constant 112 : index
    %c0_100 = arith.constant 0 : index
    %170 = vector.load %arg8[%c0_99, %c112, %c0_100] : memref<1x256x256xf32, #tpu.memory_space<vmem>>, vector<1x16x256xf32>
    %171 = vector.shape_cast %170 : vector<1x16x256xf32> to vector<16x256xf32>
    %172 = vector.shape_cast %169 : vector<16x256xf32> to vector<1x16x256xf32>
    tpu.vector_store %arg8[%c0_99, %c112, %c0_100], %172 {strides = array<i32>} : memref<1x256x256xf32, #tpu.memory_space<vmem>>, vector<1x16x256xf32>,
    %173 = vector.extract_strided_slice %108 {offsets = [144, 0], sizes = [16, 256], strides = [1, 1]} : vector<288x256xf32> to vector<16x256xf32>
    %174 = vector.extract_strided_slice %3 {offsets = [128, 0], sizes = [16, 256], strides = [1, 1]} : vector<256x256xf32> to vector<16x256xf32>
    %175 = arith.addf %173, %174 : vector<16x256xf32>
    %cst_101 = arith.constant 0.000000e+00 : f32
    %176 = vector.broadcast %cst_101 : f32 to vector<16x256xf32>
    %177 = arith.maximumf %175, %176 : vector<16x256xf32>
    %c0_102 = arith.constant 0 : index
    %c128 = arith.constant 128 : index
    %c0_103 = arith.constant 0 : index
    %178 = vector.load %arg8[%c0_102, %c128, %c0_103] : memref<1x256x256xf32, #tpu.memory_space<vmem>>, vector<1x16x256xf32>
    %179 = vector.shape_cast %178 : vector<1x16x256xf32> to vector<16x256xf32>
    %180 = vector.shape_cast %177 : vector<16x256xf32> to vector<1x16x256xf32>
    tpu.vector_store %arg8[%c0_102, %c128, %c0_103], %180 {strides = array<i32>} : memref<1x256x256xf32, #tpu.memory_space<vmem>>, vector<1x16x256xf32>,
    %181 = vector.extract_strided_slice %108 {offsets = [162, 0], sizes = [16, 256], strides = [1, 1]} : vector<288x256xf32> to vector<16x256xf32>
    %182 = vector.extract_strided_slice %3 {offsets = [144, 0], sizes = [16, 256], strides = [1, 1]} : vector<256x256xf32> to vector<16x256xf32>
    %183 = arith.addf %181, %182 : vector<16x256xf32>
    %cst_104 = arith.constant 0.000000e+00 : f32
    %184 = vector.broadcast %cst_104 : f32 to vector<16x256xf32>
    %185 = arith.maximumf %183, %184 : vector<16x256xf32>
    %c0_105 = arith.constant 0 : index
    %c144 = arith.constant 144 : index
    %c0_106 = arith.constant 0 : index
    %186 = vector.load %arg8[%c0_105, %c144, %c0_106] : memref<1x256x256xf32, #tpu.memory_space<vmem>>, vector<1x16x256xf32>
    %187 = vector.shape_cast %186 : vector<1x16x256xf32> to vector<16x256xf32>
    %188 = vector.shape_cast %185 : vector<16x256xf32> to vector<1x16x256xf32>
    tpu.vector_store %arg8[%c0_105, %c144, %c0_106], %188 {strides = array<i32>} : memref<1x256x256xf32, #tpu.memory_space<vmem>>, vector<1x16x256xf32>,
    %189 = vector.extract_strided_slice %108 {offsets = [180, 0], sizes = [16, 256], strides = [1, 1]} : vector<288x256xf32> to vector<16x256xf32>
    %190 = vector.extract_strided_slice %3 {offsets = [160, 0], sizes = [16, 256], strides = [1, 1]} : vector<256x256xf32> to vector<16x256xf32>
    %191 = arith.addf %189, %190 : vector<16x256xf32>
    %cst_107 = arith.constant 0.000000e+00 : f32
    %192 = vector.broadcast %cst_107 : f32 to vector<16x256xf32>
    %193 = arith.maximumf %191, %192 : vector<16x256xf32>
    %c0_108 = arith.constant 0 : index
    %c160 = arith.constant 160 : index
    %c0_109 = arith.constant 0 : index
    %194 = vector.load %arg8[%c0_108, %c160, %c0_109] : memref<1x256x256xf32, #tpu.memory_space<vmem>>, vector<1x16x256xf32>
    %195 = vector.shape_cast %194 : vector<1x16x256xf32> to vector<16x256xf32>
    %196 = vector.shape_cast %193 : vector<16x256xf32> to vector<1x16x256xf32>
    tpu.vector_store %arg8[%c0_108, %c160, %c0_109], %196 {strides = array<i32>} : memref<1x256x256xf32, #tpu.memory_space<vmem>>, vector<1x16x256xf32>,
    %197 = vector.extract_strided_slice %108 {offsets = [198, 0], sizes = [16, 256], strides = [1, 1]} : vector<288x256xf32> to vector<16x256xf32>
    %198 = vector.extract_strided_slice %3 {offsets = [176, 0], sizes = [16, 256], strides = [1, 1]} : vector<256x256xf32> to vector<16x256xf32>
    %199 = arith.addf %197, %198 : vector<16x256xf32>
    %cst_110 = arith.constant 0.000000e+00 : f32
    %200 = vector.broadcast %cst_110 : f32 to vector<16x256xf32>
    %201 = arith.maximumf %199, %200 : vector<16x256xf32>
    %c0_111 = arith.constant 0 : index
    %c176 = arith.constant 176 : index
    %c0_112 = arith.constant 0 : index
    %202 = vector.load %arg8[%c0_111, %c176, %c0_112] : memref<1x256x256xf32, #tpu.memory_space<vmem>>, vector<1x16x256xf32>
    %203 = vector.shape_cast %202 : vector<1x16x256xf32> to vector<16x256xf32>
    %204 = vector.shape_cast %201 : vector<16x256xf32> to vector<1x16x256xf32>
    tpu.vector_store %arg8[%c0_111, %c176, %c0_112], %204 {strides = array<i32>} : memref<1x256x256xf32, #tpu.memory_space<vmem>>, vector<1x16x256xf32>,
    %205 = vector.extract_strided_slice %108 {offsets = [216, 0], sizes = [16, 256], strides = [1, 1]} : vector<288x256xf32> to vector<16x256xf32>
    %206 = vector.extract_strided_slice %3 {offsets = [192, 0], sizes = [16, 256], strides = [1, 1]} : vector<256x256xf32> to vector<16x256xf32>
    %207 = arith.addf %205, %206 : vector<16x256xf32>
    %cst_113 = arith.constant 0.000000e+00 : f32
    %208 = vector.broadcast %cst_113 : f32 to vector<16x256xf32>
    %209 = arith.maximumf %207, %208 : vector<16x256xf32>
    %c0_114 = arith.constant 0 : index
    %c192 = arith.constant 192 : index
    %c0_115 = arith.constant 0 : index
    %210 = vector.load %arg8[%c0_114, %c192, %c0_115] : memref<1x256x256xf32, #tpu.memory_space<vmem>>, vector<1x16x256xf32>
    %211 = vector.shape_cast %210 : vector<1x16x256xf32> to vector<16x256xf32>
    %212 = vector.shape_cast %209 : vector<16x256xf32> to vector<1x16x256xf32>
    tpu.vector_store %arg8[%c0_114, %c192, %c0_115], %212 {strides = array<i32>} : memref<1x256x256xf32, #tpu.memory_space<vmem>>, vector<1x16x256xf32>,
    %213 = vector.extract_strided_slice %108 {offsets = [234, 0], sizes = [16, 256], strides = [1, 1]} : vector<288x256xf32> to vector<16x256xf32>
    %214 = vector.extract_strided_slice %3 {offsets = [208, 0], sizes = [16, 256], strides = [1, 1]} : vector<256x256xf32> to vector<16x256xf32>
    %215 = arith.addf %213, %214 : vector<16x256xf32>
    %cst_116 = arith.constant 0.000000e+00 : f32
    %216 = vector.broadcast %cst_116 : f32 to vector<16x256xf32>
    %217 = arith.maximumf %215, %216 : vector<16x256xf32>
    %c0_117 = arith.constant 0 : index
    %c208 = arith.constant 208 : index
    %c0_118 = arith.constant 0 : index
    %218 = vector.load %arg8[%c0_117, %c208, %c0_118] : memref<1x256x256xf32, #tpu.memory_space<vmem>>, vector<1x16x256xf32>
    %219 = vector.shape_cast %218 : vector<1x16x256xf32> to vector<16x256xf32>
    %220 = vector.shape_cast %217 : vector<16x256xf32> to vector<1x16x256xf32>
    tpu.vector_store %arg8[%c0_117, %c208, %c0_118], %220 {strides = array<i32>} : memref<1x256x256xf32, #tpu.memory_space<vmem>>, vector<1x16x256xf32>,
    %221 = vector.extract_strided_slice %108 {offsets = [252, 0], sizes = [16, 256], strides = [1, 1]} : vector<288x256xf32> to vector<16x256xf32>
    %222 = vector.extract_strided_slice %3 {offsets = [224, 0], sizes = [16, 256], strides = [1, 1]} : vector<256x256xf32> to vector<16x256xf32>
    %223 = arith.addf %221, %222 : vector<16x256xf32>
    %cst_119 = arith.constant 0.000000e+00 : f32
    %224 = vector.broadcast %cst_119 : f32 to vector<16x256xf32>
    %225 = arith.maximumf %223, %224 : vector<16x256xf32>
    %c0_120 = arith.constant 0 : index
    %c224 = arith.constant 224 : index
    %c0_121 = arith.constant 0 : index
    %226 = vector.load %arg8[%c0_120, %c224, %c0_121] : memref<1x256x256xf32, #tpu.memory_space<vmem>>, vector<1x16x256xf32>
    %227 = vector.shape_cast %226 : vector<1x16x256xf32> to vector<16x256xf32>
    %228 = vector.shape_cast %225 : vector<16x256xf32> to vector<1x16x256xf32>
    tpu.vector_store %arg8[%c0_120, %c224, %c0_121], %228 {strides = array<i32>} : memref<1x256x256xf32, #tpu.memory_space<vmem>>, vector<1x16x256xf32>,
    %229 = vector.extract_strided_slice %108 {offsets = [270, 0], sizes = [16, 256], strides = [1, 1]} : vector<288x256xf32> to vector<16x256xf32>
    %230 = vector.extract_strided_slice %3 {offsets = [240, 0], sizes = [16, 256], strides = [1, 1]} : vector<256x256xf32> to vector<16x256xf32>
    %231 = arith.addf %229, %230 : vector<16x256xf32>
    %cst_122 = arith.constant 0.000000e+00 : f32
    %232 = vector.broadcast %cst_122 : f32 to vector<16x256xf32>
    %233 = arith.maximumf %231, %232 : vector<16x256xf32>
    %c0_123 = arith.constant 0 : index
    %c240 = arith.constant 240 : index
    %c0_124 = arith.constant 0 : index
    %234 = vector.load %arg8[%c0_123, %c240, %c0_124] : memref<1x256x256xf32, #tpu.memory_space<vmem>>, vector<1x16x256xf32>
    %235 = vector.shape_cast %234 : vector<1x16x256xf32> to vector<16x256xf32>
    %236 = vector.shape_cast %233 : vector<16x256xf32> to vector<1x16x256xf32>
    tpu.vector_store %arg8[%c0_123, %c240, %c0_124], %236 {strides = array<i32>} : memref<1x256x256xf32, #tpu.memory_space<vmem>>, vector<1x16x256xf32>,
    return
  }
  func.func @transform_0(%arg0: i32) -> (i32, i32, i32) {
    %c0_i32 = arith.constant 0 : i32
    %c0_i32_0 = arith.constant 0 : i32
    %c0_i32_1 = arith.constant 0 : i32
    return %arg0, %c0_i32, %c0_i32_0 : i32, i32, i32
  }
  func.func @transform_1(%arg0: i32) -> (i32, i32) {
    %c0_i32 = arith.constant 0 : i32
    %c0_i32_0 = arith.constant 0 : i32
    %c0_i32_1 = arith.constant 0 : i32
    return %c0_i32, %c0_i32_0 : i32, i32
  }
  func.func @transform_2(%arg0: i32) -> (i32, i32) {
    %c0_i32 = arith.constant 0 : i32
    %c0_i32_0 = arith.constant 0 : i32
    %c0_i32_1 = arith.constant 0 : i32
    return %c0_i32, %c0_i32_0 : i32, i32
  }
  func.func @transform_3(%arg0: i32) -> (i32, i32, i32) {
    %c0_i32 = arith.constant 0 : i32
    %c0_i32_0 = arith.constant 0 : i32
    %c0_i32_1 = arith.constant 0 : i32
    %c0_i32_2 = arith.constant 0 : i32
    return %c0_i32, %c0_i32_0, %c0_i32_1 : i32, i32, i32
  }
  func.func @transform_4(%arg0: i32) -> (i32, i32) {
    %c0_i32 = arith.constant 0 : i32
    %c0_i32_0 = arith.constant 0 : i32
    %c0_i32_1 = arith.constant 0 : i32
    return %c0_i32, %c0_i32_0 : i32, i32
  }
  func.func @transform_5(%arg0: i32) -> (i32, i32) {
    %c0_i32 = arith.constant 0 : i32
    %c0_i32_0 = arith.constant 0 : i32
    %c0_i32_1 = arith.constant 0 : i32
    return %c0_i32, %c0_i32_0 : i32, i32
  }
  func.func @transform_6(%arg0: i32) -> (i32, i32) {
    %c0_i32 = arith.constant 0 : i32
    %c0_i32_0 = arith.constant 0 : i32
    %c0_i32_1 = arith.constant 0 : i32
    return %c0_i32, %c0_i32_0 : i32, i32
  }
  func.func @transform_7(%arg0: i32) -> (i32, i32, i32) {
    %c0_i32 = arith.constant 0 : i32
    %c0_i32_0 = arith.constant 0 : i32
    %c0_i32_1 = arith.constant 0 : i32
    return %arg0, %c0_i32, %c0_i32_0 : i32, i32, i32
  }
}

</mosaic_0001>

<bundles_post_ra>
// kernel: bottleneck_forward.1
= control target key start
LH: loop header
LB: loop body
LE: loop exit
PB: predicated region body
PF: predicated region fallthrough
CT: control target
= control target key end

     0   :  { %s6771_s0 = inlined_call_operand.hbm [shape: f32[2,256,256], index: 0, kind: input, shape index: {}]   ;;  %s6772_s1 = inlined_call_operand.hbm [shape: bf16[256,128], index: 1, kind: input, shape index: {}]   ;;  %s6773_s2 = inlined_call_operand.vmem [shape: f32[1,128], index: 2, kind: input, shape index: {}]   ;;  %s6774_s3 = inlined_call_operand.hbm [shape: bf16[9,128,128], index: 3, kind: input, shape index: {}]   ;;  %s6775_s4 = inlined_call_operand.vmem [shape: f32[1,128], index: 4, kind: input, shape index: {}]   ;;  %s6776_s5 = inlined_call_operand.hbm [shape: bf16[128,256], index: 5, kind: input, shape index: {}]   ;;  %s6777_s6 = inlined_call_operand.vmem [shape: f32[1,256], index: 6, kind: input, shape index: {}]   ;;  %s6778_s7 = inlined_call_operand.hbm [shape: f32[2,256,256], index: 7, kind: output, shape index: {}]  }
   0x1   :  { %6780 = sst [smem:[#allocation27_spill]] %s6772_s1 }
   0x2   :  { %12 = vsyncpa [#allocation4], 0 }
   0x3   :  { %14 = vsyncpa [#allocation4 + $0x1], 0 }
   0x4   :  { %15 = vsyncpa [#allocation7], 0 }
   0x5   :  { %16 = vsyncpa [#allocation10], 0 }
   0x6   :  { %17 = vsyncpa [#allocation5], 0 }
   0x7   :  { %19 = vsyncpa [#allocation5 + $0x1], 0  ;;  %s5266_s24 = smov 0   ;;  %s5268_s25 = smov 0  }
   0x8   :  { %s5270_s26 = smov 0   ;;  %s5272_s27 = smov 0  }
   0x9 LB: > { %s5287_s28 = sadd.s32 4294967295, %s5211_s27   ;;  %s4298_s29 = sadd.s32 4294967294, %s5211_s27   ;;  %s5211_s27 = sphi %s5272_s27, %s6815_s27   ;;  %s5207_s26 = sphi %s5270_s26, %s6814_s26   ;;  %s5203_s25 = sphi %s5268_s25, %s6813_s25   ;;  %s5199_s24 = sphi %s5266_s24, %s6812_s24  }
   0xa   : > { %p45_p0 = scmp.ne.s32.totalorder %s5203_s25, %s5199_s24  ;;  %p46_p1 = scmp.eq.s32.totalorder %s5287_s28, 0 }
   0xb   : > { %p195_p2 = scmp.eq.s32.totalorder %s5287_s28, 1  ;;  %p201_p3 = scmp.eq.s32.totalorder %s4298_s29, 1 }
   0xc   : > { %p5296_p4 = por %p46_p1, %p45_p0  ;;  %p4299_p5 = scmp.ge.s32.totalorder %s5211_s27, 1 }
   0xd   : > { %p5301_p6 = por %p201_p3, %p45_p0  ;;  %p208_p7 = scmp.lt.s32.totalorder %s5211_s27, 3 }
   0xe   : > { %s6783_s1 = sld [smem:[#allocation27_spill]]  ;;  %s5213_s13 = smov [#allocation6]  }
   0xf   : > { %p5309_p8 = pnand %p4299_p5, %p208_p7  ;;  %s221_s14 = sshll.u32 %s5213_s13, 4  ;;  %s222_s14 = int_to_ptr.vmem [resolvable:$true] %s221_s14 }
  0x10   : > { %s236_s18 = sshll.u32 %s6774_s3, 4  ;;  %s5214_s19 = smov 64   ;;  %s237_s18 = int_to_ptr.hbm [resolvable:$true] %s236_s18 }
  0x11   : > { %p4880_p9 = pneg %p5309_p8  ;;  %s5215_s20 = smov 4  }
  0x12   : > { %s5216_s21 = smov [#allocation8]   ;;  %s253_s9 = sshll.u32 %s6776_s5, 4  ;;  %s254_s9 = int_to_ptr.hbm [resolvable:$true] %s253_s9 }
  0x13   : > { %p5317_p10 = pnand %p4880_p9, %p46_p1  ;;  %s238_s22 = sshll.u32 %s5216_s21, 4  ;;  %s239_s22 = int_to_ptr.vmem [resolvable:$true] %s238_s22 }
  0x14   : > { %s219_s11 = sshll.u32 %s6783_s1, 4  ;;  %s5217_s10 = smov [#allocation9]   ;;  %s220_s11 = int_to_ptr.hbm [resolvable:$true] %s219_s11 }
  0x15   : > { %4883 = dma.hbm_to_vmem [thread:$0]  (!%p5317_p10), %s220_s11, 2048, %s222_s14, [#allocation7], %s5214_s19, %s5214_s19, %s5215_s20  }
  0x16   : > { %4886 = dma.hbm_to_vmem [thread:$0]  (!%p5317_p10), %s237_s18, 9216, %s239_s22, [#allocation7], %s5214_s19, %s5214_s19, %s5215_s20  }
  0x17   : > { %s255_s13 = sshll.u32 %s5217_s10, 4  ;;  %s5218_s11 = smov 128   ;;  %s256_s13 = int_to_ptr.vmem [resolvable:$true] %s255_s13 }
  0x18   : > { %s5219_s14 = smov 8   ;;  %s5335_s16 = sadd.s32 1, %s5211_s27  }
  0x19   : > { %4889 = dma.hbm_to_vmem [thread:$0]  (!%p5317_p10), %s254_s9, 2048, %s256_s13, [#allocation10], %s5218_s11, %s5218_s11, %s5219_s14  }
  0x1a   : > { %s29_s17 = ssub.s32 %s5211_s27, %s5335_s16  ;;  %s32_s21 = sadd.s32 1, %s5207_s26 }
  0x1b   : > { %p30_p12 = scmp.eq.s32.totalorder %s29_s17, 0  ;;  %p39_p13 = scmp.ne.s32.totalorder %s5207_s26, %s5203_s25 }
  0x1c   : > { %p40_p0 = scmp.eq.s32.totalorder %s5211_s27, 0  ;;  %p4901_p3 = scmp.lt.s32.totalorder %s5211_s27, 2 }
  0x1d   : > { %s5345_s18 = scalar_select %p30_p12, %s5207_s26, %s32_s21  }
  0x1e   : > { %p41_p5 = por %p40_p0, %p39_p13  ;;  %p5349_p7 = por %p195_p2, %p39_p13 }
  0x1f   : > { %s272_s15 = sand.u32 1, %s5207_s26   ;;  %s4734_s20 = sshll.u32 %s5211_s27, 9 }
  0x20   : > { %s4304_s22 = sshll.u32 %s272_s15, 9  ;;  %s281_s9 = scalar_lea.hbm %s6771_s0, %s4734_s20 }
  0x21   : > { %s282_s10 = sshll.u32 %s281_s9, 4  ;;  %s276_s13 = scalar_lea.vmem [#allocation3], %s4304_s22  ;;  %s283_s10 = int_to_ptr.hbm [resolvable:$true] %s282_s10 }
  0x22   : > { %s284_s11 = sshll.u32 %s276_s13, 4  ;;  %p5360_p9 = pnand %p4901_p3, %p41_p5  ;;  %s285_s11 = int_to_ptr.vmem [resolvable:$true] %s284_s11 }
  0x23   : > { %s273_s17 = scalar_lea.sflag [#allocation4], %s272_s15  ;;  %s5107_s21 = sshra.s32 %s283_s10, 4  ;;  %s5108_s21 = int_to_ptr.hbm [resolvable:$true] %s5107_s21 }
  0x24   : > { %s5109_s1 = scalar_lea.hbm %s5108_s21, 512  ;;  %p5111_p10 = pneg %p5360_p9 }
  0x25   : > { %p5110_p2 = scmp.ne.s32.totalorder %s5108_s21, %s5109_s1  ;;  %s5114_s23 = scalar_lea.hbm %s6771_s0, 1024 }
  0x26   : > { %p5115_p0 = scmp.lt.s32.totalorder %s5108_s21, %s6771_s0  ;;  %p5116_p3 = scmp.lt.s32.totalorder %s5114_s23, %s5109_s1 }
  0x27   : > { %p5112_p12 = pnand %p5111_p10, %p5110_p2 }
  0x28   : > { %p5117_p5 = por %p5116_p3, %p5115_p0 }
  0x29   : > { %p5113_p13 = pneg %p5112_p12 }
  0x2b   : > { %p5118_p11 = pnand %p5117_p5, %p5113_p13 }
  0x2d   : > { %5121 = shalt.err (!%p5118_p11)
}
  0x2e   : > { %s5220_s15 = smov 256   ;;  %s5221_s13 = smov 16  }
  0x2f   : > { %4893 = dma.hbm_to_vmem [thread:$0]  (!%p5360_p9), %s283_s10, 8192, %s285_s11, %s273_s17, %s5220_s15, %s5220_s15, %s5221_s13  }
  0x30   : > { %296 = sbr.rel (%p5309_p8) target bundleno = 1468 (0x5bc), region = 48 }
  0x35   : > { %s5377_s20 = sand.u32 1, %s5203_s25  }
  0x36   : > { %s4308_s21 = sshll.u32 %s5377_s20, 9  ;;  %s299_s1 = scalar_lea.sflag [#allocation4], %s5377_s20 }
  0x37   : > { %s5383_s22 = scalar_lea.vmem [#allocation3], %s4308_s21 }
  0x38   : > { %5182 = dma.done.wait (%p5296_p4), %s299_s1, 8192  }
  0x39   : > { %5184 = vsyncadd (%p5296_p4), %s299_s1, 4294959104 }
  0x3a   : > { %5186 = dma.done.wait (%p46_p1), [#allocation7], 11264  }
  0x3b   : > { %5188 = vsyncadd (%p46_p1), [#allocation7], 4294956032 }
  0x3c   : > { %5190 = dma.done.wait (%p46_p1), [#allocation10], 2048  }
  0x3d   : > { %5192 = vsyncadd (%p46_p1), [#allocation10], 4294965248  ;;  %v5222_v0 = vmov 0.0   ;;  %v4742_v1 = vld [vmem:[#allocation6 + $0x38] sm:$0xff]  ;;  %v4741_v2 = vld [vmem:[#allocation6 + $0x30] sm:$0xff]  ;;  %vm3521_vm0 = vcmask 1041408  }
  0x3e   : > { %349 = vst [vmem:[#allocation2] sm:$0xff] %v5222_v0  ;;  %4840 = vmatpush.bf16.msra.mxu1 %v4742_v1  ;;  %620 = vmatpush.bf16.msra.mxu0 %v4742_v1  ;;  %v4740_v3 = vld [vmem:[#allocation6 + $0x28] sm:$0xff]  ;;  %v4739_v4 = vld [vmem:[#allocation6 + $0x20] sm:$0xff]  ;;  %v4738_v5 = vld [vmem:[#allocation6 + $0x18] sm:$0xff]  ;;  %s6194_s9 = scalar_lea.vmem [#allocation11], %s4308_s21  ;;  %vm3575_vm1 = vcmask 1043456  }
  0x3f   : > { %350 = vst [vmem:[#allocation2 + $0x8] sm:$0xff] %v5222_v0  ;;  %4842 = vmatpush.bf16.msra.mxu3 %v4742_v1  ;;  %4841 = vmatpush.bf16.msra.mxu2 %v4742_v1  ;;  %v4737_v6 = vld [vmem:[#allocation6 + $0x10] sm:$0xff]  ;;  %v4736_v7 = vld [vmem:[#allocation6 + $0x8] sm:$0xff]  ;;  %v4735_v8 = vld [vmem:[#allocation6] sm:$0xff]  ;;  %vm3552_vm2 = vcmask 1045504   ;;  %s4839_s15 = sshll.u32 %s5287_s28, 9 }
  0x40   : > { %351 = vst [vmem:[#allocation2 + $0x10] sm:$0xff] %v5222_v0  ;;  %v408_v9 = vld [vmem:[%s5383_s22 + $0x80] sm:$0xff]  ;;  %v410_v10 = vld [vmem:[%s5383_s22 + $0x90] sm:$0xff]  ;;  %v4750_v11 = vld [vmem:[#allocation6 + $0x78] sm:$0xff]  ;;  %s4192_s1 = scalar_lea.hbm %s6778_s7, %s4839_s15  ;;  %s4193_s28 = sshll.u32 %s6194_s9, 4  ;;  %s4194_s28 = int_to_ptr.vmem [resolvable:$true] %s4193_s28 }
  0x41   : > { %352 = vst [vmem:[#allocation2 + $0x18] sm:$0xff] %v5222_v0  ;;  %v464_v12 = vpack.c.bf16 %v410_v10, %v408_v9  ;;  %v4749_v13 = vld [vmem:[#allocation6 + $0x70] sm:$0xff]  ;;  %v4748_v14 = vld [vmem:[#allocation6 + $0x68] sm:$0xff]  ;;  %v4747_v15 = vld [vmem:[#allocation6 + $0x60] sm:$0xff]  ;;  %s4181_s30 = scalar_lea.sflag [#allocation5], %s5377_s20  ;;  %s5157_s17 = scalar_lea.hbm %s6778_s7, 1024 }
  0x42   : > { %353 = vst [vmem:[#allocation2 + $0x20] sm:$0xff] %v5222_v0  ;;  %4843 = vmatpush.bf16.msra.mxu1 %v4741_v2  ;;  %621 = vmatpush.bf16.msra.mxu0 %v4741_v2  ;;  %v412_v16 = vld [vmem:[%s5383_s22 + $0xa0] sm:$0xff]  ;;  %v414_v17 = vld [vmem:[%s5383_s22 + $0xb0] sm:$0xff]  ;;  %v4746_v19 = vld [vmem:[#allocation6 + $0x58] sm:$0xff] }
  0x43   : > { %354 = vst [vmem:[#allocation2 + $0x28] sm:$0xff] %v5222_v0  ;;  %4845 = vmatpush.bf16.msra.mxu3 %v4741_v2  ;;  %4844 = vmatpush.bf16.msra.mxu2 %v4741_v2  ;;  %v466_v18 = vpack.c.bf16 %v414_v17, %v412_v16  ;;  %v4745_v20 = vld [vmem:[#allocation6 + $0x50] sm:$0xff]  ;;  %v416_v21 = vld [vmem:[%s5383_s22 + $0xc0] sm:$0xff]  ;;  %v4744_v24 = vld [vmem:[#allocation6 + $0x48] sm:$0xff] }
  0x44   : > { %355 = vst [vmem:[#allocation2 + $0x30] sm:$0xff] %v5222_v0  ;;  %v418_v22 = vld [vmem:[%s5383_s22 + $0xd0] sm:$0xff]  ;;  %v420_v25 = vld [vmem:[%s5383_s22 + $0xe0] sm:$0xff]  ;;  %v393_v44 = vld [vmem:[%s5383_s22 + $0x8] sm:$0xff] }
  0x45   : > { %356 = vst [vmem:[#allocation2 + $0x38] sm:$0xff] %v5222_v0  ;;  %v468_v23 = vpack.c.bf16 %v418_v22, %v416_v21  ;;  %v422_v26 = vld [vmem:[%s5383_s22 + $0xf0] sm:$0xff]  ;;  %v4743_v28 = vld [vmem:[#allocation6 + $0x40] sm:$0xff]  ;;  %v395_v45 = vld [vmem:[%s5383_s22 + $0x18] sm:$0xff] }
  0x46   : > { %357 = vst [vmem:[#allocation2 + $0x40] sm:$0xff] %v5222_v0  ;;  %4846 = vmatpush.bf16.msra.mxu1 %v4740_v3  ;;  %622 = vmatpush.bf16.msra.mxu0 %v4740_v3  ;;  %v470_v27 = vpack.c.bf16 %v422_v26, %v420_v25  ;;  %v392_v29 = vld [vmem:[%s5383_s22] sm:$0xff]  ;;  %v394_v30 = vld [vmem:[%s5383_s22 + $0x10] sm:$0xff]  ;;  %v457_v46 = vpack.c.bf16 %v395_v45, %v393_v44  ;;  %v397_v47 = vld [vmem:[%s5383_s22 + $0x28] sm:$0xff] }
  0x47   : > { %358 = vst [vmem:[#allocation2 + $0x48] sm:$0xff] %v5222_v0  ;;  %4848 = vmatpush.bf16.msra.mxu3 %v4740_v3  ;;  %4847 = vmatpush.bf16.msra.mxu2 %v4740_v3  ;;  %v456_v31 = vpack.c.bf16 %v394_v30, %v392_v29  ;;  %v424_v32 = vld [vmem:[%s5383_s22 + $0x100] sm:$0xff]  ;;  %v426_v33 = vld [vmem:[%s5383_s22 + $0x110] sm:$0xff]  ;;  %v399_v48 = vld [vmem:[%s5383_s22 + $0x38] sm:$0xff] }
  0x48   : > { %359 = vst [vmem:[#allocation2 + $0x50] sm:$0xff] %v5222_v0  ;;  %v472_v34 = vpack.c.bf16 %v426_v33, %v424_v32  ;;  %v396_v35 = vld [vmem:[%s5383_s22 + $0x20] sm:$0xff]  ;;  %v398_v36 = vld [vmem:[%s5383_s22 + $0x30] sm:$0xff]  ;;  %v459_v51 = vpack.c.bf16 %v399_v48, %v397_v47  ;;  %v401_v53 = vld [vmem:[%s5383_s22 + $0x48] sm:$0xff] }
  0x49   : > { %360 = vst [vmem:[#allocation2 + $0x58] sm:$0xff] %v5222_v0  ;;  %v458_v37 = vpack.c.bf16 %v398_v36, %v396_v35  ;;  %v428_v38 = vld [vmem:[%s5383_s22 + $0x120] sm:$0xff]  ;;  %v430_v39 = vld [vmem:[%s5383_s22 + $0x130] sm:$0xff]  ;;  %v403_v54 = vld [vmem:[%s5383_s22 + $0x58] sm:$0xff] }
  0x4a   : > { %361 = vst [vmem:[#allocation2 + $0x60] sm:$0xff] %v5222_v0  ;;  %4849 = vmatpush.bf16.msra.mxu1 %v4739_v4  ;;  %623 = vmatpush.bf16.msra.mxu0 %v4739_v4  ;;  %v474_v40 = vpack.c.bf16 %v430_v39, %v428_v38  ;;  %v400_v41 = vld [vmem:[%s5383_s22 + $0x40] sm:$0xff]  ;;  %v402_v42 = vld [vmem:[%s5383_s22 + $0x50] sm:$0xff]  ;;  %v461_v57 = vpack.c.bf16 %v403_v54, %v401_v53  ;;  %v405_v61 = vld [vmem:[%s5383_s22 + $0x68] sm:$0xff] }
  0x4b   : > { %362 = vst [vmem:[#allocation2 + $0x68] sm:$0xff] %v5222_v0  ;;  %4851 = vmatpush.bf16.msra.mxu3 %v4739_v4  ;;  %4850 = vmatpush.bf16.msra.mxu2 %v4739_v4  ;;  %v460_v43 = vpack.c.bf16 %v402_v42, %v400_v41  ;;  %v404_v49 = vld [vmem:[%s5383_s22 + $0x60] sm:$0xff]  ;;  %v406_v50 = vld [vmem:[%s5383_s22 + $0x70] sm:$0xff]  ;;  %v407_v62 = vld [vmem:[%s5383_s22 + $0x78] sm:$0xff] }
  0x4c   : > { %363 = vst [vmem:[#allocation2 + $0x70] sm:$0xff] %v5222_v0  ;;  %v462_v52 = vpack.c.bf16 %v406_v50, %v404_v49  ;;  %v440_v55 = vld [vmem:[%s5383_s22 + $0x180] sm:$0xff]  ;;  %v442_v56 = vld [vmem:[%s5383_s22 + $0x190] sm:$0xff]  ;;  %v463_v1 = vpack.c.bf16 %v407_v62, %v405_v61  ;;  %v411_v9 = vld [vmem:[%s5383_s22 + $0x98] sm:$0xff] }
  0x4d   : > { %364 = vst [vmem:[#allocation2 + $0x78] sm:$0xff] %v5222_v0  ;;  %v480_v58 = vpack.c.bf16 %v442_v56, %v440_v55  ;;  %v444_v63 = vld [vmem:[%s5383_s22 + $0x1a0] sm:$0xff]  ;;  %v4758_v10 = vld [vmem:[#allocation8 + $0x38] sm:$0xff]  ;;  %v4757_v17 = vld [vmem:[#allocation8 + $0x30] sm:$0xff]  ;;  %v5223_v55 = vmov 0.0|0.0  }
  0x4e   : > { %365 = vst [vmem:[#allocation2 + $0x80] sm:$0xff] %v5222_v0  ;;  %4852 = vmatpush.bf16.msra.mxu1 %v4738_v5  ;;  %624 = vmatpush.bf16.msra.mxu0 %v4738_v5  ;;  %v4766_v16 = vld [vmem:[#allocation8 + $0x78] sm:$0xff]  ;;  %v4764_v22 = vld [vmem:[#allocation8 + $0x68] sm:$0xff]  ;;  %v4763_v25 = vld [vmem:[#allocation8 + $0x60] sm:$0xff] }
  0x4f   : > { %366 = vst [vmem:[#allocation2 + $0x88] sm:$0xff] %v5222_v0  ;;  %4854 = vmatpush.bf16.msra.mxu3 %v4738_v5  ;;  %4853 = vmatpush.bf16.msra.mxu2 %v4738_v5  ;;  %v432_v5 = vld [vmem:[%s5383_s22 + $0x140] sm:$0xff]  ;;  %v413_v29 = vld [vmem:[%s5383_s22 + $0xa8] sm:$0xff]  ;;  %v415_v30 = vld [vmem:[%s5383_s22 + $0xb8] sm:$0xff] }
  0x50   : > { %367 = vst [vmem:[#allocation2 + $0x90] sm:$0xff] %v5222_v0  ;;  %v436_v26 = vld [vmem:[%s5383_s22 + $0x160] sm:$0xff]  ;;  %v4772_v32 = vld [vmem:[#allocation8 + $0xa8] sm:$0xff]  ;;  %v454_v35 = vld [vmem:[%s5383_s22 + $0x1f0] sm:$0xff] }
  0x51   : > { %368 = vst [vmem:[#allocation2 + $0x98] sm:$0xff] %v5222_v0  ;;  %v452_v33 = vld [vmem:[%s5383_s22 + $0x1e0] sm:$0xff]  ;;  %v4762_v38 = vld [vmem:[#allocation8 + $0x58] sm:$0xff]  ;;  %v4753_v39 = vld [vmem:[#allocation8 + $0x10] sm:$0xff] }
  0x52   : > { %369 = vst [vmem:[#allocation2 + $0xa0] sm:$0xff] %v5222_v0  ;;  %4855 = vmatpush.bf16.msra.mxu1 %v4737_v6  ;;  %625 = vmatpush.bf16.msra.mxu0 %v4737_v6  ;;  %v4761_v41 = vld [vmem:[#allocation8 + $0x50] sm:$0xff]  ;;  %v4752_v42 = vld [vmem:[#allocation8 + $0x8] sm:$0xff]  ;;  %v4759_v48 = vld [vmem:[#allocation8 + $0x40] sm:$0xff] }
  0x53   : > { %370 = vst [vmem:[#allocation2 + $0xa8] sm:$0xff] %v5222_v0  ;;  %4857 = vmatpush.bf16.msra.mxu3 %v4737_v6  ;;  %4856 = vmatpush.bf16.msra.mxu2 %v4737_v6  ;;  %v434_v6 = vld [vmem:[%s5383_s22 + $0x150] sm:$0xff]  ;;  %v4760_v45 = vld [vmem:[#allocation8 + $0x48] sm:$0xff]  ;;  %v419_v50 = vld [vmem:[%s5383_s22 + $0xd8] sm:$0xff] }
  0x54   : > { %371 = vst [vmem:[#allocation2 + $0xb0] sm:$0xff] %v5222_v0  ;;  %v4769_v47 = vld [vmem:[#allocation8 + $0x90] sm:$0xff]  ;;  %v417_v49 = vld [vmem:[%s5383_s22 + $0xc8] sm:$0xff] }
  0x55   : > { %372 = vst [vmem:[#allocation2 + $0xb8] sm:$0xff] %v5222_v0  ;;  %v1120_v53 = vld [vmem:[#allocation2 + $0x9] sm:$0xff]  ;;  %v469_v54 = vpack.c.bf16 %v419_v50, %v417_v49 }
  0x56   : > { %373 = vst [vmem:[#allocation2 + $0xc0] sm:$0xff] %v5222_v0  ;;  %4858 = vmatpush.bf16.msra.mxu1 %v4736_v7  ;;  %626 = vmatpush.bf16.msra.mxu0 %v4736_v7  ;;  %v1373_v61 = vld [vmem:[#allocation2 + $0x2] sm:$0xff]  ;;  %v1374_v62 = vld [vmem:[#allocation2 + $0xa] sm:$0xff] }
  0x57   : > { %374 = vst [vmem:[#allocation2 + $0xc8] sm:$0xff] %v5222_v0  ;;  %4860 = vmatpush.bf16.msra.mxu3 %v4736_v7  ;;  %4859 = vmatpush.bf16.msra.mxu2 %v4736_v7  ;;  %v476_v7 = vpack.c.bf16 %v434_v6, %v432_v5  ;;  %v423_v5 = vld [vmem:[%s5383_s22 + $0xf8] sm:$0xff] }
  0x58   : > { %375 = vst [vmem:[#allocation2 + $0xd0] sm:$0xff] %v5222_v0 }
  0x59   : > { %376 = vst [vmem:[#allocation2 + $0xd8] sm:$0xff] %v5222_v0 }
  0x5a   : > { %377 = vst [vmem:[#allocation2 + $0xe0] sm:$0xff] %v5222_v0  ;;  %4861 = vmatpush.bf16.msra.mxu1 %v4735_v8  ;;  %627 = vmatpush.bf16.msra.mxu0 %v4735_v8 }
  0x5b   : > { %378 = vst [vmem:[#allocation2 + $0xe8] sm:$0xff] %v5222_v0  ;;  %4863 = vmatpush.bf16.msra.mxu3 %v4735_v8  ;;  %4862 = vmatpush.bf16.msra.mxu2 %v4735_v8  ;;  %v409_v8 = vld [vmem:[%s5383_s22 + $0x88] sm:$0xff] }
  0x5c   : > { %379 = vst [vmem:[#allocation2 + $0xf0] sm:$0xff] %v5222_v0 }
  0x5d   : > { %380 = vst [vmem:[#allocation2 + $0xf8] sm:$0xff] %v5222_v0  ;;  %648 = vmatmul.bf16.vlgmr.msra.gmra.mxu1 %v464_v12  ;;  %628 = vmatmul.bf16.vlgmr.msra.gmra.mxu0 %v456_v31  ;;  %v450_v12 = vld [vmem:[%s5383_s22 + $0x1d0] sm:$0xff]  ;;  %v4754_v31 = vld [vmem:[#allocation8 + $0x18] sm:$0xff] }
  0x5e   : > { %381 = vst [vmem:[#allocation2 + $0x100] sm:$0xff] %v5222_v0  ;;  %709 = vmatpush.bf16.msrb.mxu1 %v4750_v11  ;;  %688 = vmatmul.bf16.vlgmr.msra.gmra.mxu3 %v480_v58  ;;  %v448_v11 = vld [vmem:[%s5383_s22 + $0x1c0] sm:$0xff] }
  0x5f   : > { %382 = vst [vmem:[#allocation2 + $0x108] sm:$0xff] %v5222_v0  ;;  %678 = vmatmul.bf16.vlgmr.msra.gmra.mxu2 %v476_v7  ;;  %1238 = vmatpush.bf16.msrb.mxu3 %v4766_v16  ;;  %v4767_v58 = vld [vmem:[#allocation8 + $0x80] sm:$0xff] }
  0x60   : > { %383 = vst [vmem:[#allocation2 + $0x110] sm:$0xff] %v5222_v0  ;;  %984 = vmatpush.bf16.msrb.mxu2 %v4758_v10 }
  0x61   : > { %384 = vst [vmem:[#allocation2 + $0x118] sm:$0xff] %v5222_v0 }
  0x62   : > { %385 = vst [vmem:[#allocation2 + $0x120] sm:$0xff] %v5222_v0  ;;  %710 = vmatpush.bf16.msrb.mxu1 %v4749_v13  ;;  %v465_v13 = vpack.c.bf16 %v411_v9, %v409_v8 }
  0x63   : > { %386 = vst [vmem:[#allocation2 + $0x128] sm:$0xff] %v5222_v0 }
  0x64   : > { %387 = vst [vmem:[#allocation2 + $0x130] sm:$0xff] %v5222_v0  ;;  %985 = vmatpush.bf16.msrb.mxu2 %v4757_v17 }
  0x65   : > { %388 = vst [vmem:[#allocation2 + $0x138] sm:$0xff] %v5222_v0 }
  0x66   : > { %389 = vst [vmem:[#allocation2 + $0x140] sm:$0xff] %v5222_v0  ;;  %711 = vmatpush.bf16.msrb.mxu1 %v4748_v14  ;;  %v446_v0 = vld [vmem:[%s5383_s22 + $0x1b0] sm:$0xff]  ;;  %v484_v14 = vpack.c.bf16 %v450_v12, %v448_v11  ;;  %v5513_v11 = vld [vmem:[%s6773_s2] ss:$0 sm:$0xff] }
  0x67   : > { %v482_v2 = vpack.c.bf16 %v446_v0, %v444_v63  ;;  %v1409_v63 = vpack.c.bf16 %v1374_v62, %v1373_v61  ;;  %v4790_v0 = vld [vmem:[#allocation8 + $0x138] sm:$0xff]  ;;  %v425_v12 = vld [vmem:[%s5383_s22 + $0x108] sm:$0xff] }
  0x6a   : > { %712 = vmatpush.bf16.msrb.mxu1 %v4747_v15 }
  0x6d   : > { %653 = vmatmul.bf16.gmra.mxu1 %v466_v18  ;;  %633 = vmatmul.bf16.gmra.mxu0 %v458_v37  ;;  %v4765_v18 = vld [vmem:[#allocation8 + $0x70] sm:$0xff]  ;;  %v486_v37 = vpack.c.bf16 %v454_v35, %v452_v33 }
  0x6e   : > { %713 = vmatpush.bf16.msrb.mxu1 %v4746_v19  ;;  %693 = vmatmul.bf16.gmra.mxu3 %v482_v2  ;;  %v4756_v19 = vld [vmem:[#allocation8 + $0x28] sm:$0xff] }
  0x6f   : > { %1239 = vmatpush.bf16.msrb.mxu3 %v4765_v18  ;;  %986 = vmatpush.bf16.msrb.mxu2 %v4756_v19  ;;  %v421_v2 = vld [vmem:[%s5383_s22 + $0xe8] sm:$0xff] }
  0x70   : > { %v471_v7 = vpack.c.bf16 %v423_v5, %v421_v2 }
  0x72   : > { %714 = vmatpush.bf16.msrb.mxu1 %v4745_v20  ;;  %v4774_v20 = vld [vmem:[#allocation8 + $0xb8] sm:$0xff] }
  0x73   : > { %1492 = vmatpush.bf16.msrb.mxu0 %v4774_v20  ;;  %1240 = vmatpush.bf16.msrb.mxu3 %v4764_v22 }
  0x76   : > { %715 = vmatpush.bf16.msrb.mxu1 %v4744_v24  ;;  %v4773_v24 = vld [vmem:[#allocation8 + $0xb0] sm:$0xff] }
  0x77   : > { %1493 = vmatpush.bf16.msrb.mxu0 %v4773_v24  ;;  %1241 = vmatpush.bf16.msrb.mxu3 %v4763_v25 }
  0x7a   : > { %716 = vmatpush.bf16.msrb.mxu1 %v4743_v28 }
  0x7b   : > { %1494 = vmatpush.bf16.msrb.mxu0 %v4772_v32  ;;  %1242 = vmatpush.bf16.msrb.mxu3 %v4762_v38 }
  0x7d   : > { %658 = vmatmul.bf16.gmra.mxu1 %v468_v23  ;;  %638 = vmatmul.bf16.gmra.mxu0 %v460_v43  ;;  %v4755_v23 = vld [vmem:[#allocation8 + $0x20] sm:$0xff]  ;;  %v4770_v43 = vld [vmem:[#allocation8 + $0x98] sm:$0xff] }
  0x7e   : > { %698 = vmatmul.bf16.gmra.mxu3 %v484_v14  ;;  %987 = vmatpush.bf16.msrb.mxu2 %v4755_v23 }
  0x7f   : > { %1243 = vmatpush.bf16.msrb.mxu3 %v4761_v41 }
  0x82   : > { %988 = vmatpush.bf16.msrb.mxu2 %v4754_v31  ;;  %v4789_v31 = vld [vmem:[#allocation8 + $0x130] sm:$0xff] }
  0x83   : > { %1244 = vmatpush.bf16.msrb.mxu3 %v4760_v45 }
  0x86   : > { %989 = vmatpush.bf16.msrb.mxu2 %v4753_v39 }
  0x87   : > { %1245 = vmatpush.bf16.msrb.mxu3 %v4759_v48 }
  0x8a   : > { %990 = vmatpush.bf16.msrb.mxu2 %v4752_v42 }
  0x8d   : > { %663 = vmatmul.bf16.gmra.mxu1 %v470_v27  ;;  %643 = vmatmul.bf16.gmra.mxu0 %v462_v52  ;;  %v438_v27 = vld [vmem:[%s5383_s22 + $0x170] sm:$0xff] }
  0x8e   : > { %v478_v28 = vpack.c.bf16 %v438_v27, %v436_v26  ;;  %703 = vmatmul.bf16.gmra.mxu3 %v486_v37  ;;  %v1119_v52 = vld [vmem:[#allocation2 + $0x1] sm:$0xff] }
  0x8f   : > { %v1155_v56 = vpack.c.bf16 %v1120_v53, %v1119_v52  ;;  %v429_v27 = vld [vmem:[%s5383_s22 + $0x128] sm:$0xff]  ;;  %v435_v53 = vld [vmem:[%s5383_s22 + $0x158] sm:$0xff] }
  0x90   : > { %683 = vmatmul.bf16.gmra.mxu2 %v478_v28  ;;  %v431_v28 = vld [vmem:[%s5383_s22 + $0x138] sm:$0xff]  ;;  %v433_v52 = vld [vmem:[%s5383_s22 + $0x148] sm:$0xff] }
  0x91   : > { %v475_v32 = vpack.c.bf16 %v431_v28, %v429_v27  ;;  %v4788_v27 = vld [vmem:[#allocation8 + $0x128] sm:$0xff] }
  0x9d   : > { %668 = vmatmul.bf16.gmra.mxu1 %v472_v34  ;;  %v467_v34 = vpack.c.bf16 %v415_v30, %v413_v29  ;;  %v4782_v30 = vld [vmem:[#allocation8 + $0xf8] sm:$0xff] }
  0x9e   : > { %1246 = vmatmul.bf16.vlgmr.msrb.gmra.mxu3 %v1155_v56  ;;  %1746 = vmatpush.bf16.msra.mxu1 %v4782_v30 }
  0xad   : > { %673 = vmatmul.bf16.gmra.mxu1 %v474_v40  ;;  %v4771_v40 = vld [vmem:[#allocation8 + $0xa0] sm:$0xff] }
  0xae   : > { %1495 = vmatpush.bf16.msrb.mxu0 %v4771_v40 }
  0xb2   : > { %1496 = vmatpush.bf16.msrb.mxu0 %v4770_v43 }
  0xb6   : > { %1497 = vmatpush.bf16.msrb.mxu0 %v4769_v47 }
  0xbd   : > { %717 = vmatmul.bf16.vlgmr.msrb.gmra.mxu1 %v457_v46  ;;  %v4751_v46 = vld [vmem:[#allocation8] sm:$0xff] }
  0xbe   : > { %991 = vmatpush.bf16.msrb.mxu2 %v4751_v46 }
  0xc1   : > { %992 = vmatmul.bf16.vlgmr.msrb.gmra.mxu2 %v5223_v55  ;;  %v477_v55 = vpack.c.bf16 %v435_v53, %v433_v52 }
  0xc2   : > { %2000 = vmatpush.bf16.msra.mxu2 %v4790_v0 }
  0xc6   : > { %2001 = vmatpush.bf16.msra.mxu2 %v4789_v31 }
  0xca   : > { %2002 = vmatpush.bf16.msra.mxu2 %v4788_v27  ;;  %v4779_v27 = vld [vmem:[#allocation8 + $0xe0] sm:$0xff] }
  0xcd   : > { %722 = vmatmul.bf16.gmra.mxu1 %v459_v51  ;;  %v4768_v51 = vld [vmem:[#allocation8 + $0x88] sm:$0xff] }
  0xce   : > { %1498 = vmatpush.bf16.msrb.mxu0 %v4768_v51 }
  0xd2   : > { %1499 = vmatpush.bf16.msrb.mxu0 %v4767_v58 }
  0xd5   : > { %1500 = vmatmul.bf16.vlgmr.msrb.gmra.mxu0 %v1409_v63 }
  0xda   : > { %v5466_v59 = vpop.f32.mrf.mxu1  ;;  %v629_v6 = vpop.f32.mrf.mxu0 }
  0xdb   : > { %v630_v14 = vadd.f32 %v5513_v11, %v629_v6  ;;  %v650_v53 = vadd.f32 %v5513_v11, %v5466_v59 }
  0xdd   : > { %727 = vmatmul.bf16.gmra.mxu1 %v461_v57 }
  0xe2   : > { %v5468_v60 = vpop.f32.mrf.mxu1  ;;  %v631_v10 = vpop.f32.mrf.mxu0 }
  0xe3   : > { %v632_v22 = vadd.f32 %v5513_v11, %v631_v10 }
  0xea   : > { %v5474_v3 = vpop.f32.mrf.mxu1  ;;  %v634_v19 = vpop.f32.mrf.mxu0 }
  0xeb   : > { %v635_v29 = vadd.f32 %v5513_v11, %v634_v19 }
  0xed   : > { %732 = vmatmul.bf16.gmra.mxu1 %v463_v1 }
  0xf2   : > { %v5476_v4 = vpop.f32.mrf.mxu1  ;;  %v636_v26 = vpop.f32.mrf.mxu0 }
  0xf3   : > { %v637_v48 = vadd.f32 %v5513_v11, %v636_v26 }
  0xfa   : > { %v5484_v15 = vpop.f32.mrf.mxu1  ;;  %v639_v47 = vpop.f32.mrf.mxu0 }
  0xfd   : > { %737 = vmatmul.bf16.gmra.mxu1 %v465_v13  ;;  %v427_v13 = vld [vmem:[%s5383_s22 + $0x118] sm:$0xff] }
  0xfe   : > { %v473_v16 = vpack.c.bf16 %v427_v13, %v425_v12 }
 0x102   : > { %v5486_v21 = vpop.f32.mrf.mxu1  ;;  %v641_v56 = vpop.f32.mrf.mxu0 }
 0x10a   : > { %v5494_v36 = vpop.f32.mrf.mxu1 }
 0x10d   : > { %742 = vmatmul.bf16.gmra.mxu1 %v467_v34 }
 0x112   : > { %v5496_v44 = vpop.f32.mrf.mxu1 }
 0x11a   : > { %v5500_v57 = vpop.f32.mrf.mxu1 }
 0x11d   : > { %747 = vmatmul.bf16.gmra.mxu1 %v469_v54  ;;  %v640_v54 = vadd.f32 %v5513_v11, %v639_v47 }
 0x122   : > { %v5502_v1 = vpop.f32.mrf.mxu1 }
 0x12a   : > { %v5506_v8 = vpop.f32.mrf.mxu1 }
 0x12d   : > { %752 = vmatmul.bf16.gmra.mxu1 %v471_v7 }
 0x132   : > { %v5508_v9 = vpop.f32.mrf.mxu1 }
 0x13a   : > { %v718_v17 = vpop.f32.mrf.mxu1 }
 0x13b   : > { %v719_v18 = vadd.f32 %v718_v17, %v630_v14  ;;  %v5531_v14 = vpop.f32.mrf.mxu3 }
 0x13d   : > { %v798_v20 = vmax.f32 %v719_v18, 0.0  ;;  %757 = vmatmul.bf16.gmra.mxu1 %v473_v16  ;;  %v642_v16 = vadd.f32 %v5513_v11, %v641_v56  ;;  %v644_v18 = vpop.f32.mrf.mxu0 }
 0x13f   : > { %830 = vst [vmem:[#allocation2 + $0x13] sm:$0xff] %v798_v20 }
 0x142   : > { %v720_v23 = vpop.f32.mrf.mxu1 }
 0x143   : > { %v721_v24 = vadd.f32 %v720_v23, %v632_v22  ;;  %v437_v22 = vld [vmem:[%s5383_s22 + $0x168] sm:$0xff]  ;;  %v439_v23 = vld [vmem:[%s5383_s22 + $0x178] sm:$0xff]  ;;  %v5538_v26 = vpop.f32.mrf.mxu3 }
 0x144   : > { %v479_v28 = vpack.c.bf16 %v439_v23, %v437_v22  ;;  %v445_v22 = vld [vmem:[%s5383_s22 + $0x1a8] sm:$0xff]  ;;  %v447_v23 = vld [vmem:[%s5383_s22 + $0x1b8] sm:$0xff] }
 0x145   : > { %v799_v25 = vmax.f32 %v721_v24, 0.0  ;;  %v645_v24 = vadd.f32 %v5513_v11, %v644_v18  ;;  %v646_v31 = vpop.f32.mrf.mxu0 }
 0x146   : > { %v868_v37 = vld [vmem:[#allocation2 + $0x10] sm:$0xff] }
 0x147   : > { %831 = vst [vmem:[#allocation2 + $0x1b] sm:$0xff] %v799_v25  ;;  %v1121_v38 = vld [vmem:[#allocation2 + $0x11] sm:$0xff]  ;;  %v4781_v25 = vld [vmem:[#allocation8 + $0xf0] sm:$0xff] }
 0x148   : > { %v1375_v39 = vld [vmem:[#allocation2 + $0x12] sm:$0xff]  ;;  %1747 = vmatpush.bf16.msra.mxu1 %v4781_v25  ;;  %v655_v25 = vadd.f32 %v5513_v11, %v5474_v3 }
 0x149   : > { %v4787_v3 = vld [vmem:[#allocation8 + $0x120] sm:$0xff] }
 0x14a   : > { %v723_v33 = vpop.f32.mrf.mxu1  ;;  %2003 = vmatpush.bf16.msra.mxu2 %v4787_v3 }
 0x14b   : > { %v724_v34 = vadd.f32 %v723_v33, %v635_v29 }
 0x14d   : > { %v800_v35 = vmax.f32 %v724_v34, 0.0  ;;  %762 = vmatmul.bf16.gmra.mxu1 %v475_v32 }
 0x14e   : > { %v869_v40 = vld [vmem:[#allocation2 + $0x18] sm:$0xff] }
 0x14f   : > { %v1122_v41 = vld [vmem:[#allocation2 + $0x19] sm:$0xff]  ;;  %832 = vst [vmem:[#allocation2 + $0x25] sm:$0xff] %v800_v35  ;;  %v903_v43 = vpack.c.bf16 %v869_v40, %v868_v37  ;;  %v647_v40 = vadd.f32 %v5513_v11, %v646_v31 }
 0x150   : > { %v1376_v42 = vld [vmem:[#allocation2 + $0x1a] sm:$0xff]  ;;  %v1156_v45 = vpack.c.bf16 %v1122_v41, %v1121_v38 }
 0x151   : > { %v5522_v46 = vpack.c.bf16 %v1376_v42, %v1375_v39  ;;  %997 = vmatmul.bf16.gmra.mxu2 %v903_v43 }
 0x152   : > { %1251 = vmatmul.bf16.gmra.mxu3 %v1156_v45  ;;  %v725_v49 = vpop.f32.mrf.mxu1  ;;  %v5543_v45 = vpop.f32.mrf.mxu3 }
 0x153   : > { %1505 = vmatmul.bf16.gmra.mxu0 %v5522_v46  ;;  %v726_v50 = vadd.f32 %v725_v49, %v637_v48 }
 0x155   : > { %v801_v51 = vmax.f32 %v726_v50, 0.0  ;;  %v441_v50 = vld [vmem:[%s5383_s22 + $0x188] sm:$0xff] }
 0x156   : > { %v870_v63 = vld [vmem:[#allocation2 + $0x20] sm:$0xff] }
 0x157   : > { %833 = vst [vmem:[#allocation2 + $0x2d] sm:$0xff] %v801_v51  ;;  %v1123_v0 = vld [vmem:[#allocation2 + $0x21] sm:$0xff]  ;;  %v443_v51 = vld [vmem:[%s5383_s22 + $0x198] sm:$0xff] }
 0x158   : > { %v1377_v2 = vld [vmem:[#allocation2 + $0x22] sm:$0xff] }
 0x15a   : > { %v728_v58 = vpop.f32.mrf.mxu1  ;;  %v5548_v52 = vpop.f32.mrf.mxu3 }
 0x15b   : > { %v729_v61 = vadd.f32 %v728_v58, %v640_v54  ;;  %v481_v54 = vpack.c.bf16 %v443_v51, %v441_v50 }
 0x15d   : > { %v802_v62 = vmax.f32 %v729_v61, 0.0  ;;  %767 = vmatmul.bf16.gmra.mxu1 %v477_v55 }
 0x15e   : > { %v871_v5 = vld [vmem:[#allocation2 + $0x28] sm:$0xff] }
 0x15f   : > { %v1124_v6 = vld [vmem:[#allocation2 + $0x29] sm:$0xff]  ;;  %834 = vst [vmem:[#allocation2 + $0x37] sm:$0xff] %v802_v62  ;;  %v904_v10 = vpack.c.bf16 %v871_v5, %v870_v63  ;;  %v5552_v63 = vpop.f32.mrf.mxu2 }
 0x160   : > { %v1378_v7 = vld [vmem:[#allocation2 + $0x2a] sm:$0xff]  ;;  %v1157_v12 = vpack.c.bf16 %v1124_v6, %v1123_v0 }
 0x161   : > { %v5529_v13 = vpack.c.bf16 %v1378_v7, %v1377_v2  ;;  %1002 = vmatmul.bf16.gmra.mxu2 %v904_v10 }
 0x162   : > { %1256 = vmatmul.bf16.gmra.mxu3 %v1157_v12  ;;  %v730_v17 = vpop.f32.mrf.mxu1  ;;  %v5556_v59 = vpop.f32.mrf.mxu3  ;;  %v652_v12 = vadd.f32 %v5513_v11, %v5468_v60  ;;  %v483_v60 = vpack.c.bf16 %v447_v23, %v445_v22 }
 0x163   : > { %1510 = vmatmul.bf16.gmra.mxu0 %v5529_v13  ;;  %v731_v19 = vadd.f32 %v730_v17, %v642_v16 }
 0x165   : > { %v803_v20 = vmax.f32 %v731_v19, 0.0 }
 0x166   : > { %v872_v33 = vld [vmem:[#allocation2 + $0x30] sm:$0xff] }
 0x167   : > { %835 = vst [vmem:[#allocation2 + $0x3f] sm:$0xff] %v803_v20  ;;  %v1125_v34 = vld [vmem:[#allocation2 + $0x31] sm:$0xff]  ;;  %v5561_v19 = vpop.f32.mrf.mxu2  ;;  %v4780_v20 = vld [vmem:[#allocation8 + $0xe8] sm:$0xff] }
 0x168   : > { %v1379_v35 = vld [vmem:[#allocation2 + $0x32] sm:$0xff]  ;;  %1748 = vmatpush.bf16.msra.mxu1 %v4780_v20 }
 0x16a   : > { %v733_v29 = vpop.f32.mrf.mxu1 }
 0x16b   : > { %v734_v30 = vadd.f32 %v733_v29, %v645_v24  ;;  %v5565_v24 = vpop.f32.mrf.mxu3 }
 0x16c   : > { %1749 = vmatpush.bf16.msra.mxu1 %v4779_v27 }
 0x16d   : > { %v804_v32 = vmax.f32 %v734_v30, 0.0  ;;  %772 = vmatmul.bf16.gmra.mxu1 %v479_v28 }
 0x16e   : > { %v873_v37 = vld [vmem:[#allocation2 + $0x38] sm:$0xff]  ;;  %v1127_v61 = vld [vmem:[#allocation2 + $0x41] sm:$0xff] }
 0x16f   : > { %v1126_v38 = vld [vmem:[#allocation2 + $0x39] sm:$0xff]  ;;  %836 = vst [vmem:[#allocation2 + $0x49] sm:$0xff] %v804_v32  ;;  %v905_v41 = vpack.c.bf16 %v873_v37, %v872_v33  ;;  %v1159_v7 = vpack.c.bf16 %v804_v32, %v1127_v61 }
 0x170   : > { %v1380_v39 = vld [vmem:[#allocation2 + $0x3a] sm:$0xff]  ;;  %v1158_v42 = vpack.c.bf16 %v1126_v38, %v1125_v34  ;;  %v5569_v34 = vpop.f32.mrf.mxu2 }
 0x171   : > { %v5541_v43 = vpack.c.bf16 %v1380_v39, %v1379_v35  ;;  %1007 = vmatmul.bf16.gmra.mxu2 %v905_v41  ;;  %v874_v0 = vld [vmem:[#allocation2 + $0x40] sm:$0xff]  ;;  %v4778_v35 = vld [vmem:[#allocation8 + $0xd8] sm:$0xff] }
 0x172   : > { %1261 = vmatmul.bf16.gmra.mxu3 %v1158_v42  ;;  %v735_v47 = vpop.f32.mrf.mxu1  ;;  %1750 = vmatpush.bf16.msra.mxu1 %v4778_v35 }
 0x173   : > { %1515 = vmatmul.bf16.gmra.mxu0 %v5541_v43  ;;  %v736_v48 = vadd.f32 %v735_v47, %v647_v40  ;;  %v5571_v41 = vpop.f32.mrf.mxu3  ;;  %v657_v47 = vadd.f32 %v5513_v11, %v5476_v4  ;;  %v660_v4 = vadd.f32 %v5513_v11, %v5484_v15  ;;  %v5589_v15 = vld [vmem:[%s6775_s4] ss:$0 sm:$0xff] }
 0x175   : > { %v805_v49 = vmax.f32 %v736_v48, 0.0  ;;  %v4777_v48 = vld [vmem:[#allocation8 + $0xd0] sm:$0xff] }
 0x176   : > { %v875_v58 = vld [vmem:[#allocation2 + $0x48] sm:$0xff]  ;;  %1751 = vmatpush.bf16.msra.mxu1 %v4777_v48 }
 0x177   : > { %837 = vst [vmem:[#allocation2 + $0x51] sm:$0xff] %v805_v49  ;;  %v1381_v2 = vld [vmem:[#allocation2 + $0x42] sm:$0xff]  ;;  %v906_v6 = vpack.c.bf16 %v875_v58, %v874_v0 }
 0x17a   : > { %v738_v55 = vpop.f32.mrf.mxu1 }
 0x17b   : > { %v739_v56 = vadd.f32 %v738_v55, %v650_v53  ;;  %v4776_v53 = vld [vmem:[#allocation8 + $0xc8] sm:$0xff]  ;;  %v451_v55 = vld [vmem:[%s5383_s22 + $0x1d8] sm:$0xff]  ;;  %v5582_v58 = vpop.f32.mrf.mxu3 }
 0x17c   : > { %1752 = vmatpush.bf16.msra.mxu1 %v4776_v53 }
 0x17d   : > { %v806_v62 = vmax.f32 %v739_v56, 0.0  ;;  %777 = vmatmul.bf16.gmra.mxu1 %v481_v54  ;;  %v449_v54 = vld [vmem:[%s5383_s22 + $0x1c8] sm:$0xff]  ;;  %v5580_v56 = vpop.f32.mrf.mxu2 }
 0x17e   : > { %v1382_v5 = vld [vmem:[#allocation2 + $0x4a] sm:$0xff]  ;;  %v1383_v40 = vld [vmem:[#allocation2 + $0x52] sm:$0xff]  ;;  %v485_v61 = vpack.c.bf16 %v451_v55, %v449_v54 }
 0x17f   : > { %838 = vst [vmem:[#allocation2 + $0x5b] sm:$0xff] %v806_v62  ;;  %v5554_v10 = vpack.c.bf16 %v1382_v5, %v1381_v2  ;;  %v876_v37 = vld [vmem:[#allocation2 + $0x50] sm:$0xff]  ;;  %v4775_v62 = vld [vmem:[#allocation8 + $0xc0] sm:$0xff] }
 0x180   : > { %1753 = vmatpush.bf16.msra.mxu1 %v4775_v62  ;;  %v667_v62 = vadd.f32 %v5513_v11, %v5496_v44 }
 0x181   : > { %1012 = vmatmul.bf16.gmra.mxu2 %v906_v6 }
 0x182   : > { %1266 = vmatmul.bf16.gmra.mxu3 %v1159_v7  ;;  %v740_v16 = vpop.f32.mrf.mxu1 }
 0x183   : > { %1520 = vmatmul.bf16.gmra.mxu0 %v5554_v10  ;;  %v741_v17 = vadd.f32 %v740_v16, %v652_v12 }
 0x185   : > { %v807_v18 = vmax.f32 %v741_v17, 0.0 }
 0x186   : > { %v877_v30 = vld [vmem:[#allocation2 + $0x58] sm:$0xff] }
 0x187   : > { %839 = vst [vmem:[#allocation2 + $0x63] sm:$0xff] %v807_v18  ;;  %v1130_v31 = vld [vmem:[#allocation2 + $0x59] sm:$0xff]  ;;  %v907_v38 = vpack.c.bf16 %v877_v30, %v876_v37 }
 0x188   : > { %v1384_v33 = vld [vmem:[#allocation2 + $0x5a] sm:$0xff]  ;;  %v1160_v39 = vpack.c.bf16 %v1130_v31, %v805_v49 }
 0x189   : > { %v5573_v42 = vpack.c.bf16 %v1384_v33, %v1383_v40  ;;  %v453_v37 = vld [vmem:[%s5383_s22 + $0x1e8] sm:$0xff] }
 0x18a   : > { %v743_v28 = vpop.f32.mrf.mxu1 }
 0x18b   : > { %v744_v29 = vadd.f32 %v743_v28, %v655_v25  ;;  %v993_v25 = vpop.f32.mrf.mxu2 }
 0x18c   : > { %v1083_v27 = vadd.f32 %v5589_v15, %v993_v25 }
 0x18d   : > { %v808_v32 = vmax.f32 %v744_v29, 0.0  ;;  %782 = vmatmul.bf16.gmra.mxu1 %v483_v60  ;;  %v662_v60 = vadd.f32 %v5513_v11, %v5486_v21  ;;  %v1247_v29 = vpop.f32.mrf.mxu3  ;;  %v665_v21 = vadd.f32 %v5513_v11, %v5494_v36 }
 0x18e   : > { %v878_v16 = vld [vmem:[#allocation2 + $0x60] sm:$0xff]  ;;  %v1337_v31 = vadd.f32 %v1247_v29, %v1083_v27 }
 0x18f   : > { %840 = vst [vmem:[#allocation2 + $0x6d] sm:$0xff] %v808_v32  ;;  %v1131_v17 = vld [vmem:[#allocation2 + $0x61] sm:$0xff]  ;;  %v1501_v32 = vpop.f32.mrf.mxu0 }
 0x190   : > { %v1385_v22 = vld [vmem:[#allocation2 + $0x62] sm:$0xff]  ;;  %v5597_v35 = vadd.f32 %v1501_v32, %v1337_v31 }
 0x191   : > { %1017 = vmatmul.bf16.gmra.mxu2 %v907_v38  ;;  %v455_v38 = vld [vmem:[%s5383_s22 + $0x1f8] sm:$0xff] }
 0x192   : > { %1271 = vmatmul.bf16.gmra.mxu3 %v1160_v39  ;;  %v745_v50 = vpop.f32.mrf.mxu1  ;;  %v487_v39 = vpack.c.bf16 %v455_v38, %v453_v37 }
 0x193   : > { %1525 = vmatmul.bf16.gmra.mxu0 %v5573_v42  ;;  %v746_v49 = vadd.f32 %v745_v50, %v657_v47 }
 0x195   : > { %v809_v51 = vmax.f32 %v746_v49, 0.0 }
 0x196   : > { %v879_v5 = vld [vmem:[#allocation2 + $0x68] sm:$0xff] }
 0x197   : > { %841 = vst [vmem:[#allocation2 + $0x75] sm:$0xff] %v809_v51  ;;  %v1132_v6 = vld [vmem:[#allocation2 + $0x69] sm:$0xff]  ;;  %v908_v18 = vpack.c.bf16 %v879_v5, %v878_v16  ;;  %v670_v16 = vadd.f32 %v5513_v11, %v5500_v57  ;;  %v672_v57 = vadd.f32 %v5513_v11, %v5502_v1  ;;  %v5616_v38 = vpop.f32.mrf.mxu0 }
 0x198   : > { %v1386_v12 = vld [vmem:[#allocation2 + $0x6a] sm:$0xff]  ;;  %v1161_v20 = vpack.c.bf16 %v1132_v6, %v1131_v17 }
 0x199   : > { %v5591_v23 = vpack.c.bf16 %v1386_v12, %v1385_v22  ;;  %v4806_v12 = vld [vmem:[#allocation8 + $0x1b8] sm:$0xff] }
 0x19a   : > { %v748_v0 = vpop.f32.mrf.mxu1  ;;  %2508 = vmatpush.bf16.msra.mxu0 %v4806_v12  ;;  %v4797_v12 = vld [vmem:[#allocation8 + $0x170] sm:$0xff] }
 0x19b   : > { %v749_v2 = vadd.f32 %v748_v0, %v660_v4  ;;  %v4786_v0 = vld [vmem:[#allocation8 + $0x118] sm:$0xff] }
 0x19c   : > { %2004 = vmatpush.bf16.msra.mxu2 %v4786_v0 }
 0x19d   : > { %v810_v7 = vmax.f32 %v749_v2, 0.0  ;;  %787 = vmatmul.bf16.gmra.mxu1 %v485_v61 }
 0x19e   : > { %v880_v51 = vld [vmem:[#allocation2 + $0x70] sm:$0xff] }
 0x19f   : > { %842 = vst [vmem:[#allocation2 + $0x7f] sm:$0xff] %v810_v7  ;;  %v1133_v53 = vld [vmem:[#allocation2 + $0x71] sm:$0xff] }
 0x1a0   : > { %v1387_v4 = vld [vmem:[#allocation2 + $0x72] sm:$0xff] }
 0x1a1   : > { %1022 = vmatmul.bf16.gmra.mxu2 %v908_v18  ;;  %v4798_v7 = vld [vmem:[#allocation8 + $0x178] sm:$0xff] }
 0x1a2   : > { %1276 = vmatmul.bf16.gmra.mxu3 %v1161_v20  ;;  %v750_v28 = vpop.f32.mrf.mxu1 }
 0x1a3   : > { %1530 = vmatmul.bf16.gmra.mxu0 %v5591_v23  ;;  %v751_v30 = vadd.f32 %v750_v28, %v662_v60  ;;  %2254 = vmatpush.bf16.msra.mxu3 %v4798_v7  ;;  %v4785_v7 = vld [vmem:[#allocation8 + $0x110] sm:$0xff] }
 0x1a4   : > { %2005 = vmatpush.bf16.msra.mxu2 %v4785_v7 }
 0x1a5   : > { %v811_v33 = vmax.f32 %v751_v30, 0.0 }
 0x1a6   : > { %v881_v47 = vld [vmem:[#allocation2 + $0x78] sm:$0xff] }
 0x1a7   : > { %843 = vst [vmem:[#allocation2 + $0x87] sm:$0xff] %v811_v33  ;;  %v1134_v48 = vld [vmem:[#allocation2 + $0x79] sm:$0xff]  ;;  %v909_v54 = vpack.c.bf16 %v881_v47, %v880_v51  ;;  %2255 = vmatpush.bf16.msra.mxu3 %v4797_v12 }
 0x1a8   : > { %v1388_v49 = vld [vmem:[#allocation2 + $0x7a] sm:$0xff]  ;;  %v1162_v55 = vpack.c.bf16 %v1134_v48, %v1133_v53 }
 0x1a9   : > { %v5603_v61 = vpack.c.bf16 %v1388_v49, %v1387_v4 }
 0x1aa   : > { %v753_v40 = vpop.f32.mrf.mxu1 }
 0x1ab   : > { %v754_v3 = vadd.f32 %v753_v40, %v665_v21  ;;  %v5620_v40 = vpop.f32.mrf.mxu2 }
 0x1ad   : > { %v812_v50 = vmax.f32 %v754_v3, 0.0  ;;  %792 = vmatmul.bf16.gmra.mxu1 %v487_v39  ;;  %v5622_v3 = vpop.f32.mrf.mxu3 }
 0x1ae   : > { %v882_v18 = vld [vmem:[#allocation2 + $0x80] sm:$0xff]  ;;  %v883_v20 = vld [vmem:[#allocation2 + $0x88] sm:$0xff] }
 0x1af   : > { %844 = vst [vmem:[#allocation2 + $0x91] sm:$0xff] %v812_v50  ;;  %v1135_v22 = vld [vmem:[#allocation2 + $0x81] sm:$0xff]  ;;  %v1136_v25 = vld [vmem:[#allocation2 + $0x89] sm:$0xff]  ;;  %v910_v28 = vpack.c.bf16 %v883_v20, %v882_v18 }
 0x1b0   : > { %v1163_v29 = vpack.c.bf16 %v1136_v25, %v1135_v22  ;;  %v1389_v30 = vld [vmem:[#allocation2 + $0x82] sm:$0xff] }
 0x1b1   : > { %1027 = vmatmul.bf16.gmra.mxu2 %v909_v54 }
 0x1b2   : > { %1281 = vmatmul.bf16.gmra.mxu3 %v1162_v55  ;;  %v755_v36 = vpop.f32.mrf.mxu1 }
 0x1b3   : > { %1535 = vmatmul.bf16.gmra.mxu0 %v5603_v61  ;;  %v756_v2 = vadd.f32 %v755_v36, %v667_v62 }
 0x1b5   : > { %v813_v5 = vmax.f32 %v756_v2, 0.0 }
 0x1b6   : > { %v1390_v27 = vld [vmem:[#allocation2 + $0x8a] sm:$0xff] }
 0x1b7   : > { %845 = vst [vmem:[#allocation2 + $0x99] sm:$0xff] %v813_v5  ;;  %v1164_v6 = vpack.c.bf16 %v813_v5, %v812_v50  ;;  %v5611_v31 = vpack.c.bf16 %v1390_v27, %v1389_v30  ;;  %v884_v49 = vld [vmem:[#allocation2 + $0x90] sm:$0xff] }
 0x1ba   : > { %v758_v17 = vpop.f32.mrf.mxu1 }
 0x1bb   : > { %v759_v44 = vadd.f32 %v758_v17, %v670_v16  ;;  %v680_v16 = vadd.f32 %v5513_v11, %v5552_v63 }
 0x1bd   : > { %v814_v60 = vmax.f32 %v759_v44, 0.0  ;;  %1754 = vmatmul.bf16.vlgmr.msra.gmra.mxu1 %v5522_v46  ;;  %v675_v46 = vadd.f32 %v5513_v11, %v5506_v8  ;;  %v677_v8 = vadd.f32 %v5513_v11, %v5508_v9 }
 0x1be   : > { %v885_v1 = vld [vmem:[#allocation2 + $0x98] sm:$0xff] }
 0x1bf   : > { %846 = vst [vmem:[#allocation2 + $0xa3] sm:$0xff] %v814_v60  ;;  %v1391_v48 = vld [vmem:[#allocation2 + $0x92] sm:$0xff]  ;;  %v1392_v50 = vld [vmem:[#allocation2 + $0x9a] sm:$0xff]  ;;  %v911_v53 = vpack.c.bf16 %v885_v1, %v884_v49 }
 0x1c0   : > { %v5625_v54 = vpack.c.bf16 %v1392_v50, %v1391_v48 }
 0x1c1   : > { %1032 = vmatmul.bf16.gmra.mxu2 %v910_v28 }
 0x1c2   : > { %1286 = vmatmul.bf16.gmra.mxu3 %v1163_v29  ;;  %v760_v32 = vpop.f32.mrf.mxu1 }
 0x1c3   : > { %1540 = vmatmul.bf16.gmra.mxu0 %v5611_v31  ;;  %v761_v33 = vadd.f32 %v760_v32, %v672_v57 }
 0x1c5   : > { %v815_v37 = vmax.f32 %v761_v33, 0.0 }
 0x1c6   : > { %v886_v28 = vld [vmem:[#allocation2 + $0xa0] sm:$0xff] }
 0x1c7   : > { %847 = vst [vmem:[#allocation2 + $0xab] sm:$0xff] %v815_v37  ;;  %v1139_v29 = vld [vmem:[#allocation2 + $0xa1] sm:$0xff] }
 0x1c8   : > { %v1393_v33 = vld [vmem:[#allocation2 + $0xa2] sm:$0xff] }
 0x1c9   : > { %v4805_v37 = vld [vmem:[#allocation8 + $0x1b0] sm:$0xff] }
 0x1ca   : > { %v763_v21 = vpop.f32.mrf.mxu1  ;;  %2509 = vmatpush.bf16.msra.mxu0 %v4805_v37 }
 0x1cb   : > { %v764_v39 = vadd.f32 %v763_v21, %v675_v46  ;;  %v682_v21 = vadd.f32 %v5513_v11, %v5561_v19  ;;  %v685_v19 = vadd.f32 %v5513_v11, %v5569_v34 }
 0x1cd   : > { %v816_v47 = vmax.f32 %v764_v39, 0.0  ;;  %1759 = vmatmul.bf16.gmra.mxu1 %v5529_v13 }
 0x1ce   : > { %v887_v20 = vld [vmem:[#allocation2 + $0xa8] sm:$0xff] }
 0x1cf   : > { %848 = vst [vmem:[#allocation2 + $0xb5] sm:$0xff] %v816_v47  ;;  %v1140_v22 = vld [vmem:[#allocation2 + $0xa9] sm:$0xff]  ;;  %v912_v57 = vpack.c.bf16 %v887_v20, %v886_v28 }
 0x1d0   : > { %v1506_v51 = vpop.f32.mrf.mxu0  ;;  %v1394_v27 = vld [vmem:[#allocation2 + $0xaa] sm:$0xff]  ;;  %v1165_v32 = vpack.c.bf16 %v1140_v22, %v1139_v29  ;;  %v687_v22 = vadd.f32 %v5513_v11, %v5580_v56 }
 0x1d1   : > { %1037 = vmatmul.bf16.gmra.mxu2 %v911_v53  ;;  %v5637_v46 = vpack.c.bf16 %v1394_v27, %v1393_v33 }
 0x1d2   : > { %1291 = vmatmul.bf16.gmra.mxu3 %v1164_v6  ;;  %v765_v55 = vpop.f32.mrf.mxu1 }
 0x1d3   : > { %1545 = vmatmul.bf16.gmra.mxu0 %v5625_v54  ;;  %v766_v4 = vadd.f32 %v765_v55, %v677_v8 }
 0x1d4   : > { %v998_v62 = vpop.f32.mrf.mxu2 }
 0x1d5   : > { %v1252_v36 = vpop.f32.mrf.mxu3  ;;  %v817_v13 = vmax.f32 %v766_v4, 0.0  ;;  %v1085_v0 = vadd.f32 %v5589_v15, %v998_v62 }
 0x1d6   : > { %v888_v12 = vld [vmem:[#allocation2 + $0xb0] sm:$0xff] }
 0x1d7   : > { %849 = vst [vmem:[#allocation2 + $0xbd] sm:$0xff] %v817_v13  ;;  %v1339_v2 = vadd.f32 %v1252_v36, %v1085_v0 }
 0x1d8   : > { %v1508_v5 = vpop.f32.mrf.mxu0 }
 0x1d9   : > { %v5633_v9 = vadd.f32 %v1506_v51, %v1339_v2 }
 0x1da   : > { %v768_v6 = vpop.f32.mrf.mxu1 }
 0x1db   : > { %v769_v17 = vadd.f32 %v768_v6, %v680_v16  ;;  %v1141_v16 = vld [vmem:[#allocation2 + $0xb1] sm:$0xff] }
 0x1dc   : > { %v1000_v44 = vpop.f32.mrf.mxu2 }
 0x1dd   : > { %v1254_v18 = vpop.f32.mrf.mxu3  ;;  %v818_v25 = vmax.f32 %v769_v17, 0.0  ;;  %v1086_v60 = vadd.f32 %v5589_v15, %v1000_v44  ;;  %1764 = vmatmul.bf16.gmra.mxu1 %v5541_v43 }
 0x1de   : > { %v889_v13 = vld [vmem:[#allocation2 + $0xb8] sm:$0xff] }
 0x1df   : > { %850 = vst [vmem:[#allocation2 + $0xc7] sm:$0xff] %v818_v25  ;;  %v1340_v63 = vadd.f32 %v1254_v18, %v1086_v60  ;;  %v1142_v0 = vld [vmem:[#allocation2 + $0xb9] sm:$0xff]  ;;  %v913_v17 = vpack.c.bf16 %v889_v13, %v888_v12 }
 0x1e0   : > { %v1511_v30 = vpop.f32.mrf.mxu0  ;;  %v1396_v7 = vld [vmem:[#allocation2 + $0xba] sm:$0xff]  ;;  %v1166_v44 = vpack.c.bf16 %v1142_v0, %v1141_v16  ;;  %v1395_v18 = vld [vmem:[#allocation2 + $0xb2] sm:$0xff] }
 0x1e1   : > { %1042 = vmatmul.bf16.gmra.mxu2 %v912_v57  ;;  %v5641_v39 = vadd.f32 %v1508_v5, %v1340_v63  ;;  %v5656_v20 = vpack.c.bf16 %v1396_v7, %v1395_v18  ;;  %v4804_v16 = vld [vmem:[#allocation8 + $0x1a8] sm:$0xff]  ;;  %v695_v18 = vadd.f32 %v5513_v11, %v5543_v45  ;;  %v697_v45 = vadd.f32 %v5513_v11, %v5548_v52 }
 0x1e2   : > { %1296 = vmatmul.bf16.gmra.mxu3 %v1165_v32  ;;  %v770_v43 = vpop.f32.mrf.mxu1  ;;  %v4784_v32 = vld [vmem:[#allocation8 + $0x108] sm:$0xff]  ;;  %2510 = vmatpush.bf16.msra.mxu0 %v4804_v16 }
 0x1e3   : > { %1550 = vmatmul.bf16.gmra.mxu0 %v5637_v46  ;;  %v771_v1 = vadd.f32 %v770_v43, %v682_v21  ;;  %2006 = vmatpush.bf16.msra.mxu2 %v4784_v32 }
 0x1e4   : > { %v1003_v47 = vpop.f32.mrf.mxu2 }
 0x1e5   : > { %v1257_v48 = vpop.f32.mrf.mxu3  ;;  %v819_v50 = vmax.f32 %v771_v1, 0.0  ;;  %v1087_v49 = vadd.f32 %v5589_v15, %v1003_v47 }
 0x1e6   : > { %v1397_v0 = vld [vmem:[#allocation2 + $0xc2] sm:$0xff] }
 0x1e7   : > { %851 = vst [vmem:[#allocation2 + $0xcf] sm:$0xff] %v819_v50  ;;  %v1341_v51 = vadd.f32 %v1257_v48, %v1087_v49 }
 0x1e8   : > { %v1513_v53 = vpop.f32.mrf.mxu0 }
 0x1e9   : > { %v5647_v8 = vadd.f32 %v1511_v30, %v1341_v51  ;;  %v690_v30 = vadd.f32 %v5513_v11, %v5531_v14  ;;  %v890_v51 = vld [vmem:[#allocation2 + $0xc0] sm:$0xff] }
 0x1ea   : > { %v773_v55 = vpop.f32.mrf.mxu1 }
 0x1eb   : > { %v5649_v4 = vadd.f32 %v773_v55, %v685_v19  ;;  %v692_v19 = vadd.f32 %v5513_v11, %v5538_v26 }
 0x1ec   : > { %v1005_v62 = vpop.f32.mrf.mxu2 }
 0x1ed   : > { %v1259_v36 = vpop.f32.mrf.mxu3  ;;  %v820_v2 = vmax.f32 %v5649_v4, 0.0  ;;  %v1088_v5 = vadd.f32 %v5589_v15, %v1005_v62  ;;  %1769 = vmatmul.bf16.gmra.mxu1 %v5554_v10  ;;  %v700_v4 = vadd.f32 %v5513_v11, %v5556_v59  ;;  %v702_v59 = vadd.f32 %v5513_v11, %v5565_v24 }
 0x1ee   : > { %v891_v47 = vld [vmem:[#allocation2 + $0xc8] sm:$0xff]  ;;  %v1145_v32 = vld [vmem:[#allocation2 + $0xd1] sm:$0xff] }
 0x1ef   : > { %852 = vst [vmem:[#allocation2 + $0xd9] sm:$0xff] %v820_v2  ;;  %v1342_v34 = vadd.f32 %v1259_v36, %v1088_v5  ;;  %v1144_v48 = vld [vmem:[#allocation2 + $0xc9] sm:$0xff]  ;;  %v914_v36 = vpack.c.bf16 %v891_v47, %v890_v51  ;;  %v4796_v5 = vld [vmem:[#allocation8 + $0x168] sm:$0xff] }
 0x1f0   : > { %v1516_v6 = vpop.f32.mrf.mxu0  ;;  %v1398_v14 = vld [vmem:[#allocation2 + $0xca] sm:$0xff]  ;;  %2256 = vmatpush.bf16.msra.mxu3 %v4796_v5 }
 0x1f1   : > { %1047 = vmatmul.bf16.gmra.mxu2 %v913_v17  ;;  %v5660_v25 = vadd.f32 %v1513_v53, %v1342_v34  ;;  %v1143_v53 = vld [vmem:[#allocation2 + $0xc1] sm:$0xff]  ;;  %v5677_v7 = vpack.c.bf16 %v1398_v14, %v1397_v0 }
 0x1f2   : > { %1301 = vmatmul.bf16.gmra.mxu3 %v1166_v44  ;;  %v775_v10 = vpop.f32.mrf.mxu1  ;;  %v1167_v13 = vpack.c.bf16 %v1144_v48, %v1143_v53 }
 0x1f3   : > { %1555 = vmatmul.bf16.gmra.mxu0 %v5656_v20  ;;  %v5663_v60 = vadd.f32 %v775_v10, %v687_v22 }
 0x1f4   : > { %v1008_v27 = vpop.f32.mrf.mxu2 }
 0x1f5   : > { %v1262_v28 = vpop.f32.mrf.mxu3  ;;  %v821_v29 = vmax.f32 %v5663_v60, 0.0  ;;  %v1089_v63 = vadd.f32 %v5589_v15, %v1008_v27 }
 0x1f6   : > { %v1399_v14 = vld [vmem:[#allocation2 + $0xd2] sm:$0xff] }
 0x1f7   : > { %853 = vst [vmem:[#allocation2 + $0xe1] sm:$0xff] %v821_v29  ;;  %v1343_v56 = vadd.f32 %v1262_v28, %v1089_v63 }
 0x1f8   : > { %v1518_v57 = vpop.f32.mrf.mxu0 }
 0x1f9   : > { %v5671_v33 = vadd.f32 %v1516_v6, %v1343_v56 }
 0x1fa   : > { %v778_v37 = vpop.f32.mrf.mxu1 }
 0x1fb   : > { %v779_v21 = vadd.f32 %v778_v37, %v690_v30 }
 0x1fc   : > { %v1010_v43 = vpop.f32.mrf.mxu2 }
 0x1fd   : > { %v1264_v1 = vpop.f32.mrf.mxu3  ;;  %v822_v50 = vmax.f32 %v779_v21, 0.0  ;;  %v1090_v49 = vadd.f32 %v5589_v15, %v1010_v43  ;;  %1774 = vmatmul.bf16.gmra.mxu1 %v5573_v42 }
 0x1fe   : > { %v1400_v43 = vld [vmem:[#allocation2 + $0xda] sm:$0xff] }
 0x1ff   : > { %854 = vst [vmem:[#allocation2 + $0xeb] sm:$0xff] %v822_v50  ;;  %v1344_v55 = vadd.f32 %v1264_v1, %v1090_v49  ;;  %v892_v1 = vld [vmem:[#allocation2 + $0xd0] sm:$0xff]  ;;  %v1168_v49 = vpack.c.bf16 %v820_v2, %v1145_v32  ;;  %v5693_v51 = vpack.c.bf16 %v1400_v43, %v1399_v14  ;;  %v4795_v32 = vld [vmem:[#allocation8 + $0x160] sm:$0xff] }
 0x200   : > { %v1521_v62 = vpop.f32.mrf.mxu0  ;;  %2257 = vmatpush.bf16.msra.mxu3 %v4795_v32  ;;  %v4792_v32 = vld [vmem:[#allocation8 + $0x148] sm:$0xff] }
 0x201   : > { %1052 = vmatmul.bf16.gmra.mxu2 %v914_v36  ;;  %v5679_v12 = vadd.f32 %v1518_v57, %v1344_v55  ;;  %v893_v57 = vld [vmem:[#allocation2 + $0xd8] sm:$0xff] }
 0x202   : > { %1306 = vmatmul.bf16.gmra.mxu3 %v1167_v13  ;;  %v780_v42 = vpop.f32.mrf.mxu1  ;;  %v915_v50 = vpack.c.bf16 %v893_v57, %v892_v1  ;;  %v4783_v57 = vld [vmem:[#allocation8 + $0x100] sm:$0xff] }
 0x203   : > { %1560 = vmatmul.bf16.gmra.mxu0 %v5677_v7  ;;  %v781_v34 = vadd.f32 %v780_v42, %v692_v19  ;;  %2007 = vmatpush.bf16.msra.mxu2 %v4783_v57 }
 0x204   : > { %v1013_v26 = vpop.f32.mrf.mxu2 }
 0x205   : > { %v1267_v6 = vpop.f32.mrf.mxu3  ;;  %v823_v17 = vmax.f32 %v781_v34, 0.0  ;;  %v1091_v44 = vadd.f32 %v5589_v15, %v1013_v26 }
 0x206   : > { %v895_v26 = vld [vmem:[#allocation2 + $0xe8] sm:$0xff] }
 0x207   : > { %855 = vst [vmem:[#allocation2 + $0xf3] sm:$0xff] %v823_v17  ;;  %v1345_v22 = vadd.f32 %v1267_v6, %v1091_v44  ;;  %v1148_v6 = vld [vmem:[#allocation2 + $0xe9] sm:$0xff] }
 0x208   : > { %v1523_v10 = vpop.f32.mrf.mxu0 }
 0x209   : > { %v5685_v27 = vadd.f32 %v1521_v62, %v1345_v22  ;;  %v894_v22 = vld [vmem:[#allocation2 + $0xe0] sm:$0xff] }
 0x20a   : > { %v783_v28 = vpop.f32.mrf.mxu1 }
 0x20b   : > { %v784_v63 = vadd.f32 %v783_v28, %v695_v18  ;;  %v1402_v18 = vld [vmem:[#allocation2 + $0xea] sm:$0xff] }
 0x20c   : > { %v1015_v30 = vpop.f32.mrf.mxu2 }
 0x20d   : > { %v1269_v56 = vpop.f32.mrf.mxu3  ;;  %v824_v37 = vmax.f32 %v784_v63, 0.0  ;;  %v1092_v21 = vadd.f32 %v5589_v15, %v1015_v30  ;;  %1779 = vmatmul.bf16.gmra.mxu1 %v5591_v23  ;;  %v916_v63 = vpack.c.bf16 %v895_v26, %v894_v22  ;;  %v1169_v30 = vpack.c.bf16 %v1148_v6, %v821_v29 }
 0x20e   : > { %v705_v29 = vadd.f32 %v5513_v11, %v5571_v41  ;;  %v1403_v41 = vld [vmem:[#allocation2 + $0xf2] sm:$0xff] }
 0x20f   : > { %856 = vst [vmem:[#allocation2 + $0xfd] sm:$0xff] %v824_v37  ;;  %v1346_v47 = vadd.f32 %v1269_v56, %v1092_v21  ;;  %v1401_v56 = vld [vmem:[#allocation2 + $0xe2] sm:$0xff] }
 0x210   : > { %v1526_v48 = vpop.f32.mrf.mxu0  ;;  %v5709_v37 = vpack.c.bf16 %v1402_v18, %v1401_v56  ;;  %v4802_v18 = vld [vmem:[#allocation8 + $0x198] sm:$0xff] }
 0x211   : > { %1057 = vmatmul.bf16.gmra.mxu2 %v915_v50  ;;  %v5695_v53 = vadd.f32 %v1523_v10, %v1346_v47  ;;  %v4803_v50 = vld [vmem:[#allocation8 + $0x1a0] sm:$0xff] }
 0x212   : > { %1311 = vmatmul.bf16.gmra.mxu3 %v1168_v49  ;;  %v785_v23 = vpop.f32.mrf.mxu1  ;;  %2511 = vmatpush.bf16.msra.mxu0 %v4803_v50 }
 0x213   : > { %1565 = vmatmul.bf16.gmra.mxu0 %v5693_v51  ;;  %v786_v19 = vadd.f32 %v785_v23, %v697_v45 }
 0x214   : > { %v1018_v55 = vpop.f32.mrf.mxu2 }
 0x215   : > { %v1272_v52 = vpop.f32.mrf.mxu3  ;;  %v825_v62 = vmax.f32 %v786_v19, 0.0  ;;  %v1093_v36 = vadd.f32 %v5589_v15, %v1018_v55  ;;  %v896_v19 = vld [vmem:[#allocation2 + $0xf0] sm:$0xff] }
 0x216   : > { %2512 = vmatpush.bf16.msra.mxu0 %v4802_v18 }
 0x217   : > { %857 = vst [vmem:[#allocation2 + $0x105] sm:$0xff] %v825_v62  ;;  %v1347_v2 = vadd.f32 %v1272_v52, %v1093_v36  ;;  %v897_v62 = vld [vmem:[#allocation2 + $0xf8] sm:$0xff] }
 0x218   : > { %v1528_v13 = vpop.f32.mrf.mxu0  ;;  %v1149_v36 = vld [vmem:[#allocation2 + $0xf1] sm:$0xff]  ;;  %v917_v26 = vpack.c.bf16 %v897_v62, %v896_v19 }
 0x219   : > { %v5701_v0 = vadd.f32 %v1526_v48, %v1347_v2 }
 0x21a   : > { %v788_v5 = vpop.f32.mrf.mxu1 }
 0x21b   : > { %v789_v42 = vadd.f32 %v788_v5, %v700_v4  ;;  %v1150_v4 = vld [vmem:[#allocation2 + $0xf9] sm:$0xff] }
 0x21c   : > { %v1020_v16 = vpop.f32.mrf.mxu2  ;;  %v1404_v5 = vld [vmem:[#allocation2 + $0xfa] sm:$0xff]  ;;  %v1170_v6 = vpack.c.bf16 %v1150_v4, %v1149_v36 }
 0x21d   : > { %v1274_v34 = vpop.f32.mrf.mxu3  ;;  %v826_v17 = vmax.f32 %v789_v42, 0.0  ;;  %v1094_v44 = vadd.f32 %v5589_v15, %v1020_v16  ;;  %1784 = vmatmul.bf16.gmra.mxu1 %v5603_v61  ;;  %v707_v42 = vadd.f32 %v5513_v11, %v5582_v58 }
 0x21f   : > { %858 = vst [vmem:[#allocation2 + $0x10f] sm:$0xff] %v826_v17  ;;  %v1348_v10 = vadd.f32 %v1274_v34, %v1094_v44  ;;  %v5723_v17 = vpack.c.bf16 %v1404_v5, %v1403_v41  ;;  %v4794_v44 = vld [vmem:[#allocation8 + $0x158] sm:$0xff] }
 0x220   : > { %v1531_v28 = vpop.f32.mrf.mxu0  ;;  %2258 = vmatpush.bf16.msra.mxu3 %v4794_v44 }
 0x221   : > { %1062 = vmatmul.bf16.gmra.mxu2 %v916_v63  ;;  %v5711_v61 = vadd.f32 %v1528_v13, %v1348_v10  ;;  %v4793_v63 = vld [vmem:[#allocation8 + $0x150] sm:$0xff] }
 0x222   : > { %1316 = vmatmul.bf16.gmra.mxu3 %v1169_v30  ;;  %v790_v21 = vpop.f32.mrf.mxu1  ;;  %v4801_v30 = vld [vmem:[#allocation8 + $0x190] sm:$0xff] }
 0x223   : > { %1570 = vmatmul.bf16.gmra.mxu0 %v5709_v37  ;;  %v791_v24 = vadd.f32 %v790_v21, %v702_v59  ;;  %v4800_v21 = vld [vmem:[#allocation8 + $0x188] sm:$0xff] }
 0x224   : > { %v1023_v43 = vpop.f32.mrf.mxu2  ;;  %2259 = vmatpush.bf16.msra.mxu3 %v4793_v63  ;;  %2513 = vmatpush.bf16.msra.mxu0 %v4801_v30 }
 0x225   : > { %v1277_v1 = vpop.f32.mrf.mxu3  ;;  %v827_v45 = vmax.f32 %v791_v24, 0.0  ;;  %v1095_v60 = vadd.f32 %v5589_v15, %v1023_v43 }
 0x226   : > { %v1152_v50 = vld [vmem:[#allocation2 + $0x109] sm:$0xff] }
 0x227   : > { %859 = vst [vmem:[#allocation2 + $0x117] sm:$0xff] %v827_v45  ;;  %v1349_v47 = vadd.f32 %v1277_v1, %v1095_v60  ;;  %v898_v45 = vld [vmem:[#allocation2 + $0x100] sm:$0xff]  ;;  %v1406_v19 = vld [vmem:[#allocation2 + $0x10a] sm:$0xff] }
 0x228   : > { %v1533_v48 = vpop.f32.mrf.mxu0  ;;  %v1151_v60 = vld [vmem:[#allocation2 + $0x101] sm:$0xff]  ;;  %2260 = vmatpush.bf16.msra.mxu3 %v4792_v32  ;;  %2514 = vmatpush.bf16.msra.mxu0 %v4800_v21 }
 0x229   : > { %v5717_v49 = vadd.f32 %v1531_v28, %v1349_v47  ;;  %v1171_v4 = vpack.c.bf16 %v1152_v50, %v1151_v60 }
 0x22a   : > { %v793_v14 = vpop.f32.mrf.mxu1 }
 0x22b   : > { %v794_v23 = vadd.f32 %v793_v14, %v705_v29  ;;  %v1405_v14 = vld [vmem:[#allocation2 + $0x102] sm:$0xff] }
 0x22c   : > { %v1025_v55 = vpop.f32.mrf.mxu2 }
 0x22d   : > { %v1279_v52 = vpop.f32.mrf.mxu3  ;;  %v828_v2 = vmax.f32 %v794_v23, 0.0  ;;  %v1096_v13 = vadd.f32 %v5589_v15, %v1025_v55  ;;  %1789 = vmatmul.bf16.gmra.mxu1 %v5611_v31  ;;  %v4791_v55 = vld [vmem:[#allocation8 + $0x140] sm:$0xff] }
 0x22e   : > { %2261 = vmatpush.bf16.msra.mxu3 %v4791_v55  ;;  %v1154_v63 = vld [vmem:[#allocation2 + $0x119] sm:$0xff] }
 0x22f   : > { %860 = vst [vmem:[#allocation2 + $0x121] sm:$0xff] %v828_v2  ;;  %v1350_v16 = vadd.f32 %v1279_v52, %v1096_v13  ;;  %v4799_v52 = vld [vmem:[#allocation8 + $0x180] sm:$0xff]  ;;  %v5736_v2 = vpack.c.bf16 %v1406_v19, %v1405_v14 }
 0x230   : > { %v1536_v34 = vpop.f32.mrf.mxu0  ;;  %2515 = vmatpush.bf16.msra.mxu0 %v4799_v52 }
 0x231   : > { %1067 = vmatmul.bf16.gmra.mxu2 %v917_v26  ;;  %v5725_v22 = vadd.f32 %v1533_v48, %v1350_v16  ;;  %v899_v48 = vld [vmem:[#allocation2 + $0x108] sm:$0xff] }
 0x232   : > { %1321 = vmatmul.bf16.gmra.mxu3 %v1170_v6  ;;  %v795_v31 = vpop.f32.mrf.mxu1  ;;  %v4814_v6 = vld [vmem:[#allocation8 + $0x1f8] sm:$0xff] }
 0x233   : > { %1575 = vmatmul.bf16.gmra.mxu0 %v5723_v17  ;;  %v796_v59 = vadd.f32 %v795_v31, %v707_v42  ;;  %2762 = vmatpush.bf16.msrb.mxu1 %v4814_v6 }
 0x234   : > { %v1028_v11 = vpop.f32.mrf.mxu2 }
 0x235   : > { %v1282_v58 = vpop.f32.mrf.mxu3  ;;  %v829_v10 = vmax.f32 %v796_v59, 0.0  ;;  %v1097_v28 = vadd.f32 %v5589_v15, %v1028_v11  ;;  %v900_v59 = vld [vmem:[#allocation2 + $0x110] sm:$0xff] }
 0x237   : > { %861 = vst [vmem:[#allocation2 + $0x129] sm:$0xff] %v829_v10  ;;  %v1351_v56 = vadd.f32 %v1282_v58, %v1097_v28  ;;  %v901_v10 = vld [vmem:[#allocation2 + $0x118] sm:$0xff] }
 0x238   : > { %v1538_v57 = vpop.f32.mrf.mxu0  ;;  %v1153_v28 = vld [vmem:[#allocation2 + $0x111] sm:$0xff] }
 0x239   : > { %v5729_v24 = vadd.f32 %v1536_v34, %v1351_v56  ;;  %v1407_v56 = vld [vmem:[#allocation2 + $0x112] sm:$0xff] }
 0x23a   : > { %v1755_v43 = vpop.f32.mrf.mxu1 }
 0x23b   : > { %v5732_v1 = vadd.f32 %v1755_v43, %v5597_v35  ;;  %v918_v35 = vpack.c.bf16 %v899_v48, %v898_v45  ;;  %v919_v43 = vpack.c.bf16 %v901_v10, %v900_v59  ;;  %v1172_v45 = vpack.c.bf16 %v1154_v63, %v1153_v28 }
 0x23c   : > { %v1030_v29 = vpop.f32.mrf.mxu2 }
 0x23d   : > { %v1284_v47 = vpop.f32.mrf.mxu3  ;;  %v1098_v23 = vadd.f32 %v5589_v15, %v1030_v29  ;;  %1794 = vmatmul.bf16.gmra.mxu1 %v5625_v54  ;;  %v4822_v54 = vld [vmem:[#allocation8 + $0x238] sm:$0xff] }
 0x23e   : > { %3016 = vmatpush.bf16.msrb.mxu2 %v4822_v54  ;;  %v2136_v54 = vld [vmem:[#allocation2 + $0x1c] sm:$0xff] }
 0x23f   : > { %v1352_v62 = vadd.f32 %v1284_v47, %v1098_v23 }
 0x240   : > { %v1541_v36 = vpop.f32.mrf.mxu0 }
 0x241   : > { %1072 = vmatmul.bf16.gmra.mxu2 %v918_v35  ;;  %v5738_v13 = vadd.f32 %v1538_v57, %v1352_v62  ;;  %v1408_v57 = vld [vmem:[#allocation2 + $0x11a] sm:$0xff] }
 0x242   : > { %1326 = vmatmul.bf16.gmra.mxu3 %v1171_v4  ;;  %v5741_v41 = vpop.f32.mrf.mxu1  ;;  %v5751_v60 = vpack.c.bf16 %v1408_v57, %v1407_v56  ;;  %v1882_v35 = vld [vmem:[#allocation2 + $0x1b] sm:$0xff]  ;;  %v4821_v56 = vld [vmem:[#allocation8 + $0x230] sm:$0xff] }
 0x243   : > { %1580 = vmatmul.bf16.gmra.mxu0 %v5736_v2  ;;  %v2135_v4 = vld [vmem:[#allocation2 + $0x14] sm:$0xff]  ;;  %v4813_v57 = vld [vmem:[#allocation8 + $0x1f0] sm:$0xff]  ;;  %3017 = vmatpush.bf16.msrb.mxu2 %v4821_v56 }
 0x244   : > { %v1033_v5 = vpop.f32.mrf.mxu2  ;;  %v2171_v6 = vpack.c.bf16 %v2136_v54, %v2135_v4  ;;  %2763 = vmatpush.bf16.msrb.mxu1 %v4813_v57 }
 0x245   : > { %v1287_v42 = vpop.f32.mrf.mxu3  ;;  %v1099_v16 = vadd.f32 %v5589_v15, %v1033_v5  ;;  %v2390_v5 = vld [vmem:[#allocation2 + $0x2c] sm:$0xff] }
 0x247   : > { %v1353_v34 = vadd.f32 %v1287_v42, %v1099_v16  ;;  %v1881_v42 = vld [vmem:[#allocation2 + $0x13] sm:$0xff] }
 0x248   : > { %v1543_v26 = vpop.f32.mrf.mxu0 }
 0x249   : > { %v5744_v44 = vadd.f32 %v1541_v36, %v1353_v34 }
 0x24a   : > { %v1760_v18 = vpop.f32.mrf.mxu1 }
 0x24b   : > { %v5747_v31 = vadd.f32 %v1760_v18, %v5633_v9  ;;  %v2389_v18 = vld [vmem:[#allocation2 + $0x24] sm:$0xff] }
 0x24c   : > { %v1035_v11 = vpop.f32.mrf.mxu2  ;;  %v2425_v59 = vpack.c.bf16 %v2390_v5, %v2389_v18 }
 0x24d   : > { %v1289_v58 = vpop.f32.mrf.mxu3  ;;  %v1100_v30 = vadd.f32 %v5589_v15, %v1035_v11  ;;  %1799 = vmatmul.bf16.gmra.mxu1 %v5637_v46 }
 0x24f   : > { %v1354_v32 = vadd.f32 %v1289_v58, %v1100_v30 }
 0x250   : > { %v1546_v21 = vpop.f32.mrf.mxu0 }
 0x251   : > { %1077 = vmatmul.bf16.gmra.mxu2 %v919_v43  ;;  %v5753_v9 = vadd.f32 %v1543_v26, %v1354_v32  ;;  %v1917_v26 = vpack.c.bf16 %v1882_v35, %v1881_v42 }
 0x252   : > { %1331 = vmatmul.bf16.gmra.mxu3 %v1172_v45  ;;  %v1762_v29 = vpop.f32.mrf.mxu1 }
 0x253   : > { %1585 = vmatmul.bf16.gmra.mxu0 %v5751_v60  ;;  %v5757_v47 = vadd.f32 %v1762_v29, %v5641_v39 }
 0x254   : > { %v1038_v48 = vpop.f32.mrf.mxu2 }
 0x255   : > { %v1292_v46 = vpop.f32.mrf.mxu3  ;;  %v1101_v50 = vadd.f32 %v5589_v15, %v1038_v48 }
 0x257   : > { %v1355_v14 = vadd.f32 %v1292_v46, %v1101_v50  ;;  %v2392_v46 = vld [vmem:[#allocation2 + $0x3c] sm:$0xff] }
 0x258   : > { %v1548_v23 = vpop.f32.mrf.mxu0  ;;  %v1883_v50 = vld [vmem:[#allocation2 + $0x23] sm:$0xff] }
 0x259   : > { %v5760_v19 = vadd.f32 %v1546_v21, %v1355_v14 }
 0x25a   : > { %v1765_v55 = vpop.f32.mrf.mxu1 }
 0x25b   : > { %v5763_v52 = vadd.f32 %v1765_v55, %v5647_v8 }
 0x25c   : > { %v1040_v62 = vpop.f32.mrf.mxu2 }
 0x25d   : > { %v1294_v36 = vpop.f32.mrf.mxu3  ;;  %v1102_v39 = vadd.f32 %v5589_v15, %v1040_v62  ;;  %1804 = vmatmul.bf16.gmra.mxu1 %v5656_v20  ;;  %v2391_v62 = vld [vmem:[#allocation2 + $0x34] sm:$0xff] }
 0x25f   : > { %v1356_v16 = vadd.f32 %v1294_v36, %v1102_v39  ;;  %v2426_v36 = vpack.c.bf16 %v2392_v46, %v2391_v62  ;;  %v4820_v46 = vld [vmem:[#allocation8 + $0x228] sm:$0xff] }
 0x260   : > { %v1551_v34 = vpop.f32.mrf.mxu0  ;;  %3018 = vmatpush.bf16.msrb.mxu2 %v4820_v46 }
 0x261   : > { %2008 = vmatmul.bf16.vlgmr.msra.gmra.mxu2 %v1917_v26  ;;  %v5767_v8 = vadd.f32 %v1548_v23, %v1356_v16 }
 0x262   : > { %2262 = vmatmul.bf16.vlgmr.msra.gmra.mxu3 %v2171_v6  ;;  %v1767_v11 = vpop.f32.mrf.mxu1 }
 0x263   : > { %2516 = vmatmul.bf16.vlgmr.msra.gmra.mxu0 %v2425_v59  ;;  %v5770_v58 = vadd.f32 %v1767_v11, %v5660_v25  ;;  %v1884_v25 = vld [vmem:[#allocation2 + $0x2b] sm:$0xff] }
 0x264   : > { %v1043_v10 = vpop.f32.mrf.mxu2  ;;  %v1918_v55 = vpack.c.bf16 %v1884_v25, %v1883_v50 }
 0x265   : > { %v1297_v28 = vpop.f32.mrf.mxu3  ;;  %v1103_v20 = vadd.f32 %v5589_v15, %v1043_v10  ;;  %v1885_v10 = vld [vmem:[#allocation2 + $0x33] sm:$0xff] }
 0x267   : > { %v1357_v63 = vadd.f32 %v1297_v28, %v1103_v20 }
 0x268   : > { %v1553_v30 = vpop.f32.mrf.mxu0 }
 0x269   : > { %v5773_v32 = vadd.f32 %v1551_v34, %v1357_v63 }
 0x26a   : > { %v1770_v21 = vpop.f32.mrf.mxu1 }
 0x26b   : > { %v5776_v43 = vadd.f32 %v1770_v21, %v5671_v33 }
 0x26c   : > { %v1045_v45 = vpop.f32.mrf.mxu2 }
 0x26d   : > { %v1299_v29 = vpop.f32.mrf.mxu3  ;;  %v1104_v48 = vadd.f32 %v5589_v15, %v1045_v45  ;;  %1809 = vmatmul.bf16.gmra.mxu1 %v5677_v7 }
 0x26f   : > { %v1358_v14 = vadd.f32 %v1299_v29, %v1104_v48 }
 0x270   : > { %v1556_v23 = vpop.f32.mrf.mxu0 }
 0x271   : > { %2013 = vmatmul.bf16.gmra.mxu2 %v1918_v55  ;;  %v5780_v35 = vadd.f32 %v1553_v30, %v1358_v14  ;;  %v2393_v30 = vld [vmem:[#allocation2 + $0x44] sm:$0xff] }
 0x272   : > { %2267 = vmatmul.bf16.gmra.mxu3 %v2425_v59  ;;  %v1772_v33 = vpop.f32.mrf.mxu1  ;;  %v1886_v59 = vld [vmem:[#allocation2 + $0x3b] sm:$0xff] }
 0x273   : > { %2521 = vmatmul.bf16.gmra.mxu0 %v2426_v36  ;;  %v5783_v4 = vadd.f32 %v1772_v33, %v5679_v12  ;;  %v2394_v12 = vld [vmem:[#allocation2 + $0x4c] sm:$0xff]  ;;  %v1919_v63 = vpack.c.bf16 %v1886_v59, %v1885_v10  ;;  %v2396_v33 = vld [vmem:[#allocation2 + $0x5c] sm:$0xff] }
 0x274   : > { %v1048_v54 = vpop.f32.mrf.mxu2  ;;  %v2427_v56 = vpack.c.bf16 %v2394_v12, %v2393_v30 }
 0x275   : > { %v1302_v39 = vpop.f32.mrf.mxu3  ;;  %v1105_v7 = vadd.f32 %v5589_v15, %v1048_v54  ;;  %v1887_v54 = vld [vmem:[#allocation2 + $0x43] sm:$0xff] }
 0x277   : > { %v1359_v5 = vadd.f32 %v1302_v39, %v1105_v7 }
 0x278   : > { %v1558_v42 = vpop.f32.mrf.mxu0 }
 0x279   : > { %v5786_v16 = vadd.f32 %v1556_v23, %v1359_v5 }
 0x27a   : > { %v1775_v34 = vpop.f32.mrf.mxu1 }
 0x27b   : > { %v5789_v26 = vadd.f32 %v1775_v34, %v5685_v27  ;;  %v4812_v34 = vld [vmem:[#allocation8 + $0x1e8] sm:$0xff] }
 0x27c   : > { %v1050_v6 = vpop.f32.mrf.mxu2  ;;  %2764 = vmatpush.bf16.msrb.mxu1 %v4812_v34 }
 0x27d   : > { %v1304_v18 = vpop.f32.mrf.mxu3  ;;  %v1106_v11 = vadd.f32 %v5589_v15, %v1050_v6  ;;  %1814 = vmatmul.bf16.gmra.mxu1 %v5693_v51 }
 0x27f   : > { %v1360_v28 = vadd.f32 %v1304_v18, %v1106_v11  ;;  %v5814_v11 = vld [vmem:[%s6775_s4] ss:$0 sm:$0xff] }
 0x280   : > { %v1561_v20 = vpop.f32.mrf.mxu0 }
 0x281   : > { %2018 = vmatmul.bf16.gmra.mxu2 %v1919_v63  ;;  %v5793_v57 = vadd.f32 %v1558_v42, %v1360_v28  ;;  %v2395_v42 = vld [vmem:[#allocation2 + $0x54] sm:$0xff] }
 0x282   : > { %2272 = vmatmul.bf16.gmra.mxu3 %v2426_v36  ;;  %v1777_v27 = vpop.f32.mrf.mxu1  ;;  %v1888_v36 = vld [vmem:[#allocation2 + $0x4b] sm:$0xff]  ;;  %v2428_v6 = vpack.c.bf16 %v2396_v33, %v2395_v42  ;;  %v4811_v42 = vld [vmem:[#allocation8 + $0x1e0] sm:$0xff] }
 0x283   : > { %2526 = vmatmul.bf16.gmra.mxu0 %v2427_v56  ;;  %v5796_v21 = vadd.f32 %v1777_v27, %v5695_v53  ;;  %v1920_v5 = vpack.c.bf16 %v1888_v36, %v1887_v54  ;;  %v1890_v27 = vld [vmem:[#allocation2 + $0x5b] sm:$0xff]  ;;  %2765 = vmatpush.bf16.msrb.mxu1 %v4811_v42 }
 0x284   : > { %v1053_v45 = vpop.f32.mrf.mxu2 }
 0x285   : > { %v1307_v29 = vpop.f32.mrf.mxu3  ;;  %v1107_v51 = vadd.f32 %v5589_v15, %v1053_v45 }
 0x287   : > { %v1361_v25 = vadd.f32 %v1307_v29, %v1107_v51  ;;  %v2398_v29 = vld [vmem:[#allocation2 + $0x6c] sm:$0xff] }
 0x288   : > { %v1563_v48 = vpop.f32.mrf.mxu0  ;;  %v1889_v51 = vld [vmem:[#allocation2 + $0x53] sm:$0xff] }
 0x289   : > { %v5799_v50 = vadd.f32 %v1561_v20, %v1361_v25  ;;  %v1921_v46 = vpack.c.bf16 %v1890_v27, %v1889_v51  ;;  %v4819_v27 = vld [vmem:[#allocation8 + $0x220] sm:$0xff]  ;;  %v4809_v51 = vld [vmem:[#allocation8 + $0x1d0] sm:$0xff] }
 0x28a   : > { %v1780_v14 = vpop.f32.mrf.mxu1  ;;  %3019 = vmatpush.bf16.msrb.mxu2 %v4819_v27 }
 0x28b   : > { %v5802_v23 = vadd.f32 %v1780_v14, %v5701_v0  ;;  %v2397_v14 = vld [vmem:[#allocation2 + $0x64] sm:$0xff] }
 0x28c   : > { %v1055_v55 = vpop.f32.mrf.mxu2 }
 0x28d   : > { %v1309_v62 = vpop.f32.mrf.mxu3  ;;  %v1108_v53 = vadd.f32 %v5589_v15, %v1055_v55  ;;  %1819 = vmatmul.bf16.gmra.mxu1 %v5709_v37  ;;  %v2429_v55 = vpack.c.bf16 %v2398_v29, %v2397_v14  ;;  %v4808_v14 = vld [vmem:[#allocation8 + $0x1c8] sm:$0xff] }
 0x28f   : > { %v1362_v39 = vadd.f32 %v1309_v62, %v1108_v53 }
 0x290   : > { %v1566_v7 = vpop.f32.mrf.mxu0 }
 0x291   : > { %2023 = vmatmul.bf16.gmra.mxu2 %v1920_v5  ;;  %v5806_v18 = vadd.f32 %v1563_v48, %v1362_v39 }
 0x292   : > { %2277 = vmatmul.bf16.gmra.mxu3 %v2427_v56  ;;  %v1782_v0 = vpop.f32.mrf.mxu1 }
 0x293   : > { %2531 = vmatmul.bf16.gmra.mxu0 %v2428_v6  ;;  %v5809_v59 = vadd.f32 %v1782_v0, %v5711_v61 }
 0x294   : > { %v1058_v15 = vpop.f32.mrf.mxu2 }
 0x295   : > { %v1312_v37 = vpop.f32.mrf.mxu3  ;;  %v1109_v12 = vadd.f32 %v5814_v11, %v1058_v15  ;;  %v1892_v15 = vld [vmem:[#allocation2 + $0x6b] sm:$0xff] }
 0x297   : > { %v1363_v10 = vadd.f32 %v1312_v37, %v1109_v12  ;;  %v2400_v37 = vld [vmem:[#allocation2 + $0x7c] sm:$0xff] }
 0x298   : > { %v1568_v28 = vpop.f32.mrf.mxu0  ;;  %v1891_v12 = vld [vmem:[#allocation2 + $0x63] sm:$0xff] }
 0x299   : > { %v5817_v20 = vadd.f32 %v1566_v7, %v1363_v10  ;;  %v4810_v10 = vld [vmem:[#allocation8 + $0x1d8] sm:$0xff] }
 0x29a   : > { %v1785_v63 = vpop.f32.mrf.mxu1  ;;  %2766 = vmatpush.bf16.msrb.mxu1 %v4810_v10 }
 0x29b   : > { %v5820_v30 = vadd.f32 %v1785_v63, %v5717_v49 }
 0x29c   : > { %v1060_v56 = vpop.f32.mrf.mxu2 }
 0x29d   : > { %v1314_v61 = vpop.f32.mrf.mxu3  ;;  %v1110_v45 = vadd.f32 %v5814_v11, %v1060_v56  ;;  %1824 = vmatmul.bf16.gmra.mxu1 %v5723_v17  ;;  %v1922_v56 = vpack.c.bf16 %v1892_v15, %v1891_v12  ;;  %v2401_v12 = vld [vmem:[#allocation2 + $0x84] sm:$0xff] }
 0x29e   : > { %2767 = vmatpush.bf16.msrb.mxu1 %v4809_v51  ;;  %v1661_v51 = vld [vmem:[#allocation2 + $0x122] sm:$0xff] }
 0x29f   : > { %v1364_v25 = vadd.f32 %v1314_v61, %v1110_v45  ;;  %v2399_v61 = vld [vmem:[#allocation2 + $0x74] sm:$0xff] }
 0x2a0   : > { %v1571_v48 = vpop.f32.mrf.mxu0  ;;  %v2430_v45 = vpack.c.bf16 %v2400_v37, %v2399_v61 }
 0x2a1   : > { %2028 = vmatmul.bf16.gmra.mxu2 %v1921_v46  ;;  %v5824_v62 = vadd.f32 %v1568_v28, %v1364_v25 }
 0x2a2   : > { %2282 = vmatmul.bf16.gmra.mxu3 %v2428_v6  ;;  %v1787_v49 = vpop.f32.mrf.mxu1  ;;  %2768 = vmatpush.bf16.msrb.mxu1 %v4808_v14 }
 0x2a3   : > { %2536 = vmatmul.bf16.gmra.mxu0 %v2429_v55  ;;  %v5827_v36 = vadd.f32 %v1787_v49, %v5725_v22 }
 0x2a4   : > { %v1063_v53 = vpop.f32.mrf.mxu2 }
 0x2a5   : > { %v1317_v33 = vpop.f32.mrf.mxu3  ;;  %v1111_v17 = vadd.f32 %v5814_v11, %v1063_v53 }
 0x2a7   : > { %v1365_v54 = vadd.f32 %v1317_v33, %v1111_v17  ;;  %v4807_v17 = vld [vmem:[#allocation8 + $0x1c0] sm:$0xff] }
 0x2a8   : > { %v1573_v39 = vpop.f32.mrf.mxu0  ;;  %2769 = vmatpush.bf16.msrb.mxu1 %v4807_v17  ;;  %v2404_v17 = vld [vmem:[#allocation2 + $0x9c] sm:$0xff] }
 0x2a9   : > { %v5830_v7 = vadd.f32 %v1571_v48, %v1365_v54 }
 0x2aa   : > { %v1790_v5 = vpop.f32.mrf.mxu1 }
 0x2ab   : > { %v5833_v34 = vadd.f32 %v1790_v5, %v5729_v24 }
 0x2ac   : > { %v1065_v6 = vpop.f32.mrf.mxu2 }
 0x2ad   : > { %v1319_v0 = vpop.f32.mrf.mxu3  ;;  %v1112_v22 = vadd.f32 %v5814_v11, %v1065_v6  ;;  %1829 = vmatmul.bf16.gmra.mxu1 %v5736_v2  ;;  %v2402_v6 = vld [vmem:[#allocation2 + $0x8c] sm:$0xff] }
 0x2ae   : > { %v2431_v10 = vpack.c.bf16 %v2402_v6, %v2401_v12  ;;  %v2403_v6 = vld [vmem:[#allocation2 + $0x94] sm:$0xff]  ;;  %v4723_v12 = vld [vmem:[#allocation9 + $0x70] sm:$0xf] }
 0x2af   : > { %v1366_v28 = vadd.f32 %v1319_v0, %v1112_v22  ;;  %v1893_v0 = vld [vmem:[#allocation2 + $0x73] sm:$0xff] }
 0x2b0   : > { %v1576_v63 = vpop.f32.mrf.mxu0 }
 0x2b1   : > { %2033 = vmatmul.bf16.gmra.mxu2 %v1922_v56  ;;  %v5837_v24 = vadd.f32 %v1573_v39, %v1366_v28 }
 0x2b2   : > { %2287 = vmatmul.bf16.gmra.mxu3 %v2429_v55  ;;  %v1792_v29 = vpop.f32.mrf.mxu1 }
 0x2b3   : > { %2541 = vmatmul.bf16.gmra.mxu0 %v2430_v45  ;;  %v5840_v2 = vadd.f32 %v1792_v29, %v5738_v13  ;;  %v1894_v13 = vld [vmem:[#allocation2 + $0x7b] sm:$0xff] }
 0x2b4   : > { %v1068_v25 = vpop.f32.mrf.mxu2  ;;  %v1923_v37 = vpack.c.bf16 %v1894_v13, %v1893_v0  ;;  %v2432_v0 = vpack.c.bf16 %v2404_v17, %v2403_v6 }
 0x2b5   : > { %v1322_v48 = vpop.f32.mrf.mxu3  ;;  %v1113_v46 = vadd.f32 %v5814_v11, %v1068_v25  ;;  %v1662_v25 = vld [vmem:[#allocation2 + $0x12a] sm:$0xff] }
 0x2b6   : > { %v1680_v14 = vpack.c.bf16 %v1662_v25, %v1661_v51 }
 0x2b7   : > { %v1367_v49 = vadd.f32 %v1322_v48, %v1113_v46 }
 0x2b8   : > { %v1578_v53 = vpop.f32.mrf.mxu0 }
 0x2b9   : > { %v5843_v33 = vadd.f32 %v1576_v63, %v1367_v49 }
 0x2ba   : > { %v1795_v55 = vpop.f32.mrf.mxu1 }
 0x2bb   : > { %v5846_v54 = vadd.f32 %v1795_v55, %v5744_v44  ;;  %v1896_v55 = vld [vmem:[#allocation2 + $0x8b] sm:$0xff] }
 0x2bc   : > { %v1070_v39 = vpop.f32.mrf.mxu2 }
 0x2bd   : > { %v1324_v5 = vpop.f32.mrf.mxu3  ;;  %v1114_v42 = vadd.f32 %v5814_v11, %v1070_v39  ;;  %1834 = vmatmul.bf16.gmra.mxu1 %v5751_v60  ;;  %v1895_v39 = vld [vmem:[#allocation2 + $0x83] sm:$0xff] }
 0x2bf   : > { %v1368_v15 = vadd.f32 %v1324_v5, %v1114_v42  ;;  %v1924_v42 = vpack.c.bf16 %v1896_v55, %v1895_v39 }
 0x2c0   : > { %v1581_v22 = vpop.f32.mrf.mxu0 }
 0x2c1   : > { %2038 = vmatmul.bf16.gmra.mxu2 %v1923_v37  ;;  %v5850_v28 = vadd.f32 %v1578_v53, %v1368_v15 }
 0x2c2   : > { %2292 = vmatmul.bf16.gmra.mxu3 %v2430_v45  ;;  %v1797_v44 = vpop.f32.mrf.mxu1 }
 0x2c3   : > { %2546 = vmatmul.bf16.gmra.mxu0 %v2431_v10  ;;  %v5853_v63 = vadd.f32 %v1797_v44, %v5753_v9  ;;  %v4838_v44 = vld [vmem:[#allocation9 + $0x74] sm:$0xf0] }
 0x2c4   : > { %v1073_v56 = vpop.f32.mrf.mxu2 }
 0x2c5   : > { %v1327_v61 = vpop.f32.mrf.mxu3  ;;  %v1115_v60 = vadd.f32 %v5814_v11, %v1073_v56 }
 0x2c7   : > { %v1369_v27 = vadd.f32 %v1327_v61, %v1115_v60  ;;  %v4724_v60 = vor.u32 %v4838_v44, %v4723_v12 }
 0x2c8   : > { %v1583_v29 = vpop.f32.mrf.mxu0 }
 0x2c9   : > { %v5856_v48 = vadd.f32 %v1581_v22, %v1369_v27  ;;  %v4818_v22 = vld [vmem:[#allocation8 + $0x218] sm:$0xff]  ;;  %3307 = vmatpush.bf16.msrb.mxu3 %v4724_v60 }
 0x2ca   : > { %v1800_v46 = vpop.f32.mrf.mxu1  ;;  %3020 = vmatpush.bf16.msrb.mxu2 %v4818_v22  ;;  %v2406_v22 = vld [vmem:[#allocation2 + $0xac] sm:$0xff] }
 0x2cb   : > { %v5859_v45 = vadd.f32 %v1800_v46, %v5760_v19  ;;  %v2644_v46 = vld [vmem:[#allocation2 + $0x2d] sm:$0xff] }
 0x2cc   : > { %v1075_v49 = vpop.f32.mrf.mxu2 }
 0x2cd   : > { %v1329_v53 = vpop.f32.mrf.mxu3  ;;  %v1116_v9 = vadd.f32 %v5814_v11, %v1075_v49  ;;  %1839 = vmatmul.bf16.gmra.mxu1 %v1680_v14 }
 0x2cf   : > { %v1370_v5 = vadd.f32 %v1329_v53, %v1116_v9 }
 0x2d0   : > { %v1586_v13 = vpop.f32.mrf.mxu0 }
 0x2d1   : > { %2043 = vmatmul.bf16.gmra.mxu2 %v1924_v42  ;;  %v5862_v15 = vadd.f32 %v1583_v29, %v1370_v5  ;;  %v4725_v29 = vld [vmem:[#allocation9 + $0x78] sm:$0xf0]  ;;  %v1898_v42 = vld [vmem:[#allocation2 + $0x9b] sm:$0xff] }
 0x2d2   : > { %2297 = vmatmul.bf16.gmra.mxu3 %v2431_v10  ;;  %v1802_v19 = vpop.f32.mrf.mxu1  ;;  %v4837_v10 = vld [vmem:[#allocation9 + $0x74] sm:$0xf]  ;;  %v1897_v5 = vld [vmem:[#allocation2 + $0x93] sm:$0xff] }
 0x2d3   : > { %2551 = vmatmul.bf16.gmra.mxu0 %v2432_v0  ;;  %v5865_v37 = vadd.f32 %v1802_v19, %v5767_v8  ;;  %v4728_v14 = vor.u32 %v4837_v10, %v4725_v29  ;;  %v2643_v8 = vld [vmem:[#allocation2 + $0x25] sm:$0xff] }
 0x2d4   : > { %v1078_v56 = vpop.f32.mrf.mxu2  ;;  %v2679_v9 = vpack.c.bf16 %v2644_v46, %v2643_v8  ;;  %v2405_v19 = vld [vmem:[#allocation2 + $0xa4] sm:$0xff] }
 0x2d5   : > { %v1332_v61 = vpop.f32.mrf.mxu3  ;;  %v1117_v27 = vadd.f32 %v5814_v11, %v1078_v56  ;;  %3406 = vmatpush.bf16.msrb.mxu0 %v4728_v14  ;;  %v2433_v56 = vpack.c.bf16 %v2406_v22, %v2405_v19  ;;  %v2646_v8 = vld [vmem:[#allocation2 + $0x3d] sm:$0xff] }
 0x2d7   : > { %v1371_v51 = vadd.f32 %v1332_v61, %v1117_v27  ;;  %v1084_v61 = vadd.f32 %v5814_v11, %v5620_v40 }
 0x2d8   : > { %v1588_v25 = vpop.f32.mrf.mxu0 }
 0x2d9   : > { %v5868_v49 = vadd.f32 %v1586_v13, %v1371_v51  ;;  %v1925_v13 = vpack.c.bf16 %v1898_v42, %v1897_v5  ;;  %v1338_v29 = vadd.f32 %v5622_v3, %v1084_v61  ;;  %v1900_v3 = vld [vmem:[#allocation2 + $0xab] sm:$0xff] }
 0x2da   : > { %v1805_v53 = vpop.f32.mrf.mxu1 }
 0x2db   : > { %v5871_v55 = vadd.f32 %v1805_v53, %v5773_v32  ;;  %v1592_v40 = vadd.f32 %v5616_v38, %v1338_v29 }
 0x2dc   : > { %v1080_v17 = vpop.f32.mrf.mxu2 }
 0x2dd   : > { %v1334_v39 = vpop.f32.mrf.mxu3  ;;  %v1118_v6 = vadd.f32 %v5814_v11, %v1080_v17  ;;  %2770 = vmatmul.bf16.vlgmr.msrb.gmra.mxu1 %v2679_v9  ;;  %v1846_v9 = vadd.f32 %v5741_v41, %v1592_v40  ;;  %v2648_v40 = vld [vmem:[#allocation2 + $0x4d] sm:$0xff] }
 0x2df   : > { %v1372_v12 = vadd.f32 %v1334_v39, %v1118_v6  ;;  %v1899_v6 = vld [vmem:[#allocation2 + $0xa3] sm:$0xff] }
 0x2e0   : > { %v2517_v44 = vpop.f32.mrf.mxu0  ;;  %v1926_v38 = vpack.c.bf16 %v1900_v3, %v1899_v6  ;;  %v2410_v3 = vld [vmem:[#allocation2 + $0xcc] sm:$0xff] }
 0x2e1   : > { %2048 = vmatmul.bf16.gmra.mxu2 %v1925_v13  ;;  %v5876_v32 = vadd.f32 %v1588_v25, %v1372_v12  ;;  %v2645_v25 = vld [vmem:[#allocation2 + $0x35] sm:$0xff] }
 0x2e2   : > { %2302 = vmatmul.bf16.gmra.mxu3 %v2432_v0  ;;  %v1807_v60 = vpop.f32.mrf.mxu1  ;;  %v2680_v17 = vpack.c.bf16 %v2646_v8, %v2645_v25  ;;  %v2407_v12 = vld [vmem:[#allocation2 + $0xb4] sm:$0xff]  ;;  %v4836_v8 = vld [vmem:[#allocation9 + $0x64] sm:$0xf0]  ;;  %v2647_v25 = vld [vmem:[#allocation2 + $0x45] sm:$0xff] }
 0x2e3   : > { %2556 = vmatmul.bf16.gmra.mxu0 %v2433_v56  ;;  %v5879_v27 = vadd.f32 %v1807_v60, %v5780_v35 }
 0x2e4   : > { %v2009_v51 = vpop.f32.mrf.mxu2 }
 0x2e5   : > { %v2263_v10 = vpop.f32.mrf.mxu3  ;;  %v2099_v46 = vadd.f32 %v2009_v51, %v5732_v1  ;;  %v2408_v1 = vld [vmem:[#allocation2 + $0xbc] sm:$0xff] }
 0x2e7   : > { %v2353_v14 = vadd.f32 %v2263_v10, %v2099_v46  ;;  %v4817_v46 = vld [vmem:[#allocation8 + $0x210] sm:$0xff] }
 0x2e8   : > { %v2519_v53 = vpop.f32.mrf.mxu0  ;;  %3021 = vmatpush.bf16.msrb.mxu2 %v4817_v46 }
 0x2e9   : > { %v5884_v11 = vadd.f32 %v2517_v44, %v2353_v14  ;;  %v2434_v44 = vpack.c.bf16 %v2408_v1, %v2407_v12  ;;  %v4715_v14 = vld [vmem:[#allocation9 + $0x60] sm:$0xf]  ;;  %v4717_v12 = vld [vmem:[#allocation9 + $0x68] sm:$0xf0] }
 0x2ea   : > { %v1810_v0 = vpop.f32.mrf.mxu1 }
 0x2eb   : > { %v5888_v35 = vadd.f32 %v1810_v0, %v5786_v16  ;;  %v4716_v0 = vor.u32 %v4836_v8, %v4715_v14 }
 0x2ec   : > { %v2011_v39 = vpop.f32.mrf.mxu2 }
 0x2ed   : > { %v2265_v5 = vpop.f32.mrf.mxu3  ;;  %v2100_v42 = vadd.f32 %v2011_v39, %v1846_v9  ;;  %2775 = vmatmul.bf16.gmra.mxu1 %v2680_v17  ;;  %3308 = vmatpush.bf16.msrb.mxu3 %v4716_v0  ;;  %v2681_v9 = vpack.c.bf16 %v2648_v40, %v2647_v25  ;;  %v2650_v40 = vld [vmem:[#allocation2 + $0x5d] sm:$0xff]  ;;  %v2649_v25 = vld [vmem:[#allocation2 + $0x55] sm:$0xff] }
 0x2ef   : > { %v2354_v19 = vadd.f32 %v2265_v5, %v2100_v42  ;;  %v1901_v42 = vld [vmem:[#allocation2 + $0xb3] sm:$0xff] }
 0x2f0   : > { %v2522_v22 = vpop.f32.mrf.mxu0 }
 0x2f1   : > { %2053 = vmatmul.bf16.gmra.mxu2 %v1926_v38  ;;  %v5890_v13 = vadd.f32 %v2519_v53, %v2354_v19  ;;  %v4835_v38 = vld [vmem:[#allocation9 + $0x64] sm:$0xf] }
 0x2f2   : > { %2307 = vmatmul.bf16.gmra.mxu3 %v2433_v56  ;;  %v1812_v41 = vpop.f32.mrf.mxu1 }
 0x2f3   : > { %2561 = vmatmul.bf16.gmra.mxu0 %v2434_v44  ;;  %v5893_v16 = vadd.f32 %v1812_v41, %v5793_v57 }
 0x2f4   : > { %v2014_v61 = vpop.f32.mrf.mxu2 }
 0x2f5   : > { %v2268_v60 = vpop.f32.mrf.mxu3  ;;  %v2101_v51 = vadd.f32 %v2014_v61, %v5747_v31  ;;  %v1902_v31 = vld [vmem:[#allocation2 + $0xbb] sm:$0xff]  ;;  %v4720_v61 = vor.u32 %v4835_v38, %v4717_v12 }
 0x2f6   : > { %v1927_v19 = vpack.c.bf16 %v1902_v31, %v1901_v42  ;;  %v2412_v31 = vld [vmem:[#allocation2 + $0xdc] sm:$0xff] }
 0x2f7   : > { %v2355_v10 = vadd.f32 %v2268_v60, %v2101_v51  ;;  %3407 = vmatpush.bf16.msrb.mxu0 %v4720_v61 }
 0x2f8   : > { %v2524_v29 = vpop.f32.mrf.mxu0 }
 0x2f9   : > { %v5896_v56 = vadd.f32 %v2522_v22, %v2355_v10  ;;  %v2409_v22 = vld [vmem:[#allocation2 + $0xc4] sm:$0xff] }
 0x2fa   : > { %v1815_v53 = vpop.f32.mrf.mxu1  ;;  %v2435_v41 = vpack.c.bf16 %v2410_v3, %v2409_v22 }
 0x2fb   : > { %v5899_v57 = vadd.f32 %v1815_v53, %v5799_v50 }
 0x2fc   : > { %v2016_v17 = vpop.f32.mrf.mxu2 }
 0x2fd   : > { %v2270_v39 = vpop.f32.mrf.mxu3  ;;  %v2102_v5 = vadd.f32 %v2016_v17, %v5757_v47  ;;  %2780 = vmatmul.bf16.gmra.mxu1 %v2681_v9 }
 0x2ff   : > { %v2356_v1 = vadd.f32 %v2270_v39, %v2102_v5  ;;  %v1903_v5 = vld [vmem:[#allocation2 + $0xc3] sm:$0xff] }
 0x300   : > { %v2527_v6 = vpop.f32.mrf.mxu0 }
 0x301   : > { %2058 = vmatmul.bf16.gmra.mxu2 %v1927_v19  ;;  %v5902_v50 = vadd.f32 %v2524_v29, %v2356_v1  ;;  %v2682_v29 = vpack.c.bf16 %v2650_v40, %v2649_v25  ;;  %v2411_v1 = vld [vmem:[#allocation2 + $0xd4] sm:$0xff] }
 0x302   : > { %2312 = vmatmul.bf16.gmra.mxu3 %v2434_v44  ;;  %v1817_v60 = vpop.f32.mrf.mxu1 }
 0x303   : > { %2566 = vmatmul.bf16.gmra.mxu0 %v2435_v41  ;;  %v5905_v51 = vadd.f32 %v1817_v60, %v5806_v18  ;;  %v1904_v18 = vld [vmem:[#allocation2 + $0xcb] sm:$0xff] }
 0x304   : > { %v2019_v47 = vpop.f32.mrf.mxu2  ;;  %v1928_v42 = vpack.c.bf16 %v1904_v18, %v1903_v5  ;;  %v2414_v18 = vld [vmem:[#allocation2 + $0xec] sm:$0xff] }
 0x305   : > { %v2273_v10 = vpop.f32.mrf.mxu3  ;;  %v2103_v46 = vadd.f32 %v2019_v47, %v5763_v52  ;;  %v4816_v47 = vld [vmem:[#allocation8 + $0x208] sm:$0xff] }
 0x306   : > { %3022 = vmatpush.bf16.msrb.mxu2 %v4816_v47 }
 0x307   : > { %v2357_v14 = vadd.f32 %v2273_v10, %v2103_v46  ;;  %v2652_v10 = vld [vmem:[#allocation2 + $0x6d] sm:$0xff] }
 0x308   : > { %v2529_v8 = vpop.f32.mrf.mxu0 }
 0x309   : > { %v5908_v0 = vadd.f32 %v2527_v6, %v2357_v14  ;;  %v2436_v6 = vpack.c.bf16 %v2412_v31, %v2411_v1 }
 0x30a   : > { %v1820_v53 = vpop.f32.mrf.mxu1 }
 0x30b   : > { %v5911_v44 = vadd.f32 %v1820_v53, %v5817_v20  ;;  %v4707_v53 = vld [vmem:[#allocation9 + $0x50] sm:$0xf] }
 0x30c   : > { %v2021_v9 = vpop.f32.mrf.mxu2 }
 0x30d   : > { %v2275_v17 = vpop.f32.mrf.mxu3  ;;  %v2104_v39 = vadd.f32 %v2021_v9, %v5770_v58  ;;  %2785 = vmatmul.bf16.gmra.mxu1 %v2682_v29  ;;  %v1906_v9 = vld [vmem:[#allocation2 + $0xdb] sm:$0xff] }
 0x30f   : > { %v2358_v52 = vadd.f32 %v2275_v17, %v2104_v39  ;;  %v1905_v39 = vld [vmem:[#allocation2 + $0xd3] sm:$0xff] }
 0x310   : > { %v2532_v3 = vpop.f32.mrf.mxu0 }
 0x311   : > { %2063 = vmatmul.bf16.gmra.mxu2 %v1928_v42  ;;  %v5914_v19 = vadd.f32 %v2529_v8, %v2358_v52  ;;  %v1929_v52 = vpack.c.bf16 %v1906_v9, %v1905_v39 }
 0x312   : > { %2317 = vmatmul.bf16.gmra.mxu3 %v2435_v41  ;;  %v1822_v20 = vpop.f32.mrf.mxu1  ;;  %v2651_v41 = vld [vmem:[#allocation2 + $0x65] sm:$0xff] }
 0x313   : > { %2571 = vmatmul.bf16.gmra.mxu0 %v2436_v6  ;;  %v5917_v22 = vadd.f32 %v1822_v20, %v5824_v62  ;;  %v2683_v40 = vpack.c.bf16 %v2652_v10, %v2651_v41  ;;  %v4834_v62 = vld [vmem:[#allocation9 + $0x54] sm:$0xf0]  ;;  %v4833_v20 = vld [vmem:[#allocation9 + $0x54] sm:$0xf]  ;;  %v2654_v41 = vld [vmem:[#allocation2 + $0x7d] sm:$0xff] }
 0x314   : > { %v2024_v38 = vpop.f32.mrf.mxu2  ;;  %v4708_v17 = vor.u32 %v4834_v62, %v4707_v53 }
 0x315   : > { %v2278_v12 = vpop.f32.mrf.mxu3  ;;  %v2105_v58 = vadd.f32 %v2024_v38, %v5776_v43  ;;  %v4709_v38 = vld [vmem:[#allocation9 + $0x58] sm:$0xf0] }
 0x316   : > { %3309 = vmatpush.bf16.msrb.mxu3 %v4708_v17  ;;  %v2415_v17 = vld [vmem:[#allocation2 + $0xf4] sm:$0xff] }
 0x317   : > { %v2359_v61 = vadd.f32 %v2278_v12, %v2105_v58 }
 0x318   : > { %v2534_v60 = vpop.f32.mrf.mxu0 }
 0x319   : > { %v5920_v46 = vadd.f32 %v2532_v3, %v2359_v61  ;;  %v2413_v3 = vld [vmem:[#allocation2 + $0xe4] sm:$0xff] }
 0x31a   : > { %v1825_v14 = vpop.f32.mrf.mxu1  ;;  %v2437_v42 = vpack.c.bf16 %v2414_v18, %v2413_v3 }
 0x31b   : > { %v5923_v8 = vadd.f32 %v1825_v14, %v5830_v7 }
 0x31c   : > { %v2026_v25 = vpop.f32.mrf.mxu2 }
 0x31d   : > { %v2280_v29 = vpop.f32.mrf.mxu3  ;;  %v2106_v43 = vadd.f32 %v2026_v25, %v5783_v4  ;;  %2790 = vmatmul.bf16.gmra.mxu1 %v2683_v40  ;;  %v4712_v4 = vor.u32 %v4833_v20, %v4709_v38 }
 0x31f   : > { %v2360_v31 = vadd.f32 %v2280_v29, %v2106_v43  ;;  %3408 = vmatpush.bf16.msrb.mxu0 %v4712_v4  ;;  %v1908_v29 = vld [vmem:[#allocation2 + $0xeb] sm:$0xff]  ;;  %v1907_v43 = vld [vmem:[#allocation2 + $0xe3] sm:$0xff] }
 0x320   : > { %v2537_v5 = vpop.f32.mrf.mxu0 }
 0x321   : > { %2068 = vmatmul.bf16.gmra.mxu2 %v1929_v52  ;;  %v5926_v7 = vadd.f32 %v2534_v60, %v2360_v31  ;;  %v2653_v60 = vld [vmem:[#allocation2 + $0x75] sm:$0xff]  ;;  %v1930_v31 = vpack.c.bf16 %v1908_v29, %v1907_v43  ;;  %v4832_v43 = vld [vmem:[#allocation9 + $0x44] sm:$0xf0] }
 0x322   : > { %2322 = vmatmul.bf16.gmra.mxu3 %v2436_v6  ;;  %v1827_v1 = vpop.f32.mrf.mxu1  ;;  %v2684_v62 = vpack.c.bf16 %v2654_v41, %v2653_v60  ;;  %v1909_v60 = vld [vmem:[#allocation2 + $0xf3] sm:$0xff] }
 0x323   : > { %2576 = vmatmul.bf16.gmra.mxu0 %v2437_v42  ;;  %v5929_v12 = vadd.f32 %v1827_v1, %v5837_v24 }
 0x324   : > { %v2029_v58 = vpop.f32.mrf.mxu2 }
 0x325   : > { %v2283_v61 = vpop.f32.mrf.mxu3  ;;  %v2107_v47 = vadd.f32 %v2029_v58, %v5789_v26  ;;  %v2416_v26 = vld [vmem:[#allocation2 + $0xfc] sm:$0xff]  ;;  %v2656_v58 = vld [vmem:[#allocation2 + $0x8d] sm:$0xff] }
 0x327   : > { %v2361_v10 = vadd.f32 %v2283_v61, %v2107_v47 }
 0x328   : > { %v2539_v14 = vpop.f32.mrf.mxu0 }
 0x329   : > { %v5932_v40 = vadd.f32 %v2537_v5, %v2361_v10  ;;  %v2438_v5 = vpack.c.bf16 %v2416_v26, %v2415_v17  ;;  %v2655_v10 = vld [vmem:[#allocation2 + $0x85] sm:$0xff]  ;;  %v4815_v17 = vld [vmem:[#allocation8 + $0x200] sm:$0xff] }
 0x32a   : > { %v1830_v6 = vpop.f32.mrf.mxu1  ;;  %v4699_v26 = vld [vmem:[#allocation9 + $0x40] sm:$0xf]  ;;  %3023 = vmatpush.bf16.msrb.mxu2 %v4815_v17 }
 0x32b   : > { %v5935_v53 = vadd.f32 %v1830_v6, %v5843_v33 }
 0x32c   : > { %v2031_v25 = vpop.f32.mrf.mxu2 }
 0x32d   : > { %v2285_v24 = vpop.f32.mrf.mxu3  ;;  %v2108_v9 = vadd.f32 %v2031_v25, %v5796_v21  ;;  %2795 = vmatmul.bf16.gmra.mxu1 %v2684_v62  ;;  %v2417_v25 = vld [vmem:[#allocation2 + $0x104] sm:$0xff] }
 0x32f   : > { %v2362_v18 = vadd.f32 %v2285_v24, %v2108_v9 }
 0x330   : > { %v2542_v39 = vpop.f32.mrf.mxu0 }
 0x331   : > { %2073 = vmatmul.bf16.gmra.mxu2 %v1930_v31  ;;  %v5938_v52 = vadd.f32 %v2539_v14, %v2362_v18  ;;  %v2685_v14 = vpack.c.bf16 %v2656_v58, %v2655_v10  ;;  %v4831_v58 = vld [vmem:[#allocation9 + $0x44] sm:$0xf] }
 0x332   : > { %2327 = vmatmul.bf16.gmra.mxu3 %v2437_v42  ;;  %v1832_v33 = vpop.f32.mrf.mxu1  ;;  %v2658_v10 = vld [vmem:[#allocation2 + $0x9d] sm:$0xff] }
 0x333   : > { %2581 = vmatmul.bf16.gmra.mxu0 %v2438_v5  ;;  %v5941_v3 = vadd.f32 %v1832_v33, %v5850_v28  ;;  %v1910_v28 = vld [vmem:[#allocation2 + $0xfb] sm:$0xff] }
 0x334   : > { %v2034_v1 = vpop.f32.mrf.mxu2  ;;  %v1931_v9 = vpack.c.bf16 %v1910_v28, %v1909_v60 }
 0x335   : > { %v2288_v20 = vpop.f32.mrf.mxu3  ;;  %v2109_v21 = vadd.f32 %v2034_v1, %v5802_v23  ;;  %v2418_v23 = vld [vmem:[#allocation2 + $0x10c] sm:$0xff] }
 0x336   : > { %v2439_v18 = vpack.c.bf16 %v2418_v23, %v2417_v25  ;;  %v2419_v23 = vld [vmem:[#allocation2 + $0x114] sm:$0xff] }
 0x337   : > { %v2363_v38 = vadd.f32 %v2288_v20, %v2109_v21 }
 0x338   : > { %v2544_v4 = vpop.f32.mrf.mxu0 }
 0x339   : > { %v5944_v61 = vadd.f32 %v2542_v39, %v2363_v38  ;;  %v4700_v39 = vor.u32 %v4832_v43, %v4699_v26 }
 0x33a   : > { %v1835_v47 = vpop.f32.mrf.mxu1 }
 0x33b   : > { %v5947_v42 = vadd.f32 %v1835_v47, %v5856_v48  ;;  %3310 = vmatpush.bf16.msrb.mxu3 %v4700_v39  ;;  %v4701_v47 = vld [vmem:[#allocation9 + $0x48] sm:$0xf0] }
 0x33c   : > { %v2036_v41 = vpop.f32.mrf.mxu2 }
 0x33d   : > { %v2290_v6 = vpop.f32.mrf.mxu3  ;;  %v2110_v62 = vadd.f32 %v2036_v41, %v5809_v59  ;;  %2800 = vmatmul.bf16.gmra.mxu1 %v2685_v14  ;;  %v2657_v41 = vld [vmem:[#allocation2 + $0x95] sm:$0xff] }
 0x33f   : > { %v2364_v24 = vadd.f32 %v2290_v6, %v2110_v62  ;;  %v2686_v6 = vpack.c.bf16 %v2658_v10, %v2657_v41  ;;  %v1912_v62 = vld [vmem:[#allocation2 + $0x10b] sm:$0xff] }
 0x340   : > { %v2547_v29 = vpop.f32.mrf.mxu0 }
 0x341   : > { %2078 = vmatmul.bf16.gmra.mxu2 %v1931_v9  ;;  %v5950_v48 = vadd.f32 %v2544_v4, %v2364_v24  ;;  %v2420_v24 = vld [vmem:[#allocation2 + $0x11c] sm:$0xff] }
 0x342   : > { %2332 = vmatmul.bf16.gmra.mxu3 %v2438_v5  ;;  %v1837_v31 = vpop.f32.mrf.mxu1  ;;  %v4704_v5 = vor.u32 %v4831_v58, %v4701_v47  ;;  %v2440_v17 = vpack.c.bf16 %v2420_v24, %v2419_v23  ;;  %v4691_v24 = vld [vmem:[#allocation9 + $0x30] sm:$0xf] }
 0x343   : > { %2586 = vmatmul.bf16.gmra.mxu0 %v2439_v18  ;;  %v5953_v59 = vadd.f32 %v1837_v31, %v5862_v15 }
 0x344   : > { %v2039_v33 = vpop.f32.mrf.mxu2  ;;  %3409 = vmatpush.bf16.msrb.mxu0 %v4704_v5 }
 0x345   : > { %v2293_v1 = vpop.f32.mrf.mxu3  ;;  %v2111_v20 = vadd.f32 %v2039_v33, %v5820_v30  ;;  %v1911_v30 = vld [vmem:[#allocation2 + $0x103] sm:$0xff] }
 0x346   : > { %v1932_v9 = vpack.c.bf16 %v1912_v62, %v1911_v30 }
 0x347   : > { %v2365_v21 = vadd.f32 %v2293_v1, %v2111_v20  ;;  %v2659_v1 = vld [vmem:[#allocation2 + $0xa5] sm:$0xff]  ;;  %v2660_v20 = vld [vmem:[#allocation2 + $0xad] sm:$0xff] }
 0x348   : > { %v5956_v38 = vpop.f32.mrf.mxu0 }
 0x349   : > { %v5958_v4 = vadd.f32 %v2547_v29, %v2365_v21 }
 0x34a   : > { %v1840_v14 = vpop.f32.mrf.mxu1 }
 0x34b   : > { %v5961_v15 = vadd.f32 %v1840_v14, %v5868_v49  ;;  %v1914_v14 = vld [vmem:[#allocation2 + $0x11b] sm:$0xff] }
 0x34c   : > { %v2041_v60 = vpop.f32.mrf.mxu2 }
 0x34d   : > { %v5963_v28 = vpop.f32.mrf.mxu3  ;;  %v5966_v25 = vadd.f32 %v2041_v60, %v5827_v36  ;;  %2805 = vmatmul.bf16.gmra.mxu1 %v2686_v6  ;;  %v2422_v6 = vld [vmem:[#allocation2 + $0x12c] sm:$0xff] }
 0x350   : > { %v2552_v29 = vpop.f32.mrf.mxu0 }
 0x351   : > { %2083 = vmatmul.bf16.gmra.mxu2 %v1932_v9 }
 0x352   : > { %2337 = vmatmul.bf16.gmra.mxu3 %v2439_v18  ;;  %v1842_v49 = vpop.f32.mrf.mxu1  ;;  %v2687_v18 = vpack.c.bf16 %v2660_v20, %v2659_v1  ;;  %v4693_v1 = vld [vmem:[#allocation9 + $0x38] sm:$0xf0]  ;;  %v2662_v20 = vld [vmem:[#allocation2 + $0xbd] sm:$0xff] }
 0x353   : > { %2591 = vmatmul.bf16.gmra.mxu0 %v2440_v17  ;;  %v5969_v26 = vadd.f32 %v1842_v49, %v5876_v32  ;;  %v1913_v32 = vld [vmem:[#allocation2 + $0x113] sm:$0xff] }
 0x354   : > { %v2044_v43 = vpop.f32.mrf.mxu2  ;;  %v1933_v30 = vpack.c.bf16 %v1914_v14, %v1913_v32  ;;  %v2423_v14 = vld [vmem:[#allocation2 + $0x134] sm:$0xff] }
 0x355   : > { %v2298_v39 = vpop.f32.mrf.mxu3  ;;  %v2113_v31 = vadd.f32 %v2044_v43, %v5833_v34  ;;  %v2421_v34 = vld [vmem:[#allocation2 + $0x124] sm:$0xff] }
 0x356   : > { %v2441_v62 = vpack.c.bf16 %v2422_v6, %v2421_v34  ;;  %v2424_v34 = vld [vmem:[#allocation2 + $0x13c] sm:$0xff] }
 0x357   : > { %v2367_v33 = vadd.f32 %v2298_v39, %v2113_v31 }
 0x358   : > { %v5972_v36 = vpop.f32.mrf.mxu0 }
 0x359   : > { %v5974_v21 = vadd.f32 %v2552_v29, %v2367_v33  ;;  %v4830_v29 = vld [vmem:[#allocation9 + $0x34] sm:$0xf0]  ;;  %v4829_v33 = vld [vmem:[#allocation9 + $0x34] sm:$0xf] }
 0x35a   : > { %v2771_v58 = vpop.f32.mrf.mxu1  ;;  %v4692_v43 = vor.u32 %v4830_v29, %v4691_v24 }
 0x35b   : > { %v5977_v47 = vadd.f32 %v2771_v58, %v5884_v11 }
 0x35c   : > { %v2046_v10 = vpop.f32.mrf.mxu2  ;;  %3311 = vmatpush.bf16.msrb.mxu3 %v4692_v43 }
 0x35d   : > { %v5979_v5 = vpop.f32.mrf.mxu3  ;;  %v5982_v41 = vadd.f32 %v2046_v10, %v5840_v2  ;;  %2810 = vmatmul.bf16.gmra.mxu1 %v2687_v18 }
 0x360   : > { %v2557_v60 = vpop.f32.mrf.mxu0 }
 0x361   : > { %2088 = vmatmul.bf16.gmra.mxu2 %v1933_v30  ;;  %v1915_v30 = vld [vmem:[#allocation2 + $0x123] sm:$0xff] }
 0x362   : > { %2342 = vmatmul.bf16.gmra.mxu3 %v2440_v17  ;;  %v2773_v11 = vpop.f32.mrf.mxu1  ;;  %v4696_v17 = vor.u32 %v4829_v33, %v4693_v1 }
 0x363   : > { %2596 = vmatmul.bf16.gmra.mxu0 %v2441_v62  ;;  %v5985_v23 = vadd.f32 %v2773_v11, %v5890_v13  ;;  %v2661_v13 = vld [vmem:[#allocation2 + $0xb5] sm:$0xff]  ;;  %v1916_v11 = vld [vmem:[#allocation2 + $0x12b] sm:$0xff] }
 0x364   : > { %v2049_v9 = vpop.f32.mrf.mxu2  ;;  %3410 = vmatpush.bf16.msrb.mxu0 %v4696_v17  ;;  %v2688_v32 = vpack.c.bf16 %v2662_v20, %v2661_v13 }
 0x365   : > { %v2303_v49 = vpop.f32.mrf.mxu3  ;;  %v2115_v2 = vadd.f32 %v2049_v9, %v5846_v54  ;;  %v1934_v9 = vpack.c.bf16 %v1916_v11, %v1915_v30 }
 0x367   : > { %v2369_v39 = vadd.f32 %v2303_v49, %v2115_v2 }
 0x368   : > { %v5988_v31 = vpop.f32.mrf.mxu0 }
 0x369   : > { %v5990_v58 = vadd.f32 %v2557_v60, %v2369_v39  ;;  %v2442_v60 = vpack.c.bf16 %v2424_v34, %v2423_v14  ;;  %v2898_v34 = vld [vmem:[#allocation2 + $0x2e] sm:$0xff] }
 0x36a   : > { %v2776_v18 = vpop.f32.mrf.mxu1 }
 0x36b   : > { %v5993_v10 = vadd.f32 %v2776_v18, %v5896_v56  ;;  %v2663_v18 = vld [vmem:[#allocation2 + $0xc5] sm:$0xff] }
 0x36c   : > { %v2051_v54 = vpop.f32.mrf.mxu2 }
 0x36d   : > { %v5995_v6 = vpop.f32.mrf.mxu3  ;;  %v5998_v24 = vadd.f32 %v2051_v54, %v5853_v63  ;;  %2815 = vmatmul.bf16.gmra.mxu1 %v2688_v32  ;;  %v2664_v63 = vld [vmem:[#allocation2 + $0xcd] sm:$0xff] }
 0x370   : > { %v2562_v29 = vpop.f32.mrf.mxu0 }
 0x371   : > { %2093 = vmatmul.bf16.gmra.mxu2 %v1934_v9 }
 0x372   : > { %2347 = vmatmul.bf16.gmra.mxu3 %v2441_v62  ;;  %v2778_v49 = vpop.f32.mrf.mxu1  ;;  %v2689_v62 = vpack.c.bf16 %v2664_v63, %v2663_v18  ;;  %v2665_v18 = vld [vmem:[#allocation2 + $0xd5] sm:$0xff] }
 0x373   : > { %2601 = vmatmul.bf16.gmra.mxu0 %v2442_v60  ;;  %v6001_v56 = vadd.f32 %v2778_v49, %v5902_v50  ;;  %v2897_v50 = vld [vmem:[#allocation2 + $0x26] sm:$0xff] }
 0x374   : > { %v2054_v43 = vpop.f32.mrf.mxu2  ;;  %v2933_v30 = vpack.c.bf16 %v2898_v34, %v2897_v50 }
 0x375   : > { %v2308_v2 = vpop.f32.mrf.mxu3  ;;  %v2117_v39 = vadd.f32 %v2054_v43, %v5859_v45 }
 0x377   : > { %v2371_v33 = vadd.f32 %v2308_v2, %v2117_v39  ;;  %v4683_v2 = vld [vmem:[#allocation9 + $0x20] sm:$0xf]  ;;  %v4828_v39 = vld [vmem:[#allocation9 + $0x24] sm:$0xf0] }
 0x378   : > { %v6004_v1 = vpop.f32.mrf.mxu0 }
 0x379   : > { %v6006_v20 = vadd.f32 %v2562_v29, %v2371_v33  ;;  %v2666_v33 = vld [vmem:[#allocation2 + $0xdd] sm:$0xff] }
 0x37a   : > { %v2781_v17 = vpop.f32.mrf.mxu1 }
 0x37b   : > { %v6009_v13 = vadd.f32 %v2781_v17, %v5908_v0 }
 0x37c   : > { %v2056_v32 = vpop.f32.mrf.mxu2 }
 0x37d   : > { %v6011_v14 = vpop.f32.mrf.mxu3  ;;  %v6014_v54 = vadd.f32 %v2056_v32, %v5865_v37  ;;  %2820 = vmatmul.bf16.gmra.mxu1 %v2689_v62  ;;  %v4684_v37 = vor.u32 %v4828_v39, %v4683_v2 }
 0x37f   : > { %3312 = vmatpush.bf16.msrb.mxu3 %v4684_v37 }
 0x380   : > { %v2567_v45 = vpop.f32.mrf.mxu0 }
 0x381   : > { %3024 = vmatmul.bf16.vlgmr.msrb.gmra.mxu2 %v2933_v30  ;;  %v2899_v30 = vld [vmem:[#allocation2 + $0x36] sm:$0xff] }
 0x382   : > { %v2783_v11 = vpop.f32.mrf.mxu1 }
 0x383   : > { %v6017_v60 = vadd.f32 %v2783_v11, %v5914_v19  ;;  %v2690_v19 = vpack.c.bf16 %v2666_v33, %v2665_v18 }
 0x384   : > { %v2059_v29 = vpop.f32.mrf.mxu2 }
 0x385   : > { %v2313_v0 = vpop.f32.mrf.mxu3  ;;  %v2119_v9 = vadd.f32 %v2059_v29, %v5871_v55  ;;  %v2900_v55 = vld [vmem:[#allocation2 + $0x3e] sm:$0xff] }
 0x386   : > { %v2934_v29 = vpack.c.bf16 %v2900_v55, %v2899_v30 }
 0x387   : > { %v2373_v49 = vadd.f32 %v2313_v0, %v2119_v9  ;;  %v4685_v0 = vld [vmem:[#allocation9 + $0x28] sm:$0xf0] }
 0x388   : > { %v6020_v43 = vpop.f32.mrf.mxu0 }
 0x389   : > { %v6022_v63 = vadd.f32 %v2567_v45, %v2373_v49  ;;  %v4827_v45 = vld [vmem:[#allocation9 + $0x24] sm:$0xf] }
 0x38a   : > { %v2786_v17 = vpop.f32.mrf.mxu1  ;;  %v4688_v9 = vor.u32 %v4827_v45, %v4685_v0 }
 0x38b   : > { %v6025_v62 = vadd.f32 %v2786_v17, %v5920_v46  ;;  %v2668_v17 = vld [vmem:[#allocation2 + $0xed] sm:$0xff] }
 0x38c   : > { %v2061_v32 = vpop.f32.mrf.mxu2  ;;  %3411 = vmatpush.bf16.msrb.mxu0 %v4688_v9 }
 0x38d   : > { %v6027_v50 = vpop.f32.mrf.mxu3  ;;  %v6030_v34 = vadd.f32 %v2061_v32, %v5879_v27  ;;  %2825 = vmatmul.bf16.gmra.mxu1 %v2690_v19  ;;  %v2667_v32 = vld [vmem:[#allocation2 + $0xe5] sm:$0xff] }
 0x38e   : > { %v2691_v30 = vpack.c.bf16 %v2668_v17, %v2667_v32  ;;  %v2670_v32 = vld [vmem:[#allocation2 + $0xfd] sm:$0xff] }
 0x390   : > { %v2572_v11 = vpop.f32.mrf.mxu0 }
 0x391   : > { %3029 = vmatmul.bf16.gmra.mxu2 %v2934_v29 }
 0x392   : > { %v2788_v49 = vpop.f32.mrf.mxu1 }
 0x393   : > { %v6033_v46 = vadd.f32 %v2788_v49, %v5926_v7  ;;  %v2902_v7 = vld [vmem:[#allocation2 + $0x4e] sm:$0xff] }
 0x394   : > { %v2064_v2 = vpop.f32.mrf.mxu2 }
 0x395   : > { %v2318_v39 = vpop.f32.mrf.mxu3  ;;  %v2121_v33 = vadd.f32 %v2064_v2, %v5888_v35  ;;  %v2901_v35 = vld [vmem:[#allocation2 + $0x46] sm:$0xff] }
 0x396   : > { %v2935_v49 = vpack.c.bf16 %v2902_v7, %v2901_v35  ;;  %v4675_v35 = vld [vmem:[#allocation9 + $0x10] sm:$0xf] }
 0x397   : > { %v2375_v37 = vadd.f32 %v2318_v39, %v2121_v33 }
 0x398   : > { %v6036_v27 = vpop.f32.mrf.mxu0 }
 0x399   : > { %6788 = vst [vmem:[#allocation16_spill] sm:$0xff] %v6036_v27  ;;  %v6038_v18 = vadd.f32 %v2572_v11, %v2375_v37  ;;  %v2904_v27 = vld [vmem:[#allocation2 + $0x5e] sm:$0xff] }
 0x39a   : > { %v2791_v19 = vpop.f32.mrf.mxu1 }
 0x39b   : > { %6789 = vst [vmem:[#allocation17_spill] sm:$0xff] %v6038_v18  ;;  %v6041_v55 = vadd.f32 %v2791_v19, %v5932_v40  ;;  %v2669_v19 = vld [vmem:[#allocation2 + $0xf5] sm:$0xff] }
 0x39c   : > { %v2066_v29 = vpop.f32.mrf.mxu2  ;;  %v2692_v7 = vpack.c.bf16 %v2670_v32, %v2669_v19 }
 0x39d   : > { %v6043_v45 = vpop.f32.mrf.mxu3  ;;  %v6046_v0 = vadd.f32 %v2066_v29, %v5893_v16  ;;  %2830 = vmatmul.bf16.gmra.mxu1 %v2691_v30 }
 0x3a0   : > { %v2577_v9 = vpop.f32.mrf.mxu0 }
 0x3a1   : > { %3034 = vmatmul.bf16.gmra.mxu2 %v2935_v49  ;;  %v4826_v49 = vld [vmem:[#allocation9 + $0x14] sm:$0xf0] }
 0x3a2   : > { %v2793_v11 = vpop.f32.mrf.mxu1  ;;  %v4676_v18 = vor.u32 %v4826_v49, %v4675_v35 }
 0x3a3   : > { %v6049_v2 = vadd.f32 %v2793_v11, %v5938_v52 }
 0x3a4   : > { %v2069_v39 = vpop.f32.mrf.mxu2  ;;  %3313 = vmatpush.bf16.msrb.mxu3 %v4676_v18  ;;  %v2672_v18 = vld [vmem:[#allocation2 + $0x10d] sm:$0xff] }
 0x3a5   : > { %v2323_v40 = vpop.f32.mrf.mxu3  ;;  %v2123_v33 = vadd.f32 %v2069_v39, %v5899_v57  ;;  %v2903_v39 = vld [vmem:[#allocation2 + $0x56] sm:$0xff] }
 0x3a7   : > { %v2377_v37 = vadd.f32 %v2323_v40, %v2123_v33  ;;  %v2936_v40 = vpack.c.bf16 %v2904_v27, %v2903_v39  ;;  %v4825_v33 = vld [vmem:[#allocation9 + $0x14] sm:$0xf] }
 0x3a8   : > { %v6052_v17 = vpop.f32.mrf.mxu0 }
 0x3a9   : > { %6790 = vst [vmem:[#allocation18_spill] sm:$0xff] %v6052_v17  ;;  %v6054_v16 = vadd.f32 %v2577_v9, %v2377_v37 }
 0x3aa   : > { %v2796_v30 = vpop.f32.mrf.mxu1 }
 0x3ab   : > { %v6057_v29 = vadd.f32 %v2796_v30, %v5944_v61  ;;  %v4677_v61 = vld [vmem:[#allocation9 + $0x18] sm:$0xf0] }
 0x3ac   : > { %v2071_v52 = vpop.f32.mrf.mxu2  ;;  %v4680_v19 = vor.u32 %v4825_v33, %v4677_v61  ;;  %v2906_v33 = vld [vmem:[#allocation2 + $0x6e] sm:$0xff]  ;;  %v2905_v61 = vld [vmem:[#allocation2 + $0x66] sm:$0xff] }
 0x3ad   : > { %v6059_v11 = vpop.f32.mrf.mxu3  ;;  %v6062_v57 = vadd.f32 %v2071_v52, %v5905_v51  ;;  %2835 = vmatmul.bf16.gmra.mxu1 %v2692_v7  ;;  %v2671_v7 = vld [vmem:[#allocation2 + $0x105] sm:$0xff] }
 0x3ae   : > { %3412 = vmatpush.bf16.msrb.mxu0 %v4680_v19  ;;  %v2693_v27 = vpack.c.bf16 %v2672_v18, %v2671_v7  ;;  %v2937_v19 = vpack.c.bf16 %v2906_v33, %v2905_v61  ;;  %v2674_v7 = vld [vmem:[#allocation2 + $0x11d] sm:$0xff] }
 0x3af   : > { %v2907_v33 = vld [vmem:[#allocation2 + $0x76] sm:$0xff] }
 0x3b0   : > { %v2582_v9 = vpop.f32.mrf.mxu0 }
 0x3b1   : > { %3039 = vmatmul.bf16.gmra.mxu2 %v2936_v40 }
 0x3b2   : > { %v2798_v37 = vpop.f32.mrf.mxu1 }
 0x3b3   : > { %v6065_v32 = vadd.f32 %v2798_v37, %v5950_v48 }
 0x3b4   : > { %v2074_v30 = vpop.f32.mrf.mxu2 }
 0x3b5   : > { %v2328_v17 = vpop.f32.mrf.mxu3  ;;  %v2125_v35 = vadd.f32 %v2074_v30, %v5911_v44 }
 0x3b7   : > { %v2379_v51 = vadd.f32 %v2328_v17, %v2125_v35 }
 0x3b8   : > { %v6068_v49 = vpop.f32.mrf.mxu0 }
 0x3b9   : > { %6791 = vst [vmem:[#allocation19_spill] sm:$0xff] %v6068_v49  ;;  %v6070_v52 = vadd.f32 %v2582_v9, %v2379_v51  ;;  %v2673_v51 = vld [vmem:[#allocation2 + $0x115] sm:$0xff] }
 0x3bb   : > { %6792 = vst [vmem:[#allocation20_spill] sm:$0xff] %v6070_v52  ;;  %v2694_v52 = vpack.c.bf16 %v2674_v7, %v2673_v51  ;;  %v4823_v7 = vld [vmem:[#allocation9 + $0x4] sm:$0xf] }
 0x3bc   : > { %v2076_v39 = vpop.f32.mrf.mxu2 }
 0x3bd   : > { %v6072_v40 = vpop.f32.mrf.mxu3  ;;  %v6075_v48 = vadd.f32 %v2076_v39, %v5917_v22  ;;  %2840 = vmatmul.bf16.gmra.mxu1 %v2693_v27  ;;  %v2908_v27 = vld [vmem:[#allocation2 + $0x7e] sm:$0xff] }
 0x3c0   : > { %v2587_v37 = vpop.f32.mrf.mxu0 }
 0x3c1   : > { %3044 = vmatmul.bf16.gmra.mxu2 %v2937_v19  ;;  %v2938_v19 = vpack.c.bf16 %v2908_v27, %v2907_v33 }
 0x3c4   : > { %v2079_v44 = vpop.f32.mrf.mxu2 }
 0x3c5   : > { %v2333_v17 = vpop.f32.mrf.mxu3  ;;  %v2127_v30 = vadd.f32 %v2079_v44, %v5923_v8  ;;  %v4667_v8 = vld [vmem:[#allocation9] sm:$0xf]  ;;  %v4824_v44 = vld [vmem:[#allocation9 + $0x4] sm:$0xf0] }
 0x3c7   : > { %v2381_v35 = vadd.f32 %v2333_v17, %v2127_v30  ;;  %v4668_v17 = vor.u32 %v4824_v44, %v4667_v8 }
 0x3c8   : > { %v6078_v9 = vpop.f32.mrf.mxu0 }
 0x3c9   : > { %6793 = vst [vmem:[#allocation21_spill] sm:$0xff] %v6078_v9  ;;  %v6080_v18 = vadd.f32 %v2587_v37, %v2381_v35  ;;  %3314 = vmatpush.bf16.msrb.mxu3 %v4668_v17  ;;  %v4669_v9 = vld [vmem:[#allocation9 + $0x8] sm:$0xf0] }
 0x3cb   : > { %6794 = vst [vmem:[#allocation22_spill] sm:$0xff] %v6080_v18  ;;  %v2675_v18 = vld [vmem:[#allocation2 + $0x125] sm:$0xff] }
 0x3cc   : > { %v2081_v49 = vpop.f32.mrf.mxu2 }
 0x3cd   : > { %v6082_v22 = vpop.f32.mrf.mxu3  ;;  %v6085_v39 = vadd.f32 %v2081_v49, %v5929_v12  ;;  %2845 = vmatmul.bf16.gmra.mxu1 %v2694_v52  ;;  %v4672_v12 = vor.u32 %v4823_v7, %v4669_v9 }
 0x3ce   : > { %6795 = vst [vmem:[#allocation23_spill] sm:$0xff] %v6082_v22  ;;  %v2676_v22 = vld [vmem:[#allocation2 + $0x12d] sm:$0xff] }
 0x3cf   : > { %3413 = vmatpush.bf16.msrb.mxu0 %v4672_v12  ;;  %v2695_v27 = vpack.c.bf16 %v2676_v22, %v2675_v18 }
 0x3d0   : > { %v2592_v61 = vpop.f32.mrf.mxu0 }
 0x3d1   : > { %3049 = vmatmul.bf16.gmra.mxu2 %v2938_v19  ;;  %v2910_v19 = vld [vmem:[#allocation2 + $0x8e] sm:$0xff] }
 0x3d4   : > { %v2084_v30 = vpop.f32.mrf.mxu2 }
 0x3d5   : > { %v2338_v37 = vpop.f32.mrf.mxu3  ;;  %v2129_v35 = vadd.f32 %v2084_v30, %v5935_v53  ;;  %v2909_v53 = vld [vmem:[#allocation2 + $0x86] sm:$0xff] }
 0x3d6   : > { %v2939_v17 = vpack.c.bf16 %v2910_v19, %v2909_v53  ;;  %v2911_v19 = vld [vmem:[#allocation2 + $0x96] sm:$0xff] }
 0x3d7   : > { %v2383_v51 = vadd.f32 %v2338_v37, %v2129_v35 }
 0x3d8   : > { %v6088_v49 = vpop.f32.mrf.mxu0 }
 0x3d9   : > { %6796 = vst [vmem:[#allocation24_spill] sm:$0xff] %v6088_v49  ;;  %v6090_v52 = vadd.f32 %v2592_v61, %v2383_v51  ;;  %v2677_v61 = vld [vmem:[#allocation2 + $0x135] sm:$0xff]  ;;  %v2678_v51 = vld [vmem:[#allocation2 + $0x13d] sm:$0xff] }
 0x3da   : > { %v2696_v18 = vpack.c.bf16 %v2678_v51, %v2677_v61  ;;  %v2914_v51 = vld [vmem:[#allocation2 + $0xae] sm:$0xff] }
 0x3dc   : > { %v2086_v33 = vpop.f32.mrf.mxu2 }
 0x3dd   : > { %v6092_v8 = vpop.f32.mrf.mxu3  ;;  %v6095_v44 = vadd.f32 %v2086_v33, %v5941_v3  ;;  %2850 = vmatmul.bf16.gmra.mxu1 %v2695_v27  ;;  %v2912_v3 = vld [vmem:[#allocation2 + $0x9e] sm:$0xff] }
 0x3de   : > { %v2940_v53 = vpack.c.bf16 %v2912_v3, %v2911_v19 }
 0x3e0   : > { %v2597_v30 = vpop.f32.mrf.mxu0 }
 0x3e1   : > { %3054 = vmatmul.bf16.gmra.mxu2 %v2939_v17 }
 0x3e4   : > { %v2089_v37 = vpop.f32.mrf.mxu2 }
 0x3e5   : > { %v2343_v9 = vpop.f32.mrf.mxu3  ;;  %v2131_v35 = vadd.f32 %v2089_v37, %v5947_v42 }
 0x3e7   : > { %v2385_v7 = vadd.f32 %v2343_v9, %v2131_v35 }
 0x3e8   : > { %v6105_v33 = vpop.f32.mrf.mxu0 }
 0x3e9   : > { %v6098_v22 = vadd.f32 %v2597_v30, %v2385_v7  ;;  %6797 = vst [vmem:[#allocation25_spill] sm:$0xff] %v6105_v33  ;;  %v2916_v33 = vld [vmem:[#allocation2 + $0xbe] sm:$0xff] }
 0x3ec   : > { %v2091_v12 = vpop.f32.mrf.mxu2 }
 0x3ed   : > { %v6100_v49 = vpop.f32.mrf.mxu3  ;;  %v6103_v27 = vadd.f32 %v2091_v12, %v5953_v59  ;;  %2855 = vmatmul.bf16.gmra.mxu1 %v2696_v18  ;;  %v2913_v59 = vld [vmem:[#allocation2 + $0xa6] sm:$0xff] }
 0x3ee   : > { %v2941_v18 = vpack.c.bf16 %v2914_v51, %v2913_v59  ;;  %v2918_v51 = vld [vmem:[#allocation2 + $0xce] sm:$0xff] }
 0x3f0   : > { %v2602_v9 = vpop.f32.mrf.mxu0 }
 0x3f1   : > { %3059 = vmatmul.bf16.gmra.mxu2 %v2940_v53  ;;  %v2915_v53 = vld [vmem:[#allocation2 + $0xb6] sm:$0xff] }
 0x3f4   : > { %v2094_v42 = vpop.f32.mrf.mxu2 }
 0x3f5   : > { %v2133_v17 = vadd.f32 %v2094_v42, %v5961_v15  ;;  %v2348_v37 = vpop.f32.mrf.mxu3 }
 0x3f7   : > { %v2387_v30 = vadd.f32 %v2348_v37, %v2133_v17  ;;  %v2942_v37 = vpack.c.bf16 %v2916_v33, %v2915_v53  ;;  %v2920_v53 = vld [vmem:[#allocation2 + $0xde] sm:$0xff] }
 0x3f9   : > { %v6108_v35 = vadd.f32 %v2602_v9, %v2387_v30 }
 0x3fb   : > { %6798 = vst [vmem:[#allocation26_spill] sm:$0xff] %v6108_v35 }
 0x3fc   : > { %v2096_v61 = vpop.f32.mrf.mxu2 }
 0x3fd   : > { %v6111_v7 = vadd.f32 %v2096_v61, %v5969_v26 }
 0x401   : > { %3064 = vmatmul.bf16.gmra.mxu2 %v2941_v18 }
 0x404   : > { %v3025_v12 = vpop.f32.mrf.mxu2 }
 0x405   : > { %v3115_v3 = vadd.f32 %v3025_v12, %v5977_v47  ;;  %v2917_v47 = vld [vmem:[#allocation2 + $0xc6] sm:$0xff] }
 0x406   : > { %v2943_v35 = vpack.c.bf16 %v2918_v51, %v2917_v47  ;;  %v2922_v51 = vld [vmem:[#allocation2 + $0xee] sm:$0xff] }
 0x407   : > { %v3151_v42 = vmax.f32 %v3115_v3, 0.0 }
 0x40c   : > { %v3027_v19 = vpop.f32.mrf.mxu2 }
 0x40d   : > { %v3116_v15 = vadd.f32 %v3027_v19, %v5985_v23 }
 0x40f   : > { %v3152_v17 = vmax.f32 %v3116_v15, 0.0 }
 0x411   : > { %v3187_v9 = vpack.c.bf16 %v3152_v17, %v3151_v42  ;;  %3069 = vmatmul.bf16.gmra.mxu2 %v2942_v37 }
 0x413   : > { %3315 = vmatmul.bf16.vlgmr.msrb.gmra.mxu3 %v3187_v9  ;;  %3414 = vmatmul.bf16.vlgmr.msrb.gmra.mxu0 %v3187_v9  ;;  %v2801_v9 = vpop.f32.mrf.mxu1 }
 0x414   : > { %v3030_v26 = vpop.f32.mrf.mxu2 }
 0x415   : > { %v3117_v30 = vadd.f32 %v3030_v26, %v5993_v10  ;;  %v2919_v10 = vld [vmem:[#allocation2 + $0xd6] sm:$0xff] }
 0x416   : > { %v2944_v37 = vpack.c.bf16 %v2920_v53, %v2919_v10  ;;  %v2923_v53 = vld [vmem:[#allocation2 + $0xf6] sm:$0xff] }
 0x417   : > { %v3153_v18 = vmax.f32 %v3117_v30, 0.0 }
 0x41b   : > { %v2803_v30 = vpop.f32.mrf.mxu1 }
 0x41c   : > { %v3032_v61 = vpop.f32.mrf.mxu2 }
 0x41d   : > { %v3118_v59 = vadd.f32 %v3032_v61, %v6001_v56 }
 0x41f   : > { %v3154_v12 = vmax.f32 %v3118_v59, 0.0  ;;  %v2921_v59 = vld [vmem:[#allocation2 + $0xe6] sm:$0xff] }
 0x421   : > { %3074 = vmatmul.bf16.gmra.mxu2 %v2943_v35  ;;  %v3188_v23 = vpack.c.bf16 %v3154_v12, %v3153_v18  ;;  %v2945_v18 = vpack.c.bf16 %v2922_v51, %v2921_v59  ;;  %v2925_v51 = vld [vmem:[#allocation2 + $0x106] sm:$0xff] }
 0x423   : > { %3320 = vmatmul.bf16.gmra.mxu3 %v3188_v23  ;;  %3419 = vmatmul.bf16.gmra.mxu0 %v3188_v23 }
 0x424   : > { %v3035_v33 = vpop.f32.mrf.mxu2 }
 0x425   : > { %v3119_v3 = vadd.f32 %v3035_v33, %v6009_v13  ;;  %v2806_v33 = vpop.f32.mrf.mxu1 }
 0x427   : > { %v3155_v42 = vmax.f32 %v3119_v3, 0.0 }
 0x42c   : > { %v3037_v19 = vpop.f32.mrf.mxu2 }
 0x42d   : > { %v3120_v15 = vadd.f32 %v3037_v19, %v6017_v60 }
 0x42f   : > { %v3156_v17 = vmax.f32 %v3120_v15, 0.0 }
 0x431   : > { %3079 = vmatmul.bf16.gmra.mxu2 %v2944_v37  ;;  %v3189_v56 = vpack.c.bf16 %v3156_v17, %v3155_v42  ;;  %v2808_v17 = vpop.f32.mrf.mxu1 }
 0x433   : > { %3325 = vmatmul.bf16.gmra.mxu3 %v3189_v56  ;;  %3424 = vmatmul.bf16.gmra.mxu0 %v3189_v56 }
 0x434   : > { %v3040_v35 = vpop.f32.mrf.mxu2 }
 0x435   : > { %v3121_v26 = vadd.f32 %v3040_v35, %v6025_v62  ;;  %v2924_v62 = vld [vmem:[#allocation2 + $0xfe] sm:$0xff] }
 0x437   : > { %v3157_v47 = vmax.f32 %v3121_v26, 0.0 }
 0x439   : > { %v2811_v35 = vpop.f32.mrf.mxu1 }
 0x43c   : > { %v3042_v61 = vpop.f32.mrf.mxu2 }
 0x43d   : > { %v3122_v13 = vadd.f32 %v3042_v61, %v6033_v46  ;;  %v2946_v46 = vpack.c.bf16 %v2924_v62, %v2923_v53 }
 0x43f   : > { %v3158_v60 = vmax.f32 %v3122_v13, 0.0 }
 0x441   : > { %3084 = vmatmul.bf16.gmra.mxu2 %v2945_v18  ;;  %v3190_v12 = vpack.c.bf16 %v3158_v60, %v3157_v47  ;;  %v2813_v18 = vpop.f32.mrf.mxu1 }
 0x443   : > { %3330 = vmatmul.bf16.gmra.mxu3 %v3190_v12  ;;  %3429 = vmatmul.bf16.gmra.mxu0 %v3190_v12 }
 0x444   : > { %v3045_v23 = vpop.f32.mrf.mxu2 }
 0x445   : > { %v3123_v3 = vadd.f32 %v3045_v23, %v6041_v55  ;;  %v2926_v55 = vld [vmem:[#allocation2 + $0x10e] sm:$0xff]  ;;  %v2366_v23 = vadd.f32 %v5963_v28, %v5966_v25  ;;  %v2875_v25 = vadd.f32 %v2806_v33, %v5974_v21 }
 0x446   : > { %v6144_v33 = vld [vmem:[%s5383_s22 + $0x38] sm:$0xff] }
 0x447   : > { %v3159_v10 = vmax.f32 %v3123_v3, 0.0  ;;  %v2873_v3 = vadd.f32 %v2801_v9, %v5958_v4  ;;  %v2368_v4 = vadd.f32 %v5979_v5, %v5982_v41  ;;  %v6141_v41 = vpop.f32.mrf.mxu0 }
 0x449   : > { %v2622_v9 = vadd.f32 %v5972_v36, %v2368_v4  ;;  %v2370_v36 = vadd.f32 %v5995_v6, %v5998_v24  ;;  %v6174_v4 = vld [vmem:[%s5383_s22 + $0x20] sm:$0xff] }
 0x44c   : > { %v3047_v19 = vpop.f32.mrf.mxu2 }
 0x44d   : > { %v3124_v15 = vadd.f32 %v3047_v19, %v6049_v2  ;;  %v2947_v2 = vpack.c.bf16 %v2926_v55, %v2925_v51  ;;  %v2929_v55 = vld [vmem:[#allocation2 + $0x126] sm:$0xff] }
 0x44f   : > { %v3160_v42 = vmax.f32 %v3124_v15, 0.0  ;;  %v2928_v15 = vld [vmem:[#allocation2 + $0x11e] sm:$0xff] }
 0x451   : > { %3089 = vmatmul.bf16.gmra.mxu2 %v2946_v46  ;;  %v3191_v37 = vpack.c.bf16 %v3160_v42, %v3159_v10  ;;  %v6129_v42 = vpop.f32.mrf.mxu1 }
 0x453   : > { %3335 = vmatmul.bf16.gmra.mxu3 %v3191_v37  ;;  %3434 = vmatmul.bf16.gmra.mxu0 %v3191_v37 }
 0x454   : > { %v3050_v56 = vpop.f32.mrf.mxu2 }
 0x455   : > { %v3125_v26 = vadd.f32 %v3050_v56, %v6057_v29  ;;  %v2620_v29 = vadd.f32 %v5956_v38, %v2366_v23  ;;  %v2877_v23 = vadd.f32 %v2811_v35, %v5990_v58 }
 0x457   : > { %v3161_v59 = vmax.f32 %v3125_v26, 0.0  ;;  %v2874_v19 = vadd.f32 %v2803_v30, %v2620_v29  ;;  %v2876_v30 = vadd.f32 %v2808_v17, %v2622_v9  ;;  %v3526_v17 = vrot.slane %v6144_v33, 6  ;;  %v3221_v29 = vld [vmem:[%s6777_s6] sm:$0x3] }
 0x459   : > { %v6133_v38 = vpop.f32.mrf.mxu1 }
 0x45c   : > { %v3052_v61 = vpop.f32.mrf.mxu2 }
 0x45d   : > { %v3126_v13 = vadd.f32 %v3052_v61, %v6065_v32  ;;  %v2927_v32 = vld [vmem:[#allocation2 + $0x116] sm:$0xff] }
 0x45e   : > { %v2948_v56 = vpack.c.bf16 %v2928_v15, %v2927_v32 }
 0x45f   : > { %v3162_v47 = vmax.f32 %v3126_v13, 0.0  ;;  %v2930_v13 = vld [vmem:[#allocation2 + $0x12e] sm:$0xff] }
 0x461   : > { %3094 = vmatmul.bf16.gmra.mxu2 %v2947_v2  ;;  %v3192_v60 = vpack.c.bf16 %v3162_v47, %v3161_v59  ;;  %v6137_v5 = vpop.f32.mrf.mxu1 }
 0x463   : > { %3340 = vmatmul.bf16.gmra.mxu3 %v3192_v60  ;;  %3439 = vmatmul.bf16.gmra.mxu0 %v3192_v60  ;;  %v2949_v60 = vpack.c.bf16 %v2930_v13, %v2929_v55  ;;  %v4957_v55 = vld [vmem:[%s5383_s22 + $0x8] sm:$0xff] }
 0x464   : > { %v3055_v12 = vpop.f32.mrf.mxu2 }
 0x465   : > { %v3127_v53 = vadd.f32 %v3055_v12, %v2873_v3  ;;  %v2624_v3 = vadd.f32 %v5988_v31, %v2370_v36  ;;  %v6158_v31 = vperm.slane %v3221_v29, 1 }
 0x467   : > { %v3163_v46 = vmax.f32 %v3127_v53, 0.0  ;;  %v2932_v53 = vld [vmem:[#allocation2 + $0x13e] sm:$0xff]  ;;  %v2878_v24 = vadd.f32 %v2813_v18, %v2624_v3 }
 0x469   : > { %v6156_v15 = vpop.f32.mrf.mxu1 }
 0x46c   : > { %v3057_v62 = vpop.f32.mrf.mxu2 }
 0x46d   : > { %v3128_v10 = vadd.f32 %v3057_v62, %v2874_v19  ;;  %v2931_v19 = vld [vmem:[#allocation2 + $0x136] sm:$0xff]  ;;  %v6153_v62 = vld [vmem:[%s5383_s22 + $0x28] sm:$0xff] }
 0x46e   : > { %v3523_v6 = vrot.slane %v6153_v62, 6  ;;  %v2950_v35 = vpack.c.bf16 %v2932_v53, %v2931_v19  ;;  %v4959_v19 = vld [vmem:[%s5383_s22] sm:$0xff] }
 0x46f   : > { %v3164_v37 = vmax.f32 %v3128_v10, 0.0 }
 0x471   : > { %v3193_v26 = vpack.c.bf16 %v3164_v37, %v3163_v46  ;;  %3099 = vmatmul.bf16.gmra.mxu2 %v2948_v56  ;;  %v6165_v46 = vsel %vm3521_vm0, %v3523_v6, %v3526_v17  ;;  %v6168_v37 = vld [vmem:[%s5383_s22 + $0x30] sm:$0xff]  ;;  %v6171_v56 = vpop.f32.mrf.mxu3 }
 0x472   : > { %v3524_v18 = vrot.slane %v6168_v37, 6 }
 0x473   : > { %3345 = vmatmul.bf16.gmra.mxu3 %v3193_v26  ;;  %3444 = vmatmul.bf16.gmra.mxu0 %v3193_v26 }
 0x474   : > { %v3060_v28 = vpop.f32.mrf.mxu2 }
 0x475   : > { %v3129_v61 = vadd.f32 %v3060_v28, %v2875_v25  ;;  %v3522_v25 = vrot.slane %v6174_v4, 6 }
 0x477   : > { %v3165_v47 = vmax.f32 %v3129_v61, 0.0 }
 0x47c   : > { %v3062_v51 = vpop.f32.mrf.mxu2 }
 0x47d   : > { %v3130_v59 = vadd.f32 %v3062_v51, %v2876_v30  ;;  %v6183_v51 = vsel %vm3521_vm0, %v3522_v25, %v3524_v18 }
 0x47f   : > { %v3166_v2 = vmax.f32 %v3130_v59, 0.0  ;;  %v6186_v59 = vperm.slane %v3221_v29, 0 }
 0x481   : > { %v3194_v12 = vpack.c.bf16 %v3166_v2, %v3165_v47  ;;  %3104 = vmatmul.bf16.gmra.mxu2 %v2949_v60  ;;  %v2372_v2 = vadd.f32 %v6011_v14, %v6014_v54  ;;  %v2879_v14 = vadd.f32 %v6129_v42, %v6006_v20 }
 0x483   : > { %3350 = vmatmul.bf16.gmra.mxu3 %v3194_v12  ;;  %3449 = vmatmul.bf16.gmra.mxu0 %v3194_v12  ;;  %v6190_v12 = vpop.f32.mrf.mxu1  ;;  %v2626_v54 = vadd.f32 %v6004_v1, %v2372_v2 }
 0x484   : > { %v3065_v21 = vpop.f32.mrf.mxu2 }
 0x485   : > { %v3131_v32 = vadd.f32 %v3065_v21, %v2877_v23  ;;  %v6199_v23 = vld [vmem:[%s5383_s22 + $0x58] sm:$0xff] }
 0x486   : > { %v3580_v3 = vrot.slane %v6199_v23, 4 }
 0x487   : > { %v3167_v26 = vmax.f32 %v3131_v32, 0.0  ;;  %v6208_v32 = vld [vmem:[%s5383_s22 + $0x48] sm:$0xff] }
 0x48c   : > { %v3067_v10 = vpop.f32.mrf.mxu2 }
 0x48d   : > { %v3132_v58 = vadd.f32 %v3067_v10, %v2878_v24  ;;  %v3577_v10 = vrot.slane %v6208_v32, 4 }
 0x48f   : > { %v3168_v28 = vmax.f32 %v3132_v58, 0.0  ;;  %v2880_v58 = vadd.f32 %v6133_v38, %v2626_v54  ;;  %v4964_v54 = vld [vmem:[%s5383_s22 + $0x10] sm:$0xff] }
 0x490   : > { %v3415_v9 = vpop.f32.mrf.mxu0 }
 0x491   : > { %v3195_v30 = vpack.c.bf16 %v3168_v28, %v3167_v26  ;;  %v3416_v61 = vadd.f32 %v3415_v9, %v6158_v31  ;;  %3109 = vmatmul.bf16.gmra.mxu2 %v2950_v35  ;;  %v4961_v28 = vld [vmem:[%s5383_s22 + $0x18] sm:$0xff] }
 0x493   : > { %v3506_v13 = vadd.f32 %v4957_v55, %v3416_v61  ;;  %3355 = vmatmul.bf16.gmra.mxu3 %v3195_v30  ;;  %3454 = vmatmul.bf16.gmra.mxu0 %v3195_v30  ;;  %v6219_v30 = vsel %vm3575_vm1, %v3577_v10, %v3580_v3  ;;  %v6222_v61 = vld [vmem:[%s5383_s22 + $0x50] sm:$0xff] }
 0x494   : > { %v3070_v47 = vpop.f32.mrf.mxu2  ;;  %v3578_v38 = vrot.slane %v6222_v61, 4 }
 0x495   : > { %v3510_v60 = vmax.f32 %v3506_v13, 0.0  ;;  %v3133_v35 = vadd.f32 %v3070_v47, %v2879_v14 }
 0x496   : > { %v3316_v21 = vpop.f32.mrf.mxu3 }
 0x497   : > { %3514 = vst [vmem:[%s6194_s9 + $0x8] sm:$0xff] %v3510_v60  ;;  %v3317_v36 = vadd.f32 %v3316_v21, %v6186_v59  ;;  %v3169_v13 = vmax.f32 %v3133_v35, 0.0  ;;  %v6228_v60 = vld [vmem:[%s5383_s22 + $0x40] sm:$0xff] }
 0x498   : > { %v3417_v29 = vpop.f32.mrf.mxu0  ;;  %v3576_v21 = vrot.slane %v6228_v60, 4 }
 0x499   : > { %v3505_v53 = vadd.f32 %v4959_v19, %v3317_v36  ;;  %v3418_v24 = vadd.f32 %v3417_v29, %v6158_v31  ;;  %v6231_v36 = vpop.f32.mrf.mxu1 }
 0x49b   : > { %v3509_v26 = vmax.f32 %v3505_v53, 0.0  ;;  %v3508_v9 = vadd.f32 %v4961_v28, %v3418_v24  ;;  %v6240_v24 = vsel %vm3575_vm1, %v3576_v21, %v3578_v38 }
 0x49c   : > { %v3072_v20 = vpop.f32.mrf.mxu2 }
 0x49d   : > { %3513 = vst [vmem:[%s6194_s9] sm:$0xff] %v3509_v26  ;;  %v3512_v1 = vmax.f32 %v3508_v9, 0.0  ;;  %v3134_v42 = vadd.f32 %v3072_v20, %v2880_v58  ;;  %v2374_v26 = vadd.f32 %v6027_v50, %v6030_v34 }
 0x49e   : > { %v3318_v55 = vpop.f32.mrf.mxu3 }
 0x49f   : > { %3516 = vst [vmem:[%s6194_s9 + $0x18] sm:$0xff] %v3512_v1  ;;  %v3170_v47 = vmax.f32 %v3134_v42, 0.0  ;;  %v3319_v2 = vadd.f32 %v3318_v55, %v6186_v59  ;;  %v6249_v42 = vld [vmem:[%s5383_s22 + $0x78] sm:$0xff] }
 0x4a0   : > { %v3420_v29 = vpop.f32.mrf.mxu0  ;;  %v3632_v55 = vrot.slane %v6249_v42, 2  ;;  %v6377_v42 = vld [vmem:[%s5383_s22 + $0xb0] sm:$0xff] }
 0x4a1   : > { %v3196_v14 = vpack.c.bf16 %v3170_v47, %v3169_v13  ;;  %v3507_v19 = vadd.f32 %v4964_v54, %v3319_v2  ;;  %v3421_v53 = vadd.f32 %v3420_v29, %v6158_v31  ;;  %v2881_v13 = vadd.f32 %v6137_v5, %v6022_v63  ;;  %v6256_v34 = vpop.f32.mrf.mxu1 }
 0x4a2   : > { %v2628_v47 = vadd.f32 %v6020_v43, %v2374_v26 }
 0x4a3   : > { %v3511_v58 = vmax.f32 %v3507_v19, 0.0  ;;  %3360 = vmatmul.bf16.gmra.mxu3 %v3196_v14  ;;  %3459 = vmatmul.bf16.gmra.mxu0 %v3196_v14  ;;  %v3535_v28 = vadd.f32 %v3523_v6, %v3421_v53  ;;  %v6259_v6 = vld [vmem:[%s5383_s22 + $0x68] sm:$0xff] }
 0x4a4   : > { %v3075_v35 = vpop.f32.mrf.mxu2  ;;  %v3629_v2 = vrot.slane %v6259_v6, 2  ;;  %v2882_v29 = vadd.f32 %v6156_v15, %v2628_v47 }
 0x4a5   : > { %3515 = vst [vmem:[%s6194_s9 + $0x10] sm:$0xff] %v3511_v58  ;;  %v3541_v62 = vmax.f32 %v3535_v28, 0.0  ;;  %v3135_v14 = vadd.f32 %v3075_v35, %v2881_v13  ;;  %v6274_v58 = vld [vmem:[%s5383_s22 + $0x70] sm:$0xff] }
 0x4a6   : > { %v3321_v9 = vpop.f32.mrf.mxu3  ;;  %v6271_v53 = vsel %vm3552_vm2, %v3629_v2, %v3632_v55  ;;  %v6779_v15 = vrot.slane %v6274_v58, 2 }
 0x4a7   : > { %v3322_v20 = vadd.f32 %v3321_v9, %v6186_v59  ;;  %v3171_v4 = vmax.f32 %v3135_v14, 0.0  ;;  %v6279_v9 = vld [vmem:[%s5383_s22 + $0x60] sm:$0xff] }
 0x4a8   : > { %v3422_v1 = vpop.f32.mrf.mxu0 }
 0x4a9   : > { %v3423_v50 = vadd.f32 %v3422_v1, %v6158_v31  ;;  %v3534_v63 = vadd.f32 %v3522_v25, %v3322_v20  ;;  %v3628_v20 = vrot.slane %v6279_v9, 2 }
 0x4ab   : > { %v3537_v54 = vadd.f32 %v6165_v46, %v3423_v50  ;;  %v3556_v46 = vrot.slane %v3541_v62, 2  ;;  %v3540_v1 = vmax.f32 %v3534_v63, 0.0  ;;  %v6291_v62 = vsel %vm3552_vm2, %v3628_v20, %v6779_v15 }
 0x4ac   : > { %v3077_v43 = vpop.f32.mrf.mxu2 }
 0x4ad   : > { %v3543_v5 = vmax.f32 %v3537_v54, 0.0  ;;  %v3136_v19 = vadd.f32 %v3077_v43, %v2882_v29  ;;  %v6295_v43 = vpop.f32.mrf.mxu1 }
 0x4ae   : > { %v3323_v35 = vpop.f32.mrf.mxu3 }
 0x4af   : > { %v3557_v25 = vrot.slane %v3543_v5, 2  ;;  %v3172_v26 = vmax.f32 %v3136_v19, 0.0  ;;  %v3324_v28 = vadd.f32 %v3323_v35, %v6186_v59  ;;  %v2376_v5 = vadd.f32 %v6043_v45, %v6046_v0 }
 0x4b0   : > { %v3425_v13 = vpop.f32.mrf.mxu0  ;;  %v3553_v19 = vrot.slane %v3540_v1, 2 }
 0x4b1   : > { %v3558_v47 = vsel %vm3552_vm2, %v3556_v46, %v3557_v25  ;;  %v3197_v50 = vpack.c.bf16 %v3172_v26, %v3171_v4  ;;  %v3536_v29 = vadd.f32 %v6183_v51, %v3324_v28  ;;  %v3426_v54 = vadd.f32 %v3425_v13, %v6158_v31 }
 0x4b2   : > { %3568 = vst [vmem:[%s6194_s9 + $0x28] sm:$0xff] %v3558_v47  ;;  %v6799_v47 = vld [vmem:[#allocation17_spill] sm:$0xff] }
 0x4b3   : > { %v3542_v14 = vmax.f32 %v3536_v29, 0.0  ;;  %v3539_v63 = vadd.f32 %v3526_v17, %v3426_v54  ;;  %3365 = vmatmul.bf16.gmra.mxu3 %v3197_v50  ;;  %3464 = vmatmul.bf16.gmra.mxu0 %v3197_v50  ;;  %v3589_v4 = vadd.f32 %v3577_v10, %v3426_v54  ;;  %v2883_v50 = vadd.f32 %v6190_v12, %v6799_v47  ;;  %v6800_v29 = vld [vmem:[#allocation16_spill] sm:$0xff] }
 0x4b4   : > { %v3080_v51 = vpop.f32.mrf.mxu2  ;;  %v2630_v15 = vadd.f32 %v6800_v29, %v2376_v5 }
 0x4b5   : > { %v3554_v46 = vrot.slane %v3542_v14, 2  ;;  %v3545_v35 = vmax.f32 %v3539_v63, 0.0  ;;  %v3595_v32 = vmax.f32 %v3589_v4, 0.0  ;;  %v3137_v54 = vadd.f32 %v3080_v51, %v2883_v50 }
 0x4b6   : > { %v3326_v26 = vpop.f32.mrf.mxu3  ;;  %v2884_v1 = vadd.f32 %v6231_v36, %v2630_v15 }
 0x4b7   : > { %v3555_v28 = vsel %vm3552_vm2, %v3553_v19, %v3554_v46  ;;  %v3561_v33 = vrot.slane %v3545_v35, 2  ;;  %v3327_v17 = vadd.f32 %v3326_v26, %v6186_v59  ;;  %v6316_v35 = vpop.f32.mrf.mxu1  ;;  %v3609_v4 = vrot.slane %v3595_v32, 4 }
 0x4b8   : > { %3567 = vst [vmem:[%s6194_s9 + $0x20] sm:$0xff] %v3555_v28  ;;  %v3427_v13 = vpop.f32.mrf.mxu0 }
 0x4b9   : > { %v3562_v45 = vsel %vm3552_vm2, %v3557_v25, %v3561_v33  ;;  %v3428_v0 = vadd.f32 %v3427_v13, %v6158_v31  ;;  %v3538_v10 = vadd.f32 %v3524_v18, %v3327_v17  ;;  %v3588_v12 = vadd.f32 %v3576_v21, %v3327_v17 }
 0x4ba   : > { %3570 = vst [vmem:[%s6194_s9 + $0x38] sm:$0xff] %v3562_v45  ;;  %v3173_v18 = vmax.f32 %v3137_v54, 0.0 }
 0x4bb   : > { %v3591_v14 = vadd.f32 %v6219_v30, %v3428_v0  ;;  %v3544_v63 = vmax.f32 %v3538_v10, 0.0  ;;  %v3594_v51 = vmax.f32 %v3588_v12, 0.0 }
 0x4bc   : > { %v3082_v5 = vpop.f32.mrf.mxu2 }
 0x4bd   : > { %v3597_v19 = vmax.f32 %v3591_v14, 0.0  ;;  %v3138_v25 = vadd.f32 %v3082_v5, %v2884_v1  ;;  %v3559_v26 = vrot.slane %v3544_v63, 2  ;;  %v3606_v45 = vrot.slane %v3594_v51, 4  ;;  %v6350_v51 = vld [vmem:[%s5383_s22 + $0xb8] sm:$0xff] }
 0x4be   : > { %v3328_v37 = vpop.f32.mrf.mxu3 }
 0x4bf   : > { %v3610_v28 = vrot.slane %v3597_v19, 4  ;;  %v3174_v36 = vmax.f32 %v3138_v25, 0.0  ;;  %v3329_v15 = vadd.f32 %v3328_v37, %v6186_v59  ;;  %v3560_v30 = vsel %vm3552_vm2, %v3554_v46, %v3559_v26  ;;  %v6332_v14 = vpop.f32.mrf.mxu1 }
 0x4c0   : > { %v3430_v60 = vpop.f32.mrf.mxu0  ;;  %3569 = vst [vmem:[%s6194_s9 + $0x30] sm:$0xff] %v3560_v30  ;;  %v2378_v46 = vadd.f32 %v6059_v11, %v6062_v57  ;;  %v2885_v11 = vadd.f32 %v6256_v34, %v6054_v16  ;;  %v6801_v57 = vld [vmem:[#allocation18_spill] sm:$0xff] }
 0x4c1   : > { %v3611_v21 = vsel %vm3575_vm1, %v3609_v4, %v3610_v28  ;;  %v3198_v33 = vpack.c.bf16 %v3174_v36, %v3173_v18  ;;  %v3590_v17 = vadd.f32 %v6240_v24, %v3329_v15  ;;  %v3431_v13 = vadd.f32 %v3430_v60, %v6158_v31 }
 0x4c2   : > { %3621 = vst [vmem:[%s6194_s9 + $0x48] sm:$0xff] %v3611_v21  ;;  %v2632_v63 = vadd.f32 %v6801_v57, %v2378_v46  ;;  %v6802_v57 = vld [vmem:[#allocation19_spill] sm:$0xff] }
 0x4c3   : > { %v3596_v47 = vmax.f32 %v3590_v17, 0.0  ;;  %v3593_v50 = vadd.f32 %v3580_v3, %v3431_v13  ;;  %3370 = vmatmul.bf16.gmra.mxu3 %v3198_v33  ;;  %3469 = vmatmul.bf16.gmra.mxu0 %v3198_v33  ;;  %v3641_v24 = vadd.f32 %v3629_v2, %v3431_v13 }
 0x4c4   : > { %v3085_v29 = vpop.f32.mrf.mxu2  ;;  %v2886_v19 = vadd.f32 %v6295_v43, %v2632_v63 }
 0x4c5   : > { %v3607_v0 = vrot.slane %v3596_v47, 4  ;;  %v3599_v32 = vmax.f32 %v3593_v50, 0.0  ;;  %v3647_v2 = vmax.f32 %v3641_v24, 0.0  ;;  %v3139_v25 = vadd.f32 %v3085_v29, %v2885_v11  ;;  %v6362_v50 = vld [vmem:[%s5383_s22 + $0xa8] sm:$0xff] }
 0x4c6   : > { %v3331_v10 = vpop.f32.mrf.mxu3  ;;  %v3693_v29 = vrot.slane %v6362_v50, 6 }
 0x4c7   : > { %v3608_v1 = vsel %vm3575_vm1, %v3606_v45, %v3607_v0  ;;  %v3614_v54 = vrot.slane %v3599_v32, 4  ;;  %v3332_v23 = vadd.f32 %v3331_v10, %v6186_v59  ;;  %v3175_v61 = vmax.f32 %v3139_v25, 0.0  ;;  %v6358_v47 = vpop.f32.mrf.mxu1 }
 0x4c8   : > { %3620 = vst [vmem:[%s6194_s9 + $0x40] sm:$0xff] %v3608_v1  ;;  %v3432_v3 = vpop.f32.mrf.mxu0 }
 0x4c9   : > { %v3615_v12 = vsel %vm3575_vm1, %v3610_v28, %v3614_v54  ;;  %v3433_v6 = vadd.f32 %v3432_v3, %v6158_v31  ;;  %v3592_v5 = vadd.f32 %v3578_v38, %v3332_v23  ;;  %v3640_v16 = vadd.f32 %v3628_v20, %v3332_v23  ;;  %v6383_v3 = vld [vmem:[%s5383_s22 + $0xa0] sm:$0xff] }
 0x4ca   : > { %3623 = vst [vmem:[%s6194_s9 + $0x58] sm:$0xff] %v3615_v12  ;;  %v3661_v28 = vrot.slane %v3647_v2, 6  ;;  %v3692_v11 = vrot.slane %v6383_v3, 6  ;;  %v6808_v3 = vld [vmem:[#allocation24_spill] sm:$0xff] }
 0x4cb   : > { %v3643_v4 = vadd.f32 %v6271_v53, %v3433_v6  ;;  %v3598_v26 = vmax.f32 %v3592_v5, 0.0  ;;  %v3696_v53 = vrot.slane %v6350_v51, 6  ;;  %v3646_v20 = vmax.f32 %v3640_v16, 0.0  ;;  %v6803_v6 = vld [vmem:[#allocation20_spill] sm:$0xff] }
 0x4cc   : > { %v3087_v34 = vpop.f32.mrf.mxu2  ;;  %v2887_v2 = vadd.f32 %v6316_v35, %v6803_v6  ;;  %v6806_v6 = vld [vmem:[#allocation22_spill] sm:$0xff] }
 0x4cd   : > { %v3649_v37 = vmax.f32 %v3643_v4, 0.0  ;;  %v3140_v18 = vadd.f32 %v3087_v34, %v2886_v19  ;;  %v3612_v36 = vrot.slane %v3598_v26, 4  ;;  %v3658_v32 = vrot.slane %v3646_v20, 6 }
 0x4ce   : > { %v3333_v15 = vpop.f32.mrf.mxu3  ;;  %v6374_v1 = vsel %vm3521_vm0, %v3693_v29, %v3696_v53  ;;  %v6804_v19 = vrot.slane %v6274_v58, 2 }
 0x4cf   : > { %v3662_v38 = vrot.slane %v3649_v37, 6  ;;  %v3176_v30 = vmax.f32 %v3140_v18, 0.0  ;;  %v3334_v43 = vadd.f32 %v3333_v15, %v6186_v59  ;;  %v3613_v9 = vsel %vm3575_vm1, %v3607_v0, %v3612_v36  ;;  %v4973_v37 = vld [vmem:[%s5383_s22 + $0x88] sm:$0xff]  ;;  %v2843_v18 = vpop.f32.mrf.mxu1 }
 0x4d0   : > { %v3435_v60 = vpop.f32.mrf.mxu0  ;;  %3622 = vst [vmem:[%s6194_s9 + $0x50] sm:$0xff] %v3613_v9 }
 0x4d1   : > { %v3663_v21 = vsel %vm3521_vm0, %v3661_v28, %v3662_v38  ;;  %v3199_v33 = vpack.c.bf16 %v3176_v30, %v3175_v61  ;;  %v3642_v17 = vadd.f32 %v6291_v62, %v3334_v43  ;;  %v3436_v13 = vadd.f32 %v3435_v60, %v6158_v31 }
 0x4d2   : > { %3673 = vst [vmem:[%s6194_s9 + $0x68] sm:$0xff] %v3663_v21  ;;  %v2380_v62 = vadd.f32 %v6072_v40, %v6075_v48  ;;  %v4974_v21 = vld [vmem:[%s5383_s22 + $0x80] sm:$0xff] }
 0x4d3   : > { %v3648_v46 = vmax.f32 %v3642_v17, 0.0  ;;  %v3645_v45 = vadd.f32 %v3632_v55, %v3436_v13  ;;  %3375 = vmatmul.bf16.gmra.mxu3 %v3199_v33  ;;  %3474 = vmatmul.bf16.gmra.mxu0 %v3199_v33  ;;  %v3694_v55 = vrot.slane %v6377_v42, 6 }
 0x4d4   : > { %v3090_v0 = vpop.f32.mrf.mxu2  ;;  %v2634_v63 = vadd.f32 %v6802_v57, %v2380_v62  ;;  %v6421_v57 = vld [vmem:[%s5383_s22 + $0xc0] sm:$0xff] }
 0x4d5   : > { %v3659_v24 = vrot.slane %v3648_v46, 6  ;;  %v3651_v10 = vmax.f32 %v3645_v45, 0.0  ;;  %v6400_v26 = vsel %vm3521_vm0, %v3692_v11, %v3694_v55  ;;  %v3141_v35 = vadd.f32 %v3090_v0, %v2887_v2  ;;  %v4975_v46 = vld [vmem:[%s5383_s22 + $0x98] sm:$0xff]  ;;  %v6807_v2 = vld [vmem:[#allocation21_spill] sm:$0xff] }
 0x4d6   : > { %v3336_v54 = vpop.f32.mrf.mxu3  ;;  %v2888_v16 = vadd.f32 %v6332_v14, %v2634_v63  ;;  %v6805_v0 = vld [vmem:[#allocation23_spill] sm:$0xff]  ;;  %v3744_v63 = vrot.slane %v6421_v57, 4 }
 0x4d7   : > { %v3660_v23 = vsel %vm3521_vm0, %v3658_v32, %v3659_v24  ;;  %v3666_v40 = vrot.slane %v3651_v10, 6  ;;  %v3337_v48 = vadd.f32 %v3336_v54, %v6186_v59  ;;  %v3177_v30 = vmax.f32 %v3141_v35, 0.0  ;;  %v6415_v10 = vld [vmem:[%s5383_s22 + $0xd0] sm:$0xff] }
 0x4d8   : > { %3672 = vst [vmem:[%s6194_s9 + $0x60] sm:$0xff] %v3660_v23  ;;  %v3437_v12 = vpop.f32.mrf.mxu0  ;;  %v2382_v32 = vadd.f32 %v6805_v0, %v6085_v39  ;;  %v3746_v54 = vrot.slane %v6415_v10, 4  ;;  %v2846_v23 = vpop.f32.mrf.mxu1  ;;  %v2889_v39 = vadd.f32 %v6358_v47, %v6806_v6 }
 0x4d9   : > { %v3667_v5 = vsel %vm3521_vm0, %v3662_v38, %v3666_v40  ;;  %v3644_v25 = vadd.f32 %v6804_v19, %v3337_v48  ;;  %v3438_v4 = vadd.f32 %v3437_v12, %v6158_v31  ;;  %v4978_v19 = vld [vmem:[%s5383_s22 + $0x90] sm:$0xff] }
 0x4da   : > { %3675 = vst [vmem:[%s6194_s9 + $0x78] sm:$0xff] %v3667_v5  ;;  %v2636_v5 = vadd.f32 %v6807_v2, %v2382_v32 }
 0x4db   : > { %v3650_v34 = vmax.f32 %v3644_v25, 0.0  ;;  %v3677_v58 = vadd.f32 %v4973_v37, %v3438_v4  ;;  %v6433_v4 = vsel %vm3575_vm1, %v3744_v63, %v3746_v54 }
 0x4dc   : > { %v3092_v28 = vpop.f32.mrf.mxu2 }
 0x4dd   : > { %v3664_v36 = vrot.slane %v3650_v34, 6  ;;  %v3681_v15 = vmax.f32 %v3677_v58, 0.0  ;;  %v3142_v61 = vadd.f32 %v3092_v28, %v2888_v16  ;;  %v2890_v16 = vadd.f32 %v2843_v18, %v2636_v5  ;;  %v4981_v5 = vld [vmem:[%s5383_s22 + $0xc8] sm:$0xff] }
 0x4de   : > { %v3338_v38 = vpop.f32.mrf.mxu3 }
 0x4df   : > { %v3665_v43 = vsel %vm3521_vm0, %v3659_v24, %v3664_v36  ;;  %3685 = vst [vmem:[%s6194_s9 + $0x88] sm:$0xff] %v3681_v15  ;;  %v3178_v9 = vmax.f32 %v3142_v61, 0.0  ;;  %v3339_v14 = vadd.f32 %v3338_v38, %v6186_v59 }
 0x4e0   : > { %3674 = vst [vmem:[%s6194_s9 + $0x70] sm:$0xff] %v3665_v43  ;;  %v3440_v20 = vpop.f32.mrf.mxu0  ;;  %v2848_v38 = vpop.f32.mrf.mxu1 }
 0x4e1   : > { %v3200_v60 = vpack.c.bf16 %v3178_v9, %v3177_v30  ;;  %v3676_v33 = vadd.f32 %v4974_v21, %v3339_v14  ;;  %v3441_v17 = vadd.f32 %v3440_v20, %v6158_v31 }
 0x4e3   : > { %v3680_v13 = vmax.f32 %v3676_v33, 0.0  ;;  %v3679_v45 = vadd.f32 %v4975_v46, %v3441_v17  ;;  %3380 = vmatmul.bf16.gmra.mxu3 %v3200_v60  ;;  %3479 = vmatmul.bf16.gmra.mxu0 %v3200_v60  ;;  %v2384_v60 = vadd.f32 %v6092_v8, %v6095_v44  ;;  %v6447_v33 = vld [vmem:[%s5383_s22 + $0xf0] sm:$0xff]  ;;  %v2891_v44 = vadd.f32 %v2846_v23, %v6090_v52 }
 0x4e4   : > { %v3095_v62 = vpop.f32.mrf.mxu2  ;;  %v3798_v17 = vrot.slane %v6447_v33, 2 }
 0x4e5   : > { %3684 = vst [vmem:[%s6194_s9 + $0x80] sm:$0xff] %v3680_v13  ;;  %v3683_v24 = vmax.f32 %v3679_v45, 0.0  ;;  %v3143_v35 = vadd.f32 %v3095_v62, %v2889_v39  ;;  %v6452_v62 = vld [vmem:[%s5383_s22 + $0xe0] sm:$0xff] }
 0x4e6   : > { %v3341_v40 = vpop.f32.mrf.mxu3  ;;  %v3796_v8 = vrot.slane %v6452_v62, 2 }
 0x4e7   : > { %3687 = vst [vmem:[%s6194_s9 + $0x98] sm:$0xff] %v3683_v24  ;;  %v3342_v48 = vadd.f32 %v3341_v40, %v6186_v59  ;;  %v3179_v36 = vmax.f32 %v3143_v35, 0.0 }
 0x4e8   : > { %v3442_v12 = vpop.f32.mrf.mxu0  ;;  %v6466_v52 = vsel %vm3552_vm2, %v3796_v8, %v3798_v17 }
 0x4e9   : > { %v3678_v25 = vadd.f32 %v4978_v19, %v3342_v48  ;;  %v3443_v37 = vadd.f32 %v3442_v12, %v6158_v31  ;;  %v2851_v12 = vpop.f32.mrf.mxu1 }
 0x4eb   : > { %v3682_v34 = vmax.f32 %v3678_v25, 0.0  ;;  %v3705_v15 = vadd.f32 %v3693_v29, %v3443_v37  ;;  %v4982_v25 = vld [vmem:[%s5383_s22 + $0xd8] sm:$0xff] }
 0x4ec   : > { %v3097_v58 = vpop.f32.mrf.mxu2 }
 0x4ed   : > { %3686 = vst [vmem:[%s6194_s9 + $0x90] sm:$0xff] %v3682_v34  ;;  %v3144_v28 = vadd.f32 %v3097_v58, %v2890_v16  ;;  %v3711_v14 = vmax.f32 %v3705_v15, 0.0  ;;  %v3748_v16 = vrot.slane %v4982_v25, 4 }
 0x4ee   : > { %v3343_v47 = vpop.f32.mrf.mxu3 }
 0x4ef   : > { %v3180_v61 = vmax.f32 %v3144_v28, 0.0  ;;  %v3344_v9 = vadd.f32 %v3343_v47, %v6186_v59  ;;  %v3725_v46 = vrot.slane %v3711_v14, 2 }
 0x4f0   : > { %v3445_v30 = vpop.f32.mrf.mxu0 }
 0x4f1   : > { %v3201_v43 = vpack.c.bf16 %v3180_v61, %v3179_v36  ;;  %v3446_v18 = vadd.f32 %v3445_v30, %v6158_v31  ;;  %v3704_v29 = vadd.f32 %v3692_v11, %v3344_v9  ;;  %v2638_v11 = vadd.f32 %v6808_v3, %v2384_v60 }
 0x4f3   : > { %v3707_v20 = vadd.f32 %v6374_v1, %v3446_v18  ;;  %3385 = vmatmul.bf16.gmra.mxu3 %v3201_v43  ;;  %3484 = vmatmul.bf16.gmra.mxu0 %v3201_v43  ;;  %v3710_v32 = vmax.f32 %v3704_v29, 0.0  ;;  %v2892_v23 = vadd.f32 %v2848_v38, %v2638_v11  ;;  %v2853_v29 = vpop.f32.mrf.mxu1  ;;  %v2893_v11 = vadd.f32 %v2851_v12, %v6098_v22  ;;  %v4983_v22 = vld [vmem:[%s5383_s22 + $0xe8] sm:$0xff] }
 0x4f4   : > { %v3100_v50 = vpop.f32.mrf.mxu2  ;;  %v3797_v12 = vrot.slane %v4983_v22, 2 }
 0x4f5   : > { %v3713_v21 = vmax.f32 %v3707_v20, 0.0  ;;  %v3145_v6 = vadd.f32 %v3100_v50, %v2891_v44  ;;  %v3722_v35 = vrot.slane %v3710_v32, 2  ;;  %v2386_v50 = vadd.f32 %v6100_v49, %v6103_v27 }
 0x4f6   : > { %v3346_v13 = vpop.f32.mrf.mxu3 }
 0x4f7   : > { %v3726_v45 = vrot.slane %v3713_v21, 2  ;;  %v3347_v1 = vadd.f32 %v3346_v13, %v6186_v59  ;;  %v3181_v28 = vmax.f32 %v3145_v6, 0.0 }
 0x4f8   : > { %v3447_v0 = vpop.f32.mrf.mxu0 }
 0x4f9   : > { %v3727_v24 = vsel %vm3552_vm2, %v3725_v46, %v3726_v45  ;;  %v3706_v40 = vadd.f32 %v6400_v26, %v3347_v1  ;;  %v3448_v48 = vadd.f32 %v3447_v0, %v6158_v31  ;;  %v3745_v26 = vrot.slane %v4981_v5, 4  ;;  %v6809_v0 = vld [vmem:[#allocation25_spill] sm:$0xff]  ;;  %v4984_v5 = vld [vmem:[%s5383_s22 + $0xf8] sm:$0xff] }
 0x4fa   : > { %3737 = vst [vmem:[%s6194_s9 + $0xa8] sm:$0xff] %v3727_v24  ;;  %v2640_v32 = vadd.f32 %v6809_v0, %v2386_v50 }
 0x4fb   : > { %v3712_v39 = vmax.f32 %v3706_v40, 0.0  ;;  %v3709_v2 = vadd.f32 %v3696_v53, %v3448_v48  ;;  %v3757_v61 = vadd.f32 %v3745_v26, %v3448_v48  ;;  %v3749_v30 = vsel %vm3575_vm1, %v3745_v26, %v3748_v16 }
 0x4fc   : > { %v3102_v19 = vpop.f32.mrf.mxu2  ;;  %v2894_v6 = vadd.f32 %v2853_v29, %v2640_v32  ;;  %v3800_v26 = vrot.slane %v4984_v5, 2 }
 0x4fd   : > { %v3723_v34 = vrot.slane %v3712_v39, 2  ;;  %v3715_v37 = vmax.f32 %v3709_v2, 0.0  ;;  %v3146_v58 = vadd.f32 %v3102_v19, %v2892_v23  ;;  %v3763_v20 = vmax.f32 %v3757_v61, 0.0 }
 0x4fe   : > { %v3348_v47 = vpop.f32.mrf.mxu3 }
 0x4ff   : > { %v3724_v36 = vsel %vm3552_vm2, %v3722_v35, %v3723_v34  ;;  %v3730_v15 = vrot.slane %v3715_v37, 2  ;;  %v3182_v38 = vmax.f32 %v3146_v58, 0.0  ;;  %v3349_v51 = vadd.f32 %v3348_v47, %v6186_v59  ;;  %v2856_v37 = vpop.f32.mrf.mxu1 }
 0x500   : > { %3736 = vst [vmem:[%s6194_s9 + $0xa0] sm:$0xff] %v3724_v36  ;;  %v3450_v53 = vpop.f32.mrf.mxu0  ;;  %v3777_v42 = vrot.slane %v3763_v20, 4 }
 0x501   : > { %v3731_v43 = vsel %vm3552_vm2, %v3726_v45, %v3730_v15  ;;  %v3202_v9 = vpack.c.bf16 %v3182_v38, %v3181_v28  ;;  %v3451_v18 = vadd.f32 %v3450_v53, %v6158_v31  ;;  %v3708_v14 = vadd.f32 %v3694_v55, %v3349_v51 }
 0x502   : > { %3739 = vst [vmem:[%s6194_s9 + $0xb8] sm:$0xff] %v3731_v43  ;;  %v3756_v46 = vadd.f32 %v3744_v63, %v3349_v51  ;;  %v3801_v38 = vsel %vm3552_vm2, %v3797_v12, %v3800_v26 }
 0x503   : > { %v3759_v60 = vadd.f32 %v3749_v30, %v3451_v18  ;;  %3390 = vmatmul.bf16.gmra.mxu3 %v3202_v9  ;;  %3489 = vmatmul.bf16.gmra.mxu0 %v3202_v9  ;;  %v3714_v21 = vmax.f32 %v3708_v14, 0.0  ;;  %v2388_v14 = vadd.f32 %v6171_v56, %v6111_v7 }
 0x504   : > { %v3105_v13 = vpop.f32.mrf.mxu2  ;;  %v3762_v57 = vmax.f32 %v3756_v46, 0.0 }
 0x505   : > { %v3765_v45 = vmax.f32 %v3759_v60, 0.0  ;;  %v3728_v1 = vrot.slane %v3714_v21, 2  ;;  %v3147_v48 = vadd.f32 %v3105_v13, %v2893_v11 }
 0x506   : > { %v3351_v44 = vpop.f32.mrf.mxu3  ;;  %v3774_v19 = vrot.slane %v3762_v57, 4 }
 0x507   : > { %v3778_v55 = vrot.slane %v3765_v45, 4  ;;  %v3352_v3 = vadd.f32 %v3351_v44, %v6186_v59  ;;  %v3729_v49 = vsel %vm3552_vm2, %v3723_v34, %v3728_v1  ;;  %v2642_v45 = vadd.f32 %v6141_v41, %v2388_v14  ;;  %v6810_v1 = vld [vmem:[#allocation26_spill] sm:$0xff] }
 0x508   : > { %v3452_v27 = vpop.f32.mrf.mxu0  ;;  %3738 = vst [vmem:[%s6194_s9 + $0xb0] sm:$0xff] %v3729_v49  ;;  %v2895_v44 = vadd.f32 %v2856_v37, %v6810_v1  ;;  %v4993_v1 = vld [vmem:[%s5383_s22 + $0x128] sm:$0xff] }
 0x509   : > { %v3779_v63 = vsel %vm3575_vm1, %v3777_v42, %v3778_v55  ;;  %v3758_v24 = vadd.f32 %v6433_v4, %v3352_v3  ;;  %v3453_v40 = vadd.f32 %v3452_v27, %v6158_v31  ;;  %v3183_v4 = vmax.f32 %v3147_v48, 0.0  ;;  %v2858_v42 = vpop.f32.mrf.mxu1 }
 0x50a   : > { %3789 = vst [vmem:[%s6194_s9 + $0xc8] sm:$0xff] %v3779_v63  ;;  %v2896_v0 = vadd.f32 %v2858_v42, %v2642_v45  ;;  %v4994_v42 = vld [vmem:[%s5383_s22 + $0x138] sm:$0xff] }
 0x50b   : > { %v3764_v23 = vmax.f32 %v3758_v24, 0.0  ;;  %v3761_v39 = vadd.f32 %v3748_v16, %v3453_v40  ;;  %v3809_v36 = vadd.f32 %v3797_v12, %v3453_v40  ;;  %v6519_v40 = vld [vmem:[%s5383_s22 + $0x130] sm:$0xff] }
 0x50c   : > { %v3107_v2 = vpop.f32.mrf.mxu2  ;;  %v3862_v48 = vrot.slane %v6519_v40, 6 }
 0x50d   : > { %v3775_v25 = vrot.slane %v3764_v23, 4  ;;  %v3767_v35 = vmax.f32 %v3761_v39, 0.0  ;;  %v3148_v34 = vadd.f32 %v3107_v2, %v2894_v6  ;;  %v3815_v9 = vmax.f32 %v3809_v36, 0.0  ;;  %v4986_v2 = vld [vmem:[%s5383_s22 + $0x120] sm:$0xff] }
 0x50e   : > { %v3353_v58 = vpop.f32.mrf.mxu3  ;;  %v3860_v5 = vrot.slane %v4986_v2, 6 }
 0x50f   : > { %v3776_v28 = vsel %vm3575_vm1, %v3774_v19, %v3775_v25  ;;  %v3782_v47 = vrot.slane %v3767_v35, 4  ;;  %v3184_v15 = vmax.f32 %v3148_v34, 0.0  ;;  %v3354_v16 = vadd.f32 %v3353_v58, %v6186_v59  ;;  %v4987_v58 = vld [vmem:[%s5383_s22 + $0x108] sm:$0xff] }
 0x510   : > { %3788 = vst [vmem:[%s6194_s9 + $0xc0] sm:$0xff] %v3776_v28  ;;  %v3455_v61 = vpop.f32.mrf.mxu0  ;;  %v3829_v46 = vrot.slane %v3815_v9, 6  ;;  %v3863_v37 = vsel %vm3521_vm0, %v3860_v5, %v3862_v48 }
 0x511   : > { %v3783_v51 = vsel %vm3575_vm1, %v3778_v55, %v3782_v47  ;;  %v3203_v53 = vpack.c.bf16 %v3184_v15, %v3183_v4  ;;  %v3456_v30 = vadd.f32 %v3455_v61, %v6158_v31  ;;  %v3760_v43 = vadd.f32 %v3746_v54, %v3354_v16  ;;  %v4988_v61 = vld [vmem:[%s5383_s22 + $0x100] sm:$0xff] }
 0x512   : > { %3791 = vst [vmem:[%s6194_s9 + $0xd8] sm:$0xff] %v3783_v51  ;;  %v3808_v50 = vadd.f32 %v3796_v8, %v3354_v16 }
 0x513   : > { %v3811_v18 = vadd.f32 %v3801_v38, %v3456_v30  ;;  %3395 = vmatmul.bf16.gmra.mxu3 %v3203_v53  ;;  %3494 = vmatmul.bf16.gmra.mxu0 %v3203_v53  ;;  %v3766_v20 = vmax.f32 %v3760_v43, 0.0  ;;  %v4989_v30 = vld [vmem:[%s5383_s22 + $0x118] sm:$0xff] }
 0x514   : > { %v3110_v60 = vpop.f32.mrf.mxu2  ;;  %v3814_v62 = vmax.f32 %v3808_v50, 0.0  ;;  %v6550_v50 = vld [vmem:[%s5383_s22 + $0x140] sm:$0xff] }
 0x515   : > { %v3817_v29 = vmax.f32 %v3811_v18, 0.0  ;;  %v3780_v21 = vrot.slane %v3766_v20, 4  ;;  %v3149_v11 = vadd.f32 %v3110_v60, %v2895_v44  ;;  %v6544_v18 = vld [vmem:[%s5383_s22 + $0x150] sm:$0xff]  ;;  %v3861_v44 = vrot.slane %v4993_v1, 6 }
 0x516   : > { %v3356_v13 = vpop.f32.mrf.mxu3  ;;  %v3826_v27 = vrot.slane %v3814_v62, 6  ;;  %v3914_v14 = vrot.slane %v6544_v18, 4 }
 0x517   : > { %v3830_v10 = vrot.slane %v3817_v29, 6  ;;  %v3357_v54 = vadd.f32 %v3356_v13, %v6186_v59  ;;  %v3781_v7 = vsel %vm3575_vm1, %v3775_v25, %v3780_v21  ;;  %v3912_v29 = vrot.slane %v6550_v50, 4  ;;  %v4992_v13 = vld [vmem:[%s5383_s22 + $0x110] sm:$0xff] }
 0x518   : > { %v3457_v56 = vpop.f32.mrf.mxu0  ;;  %3790 = vst [vmem:[%s6194_s9 + $0xd0] sm:$0xff] %v3781_v7  ;;  %v3864_v7 = vrot.slane %v4994_v42, 6 }
 0x519   : > { %v3831_v8 = vsel %vm3521_vm0, %v3829_v46, %v3830_v10  ;;  %v3810_v55 = vadd.f32 %v6466_v52, %v3357_v54  ;;  %v3458_v3 = vadd.f32 %v3457_v56, %v6158_v31  ;;  %v3185_v52 = vmax.f32 %v3149_v11, 0.0 }
 0x51a   : > { %3841 = vst [vmem:[%s6194_s9 + $0xe8] sm:$0xff] %v3831_v8 }
 0x51b   : > { %v3816_v41 = vmax.f32 %v3810_v55, 0.0  ;;  %v3813_v32 = vadd.f32 %v3800_v26, %v3458_v3  ;;  %v3865_v55 = vsel %vm3521_vm0, %v3861_v44, %v3864_v7 }
 0x51c   : > { %v3112_v49 = vpop.f32.mrf.mxu2 }
 0x51d   : > { %v3827_v57 = vrot.slane %v3816_v41, 6  ;;  %v3819_v63 = vmax.f32 %v3813_v32, 0.0  ;;  %v3150_v24 = vadd.f32 %v3112_v49, %v2896_v0 }
 0x51e   : > { %v3358_v6 = vpop.f32.mrf.mxu3 }
 0x51f   : > { %v3828_v23 = vsel %vm3521_vm0, %v3826_v27, %v3827_v57  ;;  %v3834_v39 = vrot.slane %v3819_v63, 6  ;;  %v3186_v22 = vmax.f32 %v3150_v24, 0.0  ;;  %v3359_v12 = vadd.f32 %v3358_v6, %v6186_v59  ;;  %v6567_v27 = vld [vmem:[%s5383_s22 + $0x170] sm:$0xff] }
 0x520   : > { %3840 = vst [vmem:[%s6194_s9 + $0xe0] sm:$0xff] %v3828_v23  ;;  %v3460_v26 = vpop.f32.mrf.mxu0  ;;  %v6572_v23 = vld [vmem:[%s5383_s22 + $0x160] sm:$0xff] }
 0x521   : > { %v3835_v19 = vsel %vm3521_vm0, %v3830_v10, %v3834_v39  ;;  %v3204_v25 = vpack.c.bf16 %v3186_v22, %v3185_v52  ;;  %v3812_v35 = vadd.f32 %v3798_v17, %v3359_v12  ;;  %v3461_v34 = vadd.f32 %v3460_v26, %v6158_v31 }
 0x522   : > { %3843 = vst [vmem:[%s6194_s9 + $0xf8] sm:$0xff] %v3835_v19  ;;  %v6557_v10 = vsel %vm3575_vm1, %v3912_v29, %v3914_v14  ;;  %v3964_v39 = vrot.slane %v6572_v23, 2 }
 0x523   : > { %v3818_v4 = vmax.f32 %v3812_v35, 0.0  ;;  %v3845_v28 = vadd.f32 %v4987_v58, %v3461_v34  ;;  %3400 = vmatmul.bf16.gmra.mxu3 %v3204_v25  ;;  %3499 = vmatmul.bf16.gmra.mxu0 %v3204_v25  ;;  %v4997_v34 = vld [vmem:[%s5383_s22 + $0x148] sm:$0xff]  ;;  %v4998_v58 = vld [vmem:[%s5383_s22 + $0x158] sm:$0xff] }
 0x525   : > { %v3832_v47 = vrot.slane %v3818_v4, 6  ;;  %v3849_v33 = vmax.f32 %v3845_v28, 0.0  ;;  %v3913_v4 = vrot.slane %v4997_v34, 4  ;;  %v3916_v28 = vrot.slane %v4998_v58, 4 }
 0x526   : > { %v3361_v36 = vpop.f32.mrf.mxu3 }
 0x527   : > { %v3833_v17 = vsel %vm3521_vm0, %v3827_v57, %v3832_v47  ;;  %3853 = vst [vmem:[%s6194_s9 + $0x108] sm:$0xff] %v3849_v33  ;;  %v3362_v15 = vadd.f32 %v3361_v36, %v6186_v59  ;;  %v3966_v57 = vrot.slane %v6567_v27, 2 }
 0x528   : > { %3842 = vst [vmem:[%s6194_s9 + $0xf0] sm:$0xff] %v3833_v17  ;;  %v3462_v16 = vpop.f32.mrf.mxu0 }
 0x529   : > { %v3844_v38 = vadd.f32 %v4988_v61, %v3362_v15  ;;  %v3463_v51 = vadd.f32 %v3462_v16, %v6158_v31  ;;  %v6583_v19 = vsel %vm3552_vm2, %v3964_v39, %v3966_v57 }
 0x52b   : > { %v3848_v53 = vmax.f32 %v3844_v38, 0.0  ;;  %v3847_v43 = vadd.f32 %v4989_v30, %v3463_v51  ;;  %v3917_v51 = vsel %vm3575_vm1, %v3913_v4, %v3916_v28 }
 0x52d   : > { %3852 = vst [vmem:[%s6194_s9 + $0x100] sm:$0xff] %v3848_v53  ;;  %v3851_v9 = vmax.f32 %v3847_v43, 0.0 }
 0x52e   : > { %v3363_v20 = vpop.f32.mrf.mxu3 }
 0x52f   : > { %3855 = vst [vmem:[%s6194_s9 + $0x118] sm:$0xff] %v3851_v9  ;;  %v3364_v60 = vadd.f32 %v3363_v20, %v6186_v59 }
 0x530   : > { %v3465_v21 = vpop.f32.mrf.mxu0 }
 0x531   : > { %v3846_v46 = vadd.f32 %v4992_v13, %v3364_v60  ;;  %v3466_v45 = vadd.f32 %v3465_v21, %v6158_v31 }
 0x533   : > { %v3850_v54 = vmax.f32 %v3846_v46, 0.0  ;;  %v3873_v62 = vadd.f32 %v3861_v44, %v3466_v45 }
 0x535   : > { %3854 = vst [vmem:[%s6194_s9 + $0x110] sm:$0xff] %v3850_v54  ;;  %v3879_v0 = vmax.f32 %v3873_v62, 0.0 }
 0x536   : > { %v3366_v56 = vpop.f32.mrf.mxu3 }
 0x537   : > { %v3367_v3 = vadd.f32 %v3366_v56, %v6186_v59  ;;  %v3893_v24 = vrot.slane %v3879_v0, 2 }
 0x538   : > { %v3467_v8 = vpop.f32.mrf.mxu0 }
 0x539   : > { %v3468_v11 = vadd.f32 %v3467_v8, %v6158_v31  ;;  %v3872_v32 = vadd.f32 %v3860_v5, %v3367_v3  ;;  %v4999_v8 = vld [vmem:[%s5383_s22 + $0x168] sm:$0xff]  ;;  %v5000_v3 = vld [vmem:[%s5383_s22 + $0x178] sm:$0xff] }
 0x53b   : > { %v3875_v41 = vadd.f32 %v3865_v55, %v3468_v11  ;;  %v3878_v12 = vmax.f32 %v3872_v32, 0.0  ;;  %v3965_v55 = vrot.slane %v4999_v8, 2  ;;  %v3968_v11 = vrot.slane %v5000_v3, 2  ;;  %v5005_v3 = vld [vmem:[%s5383_s22 + $0x198] sm:$0xff] }
 0x53d   : > { %v3881_v49 = vmax.f32 %v3875_v41, 0.0  ;;  %v3890_v47 = vrot.slane %v3878_v12, 2 }
 0x53e   : > { %v3368_v63 = vpop.f32.mrf.mxu3 }
 0x53f   : > { %v3894_v52 = vrot.slane %v3881_v49, 2  ;;  %v3369_v6 = vadd.f32 %v3368_v63, %v6186_v59 }
 0x540   : > { %v3470_v22 = vpop.f32.mrf.mxu0 }
 0x541   : > { %v3895_v2 = vsel %vm3552_vm2, %v3893_v24, %v3894_v52  ;;  %v3874_v5 = vadd.f32 %v3863_v37, %v3369_v6  ;;  %v3471_v26 = vadd.f32 %v3470_v22, %v6158_v31  ;;  %v3969_v22 = vsel %vm3552_vm2, %v3965_v55, %v3968_v11 }
 0x542   : > { %3905 = vst [vmem:[%s6194_s9 + $0x128] sm:$0xff] %v3895_v2 }
 0x543   : > { %v3880_v25 = vmax.f32 %v3874_v5, 0.0  ;;  %v3877_v35 = vadd.f32 %v3864_v7, %v3471_v26  ;;  %v3925_v16 = vadd.f32 %v3913_v4, %v3471_v26 }
 0x545   : > { %v3891_v37 = vrot.slane %v3880_v25, 2  ;;  %v3883_v33 = vmax.f32 %v3877_v35, 0.0  ;;  %v3931_v9 = vmax.f32 %v3925_v16, 0.0 }
 0x546   : > { %v3371_v36 = vpop.f32.mrf.mxu3 }
 0x547   : > { %v3892_v17 = vsel %vm3552_vm2, %v3890_v47, %v3891_v37  ;;  %v3898_v15 = vrot.slane %v3883_v33, 2  ;;  %v3372_v61 = vadd.f32 %v3371_v36, %v6186_v59  ;;  %v3945_v54 = vrot.slane %v3931_v9, 4 }
 0x548   : > { %3904 = vst [vmem:[%s6194_s9 + $0x120] sm:$0xff] %v3892_v17  ;;  %v3472_v38 = vpop.f32.mrf.mxu0 }
 0x549   : > { %v3899_v53 = vsel %vm3552_vm2, %v3894_v52, %v3898_v15  ;;  %v3876_v30 = vadd.f32 %v3862_v48, %v3372_v61  ;;  %v3473_v43 = vadd.f32 %v3472_v38, %v6158_v31  ;;  %v3924_v21 = vadd.f32 %v3912_v29, %v3372_v61 }
 0x54a   : > { %3907 = vst [vmem:[%s6194_s9 + $0x138] sm:$0xff] %v3899_v53  ;;  %v6624_v53 = vld [vmem:[%s5383_s22 + $0x1b0] sm:$0xff] }
 0x54b   : > { %v3882_v20 = vmax.f32 %v3876_v30, 0.0  ;;  %v3927_v60 = vadd.f32 %v3917_v51, %v3473_v43  ;;  %v3930_v44 = vmax.f32 %v3924_v21, 0.0  ;;  %v4030_v30 = vrot.slane %v6624_v53, 6 }
 0x54d   : > { %v3896_v50 = vrot.slane %v3882_v20, 2  ;;  %v3933_v13 = vmax.f32 %v3927_v60, 0.0  ;;  %v3942_v0 = vrot.slane %v3930_v44, 4  ;;  %v5002_v60 = vld [vmem:[%s5383_s22 + $0x1a0] sm:$0xff] }
 0x54e   : > { %v3373_v46 = vpop.f32.mrf.mxu3 }
 0x54f   : > { %v3897_v45 = vsel %vm3552_vm2, %v3891_v37, %v3896_v50  ;;  %v3946_v1 = vrot.slane %v3933_v13, 4  ;;  %v3374_v40 = vadd.f32 %v3373_v46, %v6186_v59  ;;  %v4028_v50 = vrot.slane %v5002_v60, 6 }
 0x550   : > { %3906 = vst [vmem:[%s6194_s9 + $0x130] sm:$0xff] %v3897_v45  ;;  %v3475_v48 = vpop.f32.mrf.mxu0 }
 0x551   : > { %v3947_v42 = vsel %vm3575_vm1, %v3945_v54, %v3946_v1  ;;  %v3926_v7 = vadd.f32 %v6557_v10, %v3374_v40  ;;  %v3476_v56 = vadd.f32 %v3475_v48, %v6158_v31  ;;  %v4031_v45 = vsel %vm3521_vm0, %v4028_v50, %v4030_v30  ;;  %v5003_v40 = vld [vmem:[%s5383_s22 + $0x188] sm:$0xff] }
 0x552   : > { %3957 = vst [vmem:[%s6194_s9 + $0x148] sm:$0xff] %v3947_v42 }
 0x553   : > { %v3932_v29 = vmax.f32 %v3926_v7, 0.0  ;;  %v3929_v62 = vadd.f32 %v3916_v28, %v3476_v56  ;;  %v3977_v52 = vadd.f32 %v3965_v55, %v3476_v56 }
 0x555   : > { %v3943_v41 = vrot.slane %v3932_v29, 4  ;;  %v3935_v32 = vmax.f32 %v3929_v62, 0.0  ;;  %v3983_v26 = vmax.f32 %v3977_v52, 0.0  ;;  %v5004_v29 = vld [vmem:[%s5383_s22 + $0x180] sm:$0xff] }
 0x556   : > { %v3376_v49 = vpop.f32.mrf.mxu3 }
 0x557   : > { %v3944_v63 = vsel %vm3575_vm1, %v3942_v0, %v3943_v41  ;;  %v3950_v24 = vrot.slane %v3935_v32, 4  ;;  %v3377_v10 = vadd.f32 %v3376_v49, %v6186_v59  ;;  %v3997_v47 = vrot.slane %v3983_v26, 6  ;;  %v5009_v26 = vld [vmem:[%s5383_s22 + $0x1a8] sm:$0xff] }
 0x558   : > { %3956 = vst [vmem:[%s6194_s9 + $0x140] sm:$0xff] %v3944_v63  ;;  %v3477_v6 = vpop.f32.mrf.mxu0 }
 0x559   : > { %v3951_v12 = vsel %vm3575_vm1, %v3946_v1, %v3950_v24  ;;  %v3928_v2 = vadd.f32 %v3914_v14, %v3377_v10  ;;  %v3478_v5 = vadd.f32 %v3477_v6, %v6158_v31  ;;  %v3976_v4 = vadd.f32 %v3964_v39, %v3377_v10  ;;  %v6655_v24 = vld [vmem:[%s5383_s22 + $0x1c0] sm:$0xff]  ;;  %v5008_v6 = vld [vmem:[%s5383_s22 + $0x190] sm:$0xff] }
 0x55a   : > { %3959 = vst [vmem:[%s6194_s9 + $0x158] sm:$0xff] %v3951_v12  ;;  %v4080_v52 = vrot.slane %v6655_v24, 4 }
 0x55b   : > { %v3934_v25 = vmax.f32 %v3928_v2, 0.0  ;;  %v3979_v35 = vadd.f32 %v3969_v22, %v3478_v5  ;;  %v3982_v36 = vmax.f32 %v3976_v4, 0.0 }
 0x55d   : > { %v3948_v34 = vrot.slane %v3934_v25, 4  ;;  %v3985_v58 = vmax.f32 %v3979_v35, 0.0  ;;  %v3994_v61 = vrot.slane %v3982_v36, 6  ;;  %v4029_v25 = vrot.slane %v5009_v26, 6  ;;  %v5010_v35 = vld [vmem:[%s5383_s22 + $0x1b8] sm:$0xff] }
 0x55e   : > { %v3378_v28 = vpop.f32.mrf.mxu3 }
 0x55f   : > { %v3949_v37 = vsel %vm3575_vm1, %v3943_v41, %v3948_v34  ;;  %v3998_v33 = vrot.slane %v3985_v58, 6  ;;  %v3379_v18 = vadd.f32 %v3378_v28, %v6186_v59  ;;  %v6649_v41 = vld [vmem:[%s5383_s22 + $0x1d0] sm:$0xff]  ;;  %v4032_v34 = vrot.slane %v5010_v35, 6 }
 0x560   : > { %3958 = vst [vmem:[%s6194_s9 + $0x150] sm:$0xff] %v3949_v37  ;;  %v3480_v14 = vpop.f32.mrf.mxu0  ;;  %v4082_v32 = vrot.slane %v6649_v41, 4 }
 0x561   : > { %v3999_v17 = vsel %vm3521_vm0, %v3997_v47, %v3998_v33  ;;  %v3978_v15 = vadd.f32 %v6583_v19, %v3379_v18  ;;  %v3481_v23 = vadd.f32 %v3480_v14, %v6158_v31  ;;  %v4033_v47 = vsel %vm3521_vm0, %v4029_v25, %v4032_v34 }
 0x562   : > { %4009 = vst [vmem:[%s6194_s9 + $0x168] sm:$0xff] %v3999_v17  ;;  %v6662_v12 = vsel %vm3575_vm1, %v4080_v52, %v4082_v32 }
 0x563   : > { %v3984_v39 = vmax.f32 %v3978_v15, 0.0  ;;  %v3981_v16 = vadd.f32 %v3968_v11, %v3481_v23  ;;  %v6672_v15 = vld [vmem:[%s5383_s22 + $0x1f0] sm:$0xff] }
 0x564   : > { %v4134_v23 = vrot.slane %v6672_v15, 2 }
 0x565   : > { %v3995_v38 = vrot.slane %v3984_v39, 6  ;;  %v3987_v51 = vmax.f32 %v3981_v16, 0.0 }
 0x566   : > { %v3381_v43 = vpop.f32.mrf.mxu3 }
 0x567   : > { %v3996_v9 = vsel %vm3521_vm0, %v3994_v61, %v3995_v38  ;;  %v4002_v20 = vrot.slane %v3987_v51, 6  ;;  %v3382_v19 = vadd.f32 %v3381_v43, %v6186_v59  ;;  %v6677_v51 = vld [vmem:[%s5383_s22 + $0x1e0] sm:$0xff] }
 0x568   : > { %4008 = vst [vmem:[%s6194_s9 + $0x160] sm:$0xff] %v3996_v9  ;;  %v3482_v21 = vpop.f32.mrf.mxu0  ;;  %v4132_v43 = vrot.slane %v6677_v51, 2 }
 0x569   : > { %v4003_v13 = vsel %vm3521_vm0, %v3998_v33, %v4002_v20  ;;  %v3980_v46 = vadd.f32 %v3966_v57, %v3382_v19  ;;  %v3483_v54 = vadd.f32 %v3482_v21, %v6158_v31 }
 0x56a   : > { %4011 = vst [vmem:[%s6194_s9 + $0x178] sm:$0xff] %v4003_v13  ;;  %v6688_v21 = vsel %vm3552_vm2, %v4132_v43, %v4134_v23 }
 0x56b   : > { %v3986_v1 = vmax.f32 %v3980_v46, 0.0  ;;  %v4013_v48 = vadd.f32 %v5003_v40, %v3483_v54  ;;  %v5013_v54 = vld [vmem:[%s5383_s22 + $0x1c8] sm:$0xff]  ;;  %v5014_v40 = vld [vmem:[%s5383_s22 + $0x1d8] sm:$0xff] }
 0x56d   : > { %v4000_v44 = vrot.slane %v3986_v1, 6  ;;  %v4017_v42 = vmax.f32 %v4013_v48, 0.0  ;;  %v4081_v1 = vrot.slane %v5013_v54, 4  ;;  %v4084_v48 = vrot.slane %v5014_v40, 4 }
 0x56e   : > { %v3383_v7 = vpop.f32.mrf.mxu3 }
 0x56f   : > { %v4001_v27 = vsel %vm3521_vm0, %v3995_v38, %v4000_v44  ;;  %4021 = vst [vmem:[%s6194_s9 + $0x188] sm:$0xff] %v4017_v42  ;;  %v3384_v57 = vadd.f32 %v3383_v7, %v6186_v59 }
 0x570   : > { %4010 = vst [vmem:[%s6194_s9 + $0x170] sm:$0xff] %v4001_v27  ;;  %v3485_v56 = vpop.f32.mrf.mxu0 }
 0x571   : > { %v4012_v62 = vadd.f32 %v5004_v29, %v3384_v57  ;;  %v3486_v8 = vadd.f32 %v3485_v56, %v6158_v31 }
 0x573   : > { %v4016_v55 = vmax.f32 %v4012_v62, 0.0  ;;  %v4015_v11 = vadd.f32 %v5005_v3, %v3486_v8  ;;  %v4085_v8 = vsel %vm3575_vm1, %v4081_v1, %v4084_v48 }
 0x575   : > { %4020 = vst [vmem:[%s6194_s9 + $0x180] sm:$0xff] %v4016_v55  ;;  %v4019_v0 = vmax.f32 %v4015_v11, 0.0 }
 0x576   : > { %v3386_v49 = vpop.f32.mrf.mxu3 }
 0x577   : > { %4023 = vst [vmem:[%s6194_s9 + $0x198] sm:$0xff] %v4019_v0  ;;  %v3387_v63 = vadd.f32 %v3386_v49, %v6186_v59 }
 0x578   : > { %v3487_v10 = vpop.f32.mrf.mxu0 }
 0x579   : > { %v4014_v22 = vadd.f32 %v5008_v6, %v3387_v63  ;;  %v3488_v5 = vadd.f32 %v3487_v10, %v6158_v31 }
 0x57b   : > { %v4018_v2 = vmax.f32 %v4014_v22, 0.0  ;;  %v4041_v58 = vadd.f32 %v4029_v25, %v3488_v5 }
 0x57d   : > { %4022 = vst [vmem:[%s6194_s9 + $0x190] sm:$0xff] %v4018_v2  ;;  %v4047_v18 = vmax.f32 %v4041_v58, 0.0 }
 0x57e   : > { %v3388_v4 = vpop.f32.mrf.mxu3 }
 0x57f   : > { %v3389_v37 = vadd.f32 %v3388_v4, %v6186_v59  ;;  %v4061_v16 = vrot.slane %v4047_v18, 2 }
 0x580   : > { %v3490_v28 = vpop.f32.mrf.mxu0 }
 0x581   : > { %v3491_v33 = vadd.f32 %v3490_v28, %v6158_v31  ;;  %v4040_v36 = vadd.f32 %v4028_v50, %v3389_v37  ;;  %v5015_v28 = vld [vmem:[%s5383_s22 + $0x1e8] sm:$0xff]  ;;  %v5016_v37 = vld [vmem:[%s5383_s22 + $0x1f8] sm:$0xff]  ;;  %s4195_s22 = sshll.u32 %s4192_s1, 4  ;;  %s4196_s22 = int_to_ptr.hbm [resolvable:$true] %s4195_s22 }
 0x582   : > { %s5151_s12 = sshra.s32 %s4196_s22, 4  ;;  %s5152_s12 = int_to_ptr.hbm [resolvable:$true] %s5151_s12 }
 0x583   : > { %v4043_v14 = vadd.f32 %v4033_v47, %v3491_v33  ;;  %v4046_v20 = vmax.f32 %v4040_v36, 0.0  ;;  %v4133_v47 = vrot.slane %v5015_v28, 2  ;;  %v4136_v33 = vrot.slane %v5016_v37, 2  ;;  %s5153_s10 = scalar_lea.hbm %s5152_s12, 512  ;;  %p5158_p11 = scmp.lt.s32.totalorder %s5152_s12, %s6778_s7 }
 0x584   : > { %p5154_p1 = scmp.ne.s32.totalorder %s5152_s12, %s5153_s10  ;;  %p5159_p9 = scmp.lt.s32.totalorder %s5157_s17, %s5153_s10 }
 0x585   : > { %v4049_v17 = vmax.f32 %v4043_v14, 0.0  ;;  %v4058_v44 = vrot.slane %v4046_v20, 2 }
 0x586   : > { %v3391_v39 = vpop.f32.mrf.mxu3  ;;  %p5155_p4 = pnand %p5154_p1, %p5349_p7  ;;  %p5160_p2 = por %p5159_p9, %p5158_p11 }
 0x587   : > { %v4062_v61 = vrot.slane %v4049_v17, 2  ;;  %v3392_v38 = vadd.f32 %v3391_v39, %v6186_v59 }
 0x588   : > { %v3492_v9 = vpop.f32.mrf.mxu0  ;;  %p5156_p8 = pneg %p5155_p4 }
 0x589   : > { %v4063_v19 = vsel %vm3552_vm2, %v4061_v16, %v4062_v61  ;;  %v4042_v60 = vadd.f32 %v4031_v45, %v3392_v38  ;;  %v3493_v50 = vadd.f32 %v3492_v9, %v6158_v31  ;;  %v4137_v9 = vsel %vm3552_vm2, %v4133_v47, %v4136_v33 }
 0x58a   : > { %4073 = vst [vmem:[%s6194_s9 + $0x1a8] sm:$0xff] %v4063_v19  ;;  %p5161_p10 = pnand %p5160_p2, %p5156_p8 }
 0x58b   : > { %v4048_v13 = vmax.f32 %v4042_v60, 0.0  ;;  %v4045_v46 = vadd.f32 %v4032_v34, %v3493_v50  ;;  %v4093_v56 = vadd.f32 %v4081_v1, %v3493_v50 }
 0x58d   : > { %v4059_v45 = vrot.slane %v4048_v13, 2  ;;  %v4051_v42 = vmax.f32 %v4045_v46, 0.0  ;;  %v4099_v0 = vmax.f32 %v4093_v56, 0.0 }
 0x58e   : > { %v3393_v7 = vpop.f32.mrf.mxu3 }
 0x58f   : > { %v4060_v27 = vsel %vm3552_vm2, %v4058_v44, %v4059_v45  ;;  %v4066_v57 = vrot.slane %v4051_v42, 2  ;;  %v3394_v29 = vadd.f32 %v3393_v7, %v6186_v59  ;;  %v4113_v2 = vrot.slane %v4099_v0, 4 }
 0x590   : > { %4072 = vst [vmem:[%s6194_s9 + $0x1a0] sm:$0xff] %v4060_v27  ;;  %v3495_v62 = vpop.f32.mrf.mxu0 }
 0x591   : > { %v4067_v55 = vsel %vm3552_vm2, %v4062_v61, %v4066_v57  ;;  %v4044_v3 = vadd.f32 %v4030_v30, %v3394_v29  ;;  %v3496_v11 = vadd.f32 %v3495_v62, %v6158_v31  ;;  %v4092_v10 = vadd.f32 %v4080_v52, %v3394_v29 }
 0x592   : > { %4075 = vst [vmem:[%s6194_s9 + $0x1b8] sm:$0xff] %v4067_v55 }
 0x593   : > { %v4050_v49 = vmax.f32 %v4044_v3, 0.0  ;;  %v4095_v63 = vadd.f32 %v4085_v8, %v3496_v11  ;;  %v4098_v25 = vmax.f32 %v4092_v10, 0.0 }
 0x595   : > { %v4064_v24 = vrot.slane %v4050_v49, 2  ;;  %v4101_v6 = vmax.f32 %v4095_v63, 0.0  ;;  %v4110_v18 = vrot.slane %v4098_v25, 4 }
 0x596   : > { %v3396_v22 = vpop.f32.mrf.mxu3 }
 0x597   : > { %v4065_v5 = vsel %vm3552_vm2, %v4059_v45, %v4064_v24  ;;  %v4114_v26 = vrot.slane %v4101_v6, 4  ;;  %v3397_v53 = vadd.f32 %v3396_v22, %v6186_v59 }
 0x598   : > { %4074 = vst [vmem:[%s6194_s9 + $0x1b0] sm:$0xff] %v4065_v5  ;;  %v3497_v30 = vpop.f32.mrf.mxu0 }
 0x599   : > { %v4115_v35 = vsel %vm3575_vm1, %v4113_v2, %v4114_v26  ;;  %v4094_v34 = vadd.f32 %v6662_v12, %v3397_v53  ;;  %v3498_v4 = vadd.f32 %v3497_v30, %v6158_v31 }
 0x59a   : > { %4125 = vst [vmem:[%s6194_s9 + $0x1c8] sm:$0xff] %v4115_v35 }
 0x59b   : > { %v4100_v52 = vmax.f32 %v4094_v34, 0.0  ;;  %v4097_v58 = vadd.f32 %v4084_v48, %v3498_v4  ;;  %v4145_v61 = vadd.f32 %v4133_v47, %v3498_v4 }
 0x59d   : > { %v4111_v14 = vrot.slane %v4100_v52, 4  ;;  %v4103_v36 = vmax.f32 %v4097_v58, 0.0  ;;  %v4151_v50 = vmax.f32 %v4145_v61, 0.0 }
 0x59e   : > { %v3398_v17 = vpop.f32.mrf.mxu3 }
 0x59f   : > { %v4112_v39 = vsel %vm3575_vm1, %v4110_v18, %v4111_v14  ;;  %v4118_v16 = vrot.slane %v4103_v36, 4  ;;  %v3399_v12 = vadd.f32 %v3398_v17, %v6186_v59  ;;  %v4165_v44 = vrot.slane %v4151_v50, 6 }
 0x5a0   : > { %4124 = vst [vmem:[%s6194_s9 + $0x1c0] sm:$0xff] %v4112_v39  ;;  %v3500_v38 = vpop.f32.mrf.mxu0 }
 0x5a1   : > { %v4119_v20 = vsel %vm3575_vm1, %v4114_v26, %v4118_v16  ;;  %v4096_v19 = vadd.f32 %v4082_v32, %v3399_v12  ;;  %v3501_v60 = vadd.f32 %v3500_v38, %v6158_v31  ;;  %v4144_v1 = vadd.f32 %v4132_v43, %v3399_v12 }
 0x5a2   : > { %4127 = vst [vmem:[%s6194_s9 + $0x1d8] sm:$0xff] %v4119_v20 }
 0x5a3   : > { %v4102_v13 = vmax.f32 %v4096_v19, 0.0  ;;  %v4147_v46 = vadd.f32 %v4137_v9, %v3501_v60  ;;  %v4150_v7 = vmax.f32 %v4144_v1, 0.0 }
 0x5a5   : > { %v4116_v54 = vrot.slane %v4102_v13, 4  ;;  %v4153_v40 = vmax.f32 %v4147_v46, 0.0  ;;  %v4162_v29 = vrot.slane %v4150_v7, 6 }
 0x5a6   : > { %v3401_v48 = vpop.f32.mrf.mxu3 }
 0x5a7   : > { %v4117_v45 = vsel %vm3575_vm1, %v4111_v14, %v4116_v54  ;;  %v4166_v42 = vrot.slane %v4153_v40, 6  ;;  %v3402_v41 = vadd.f32 %v3401_v48, %v6186_v59 }
 0x5a8   : > { %4126 = vst [vmem:[%s6194_s9 + $0x1d0] sm:$0xff] %v4117_v45  ;;  %v3502_v32 = vpop.f32.mrf.mxu0 }
 0x5a9   : > { %v4167_v27 = vsel %vm3521_vm0, %v4165_v44, %v4166_v42  ;;  %v4146_v57 = vadd.f32 %v6688_v21, %v3402_v41  ;;  %v3503_v51 = vadd.f32 %v3502_v32, %v6158_v31 }
 0x5aa   : > { %4177 = vst [vmem:[%s6194_s9 + $0x1e8] sm:$0xff] %v4167_v27 }
 0x5ab   : > { %v4152_v43 = vmax.f32 %v4146_v57, 0.0  ;;  %v4149_v56 = vadd.f32 %v4136_v33, %v3503_v51 }
 0x5ad   : > { %v4163_v62 = vrot.slane %v4152_v43, 6  ;;  %v4155_v8 = vmax.f32 %v4149_v56, 0.0 }
 0x5ae   : > { %v3403_v55 = vpop.f32.mrf.mxu3 }
 0x5af   : > { %v4164_v3 = vsel %vm3521_vm0, %v4162_v29, %v4163_v62  ;;  %v4170_v11 = vrot.slane %v4155_v8, 6  ;;  %v3404_v0 = vadd.f32 %v3403_v55, %v6186_v59 }
 0x5b0   : > { %4176 = vst [vmem:[%s6194_s9 + $0x1e0] sm:$0xff] %v4164_v3 }
 0x5b1   : > { %v4171_v31 = vsel %vm3521_vm0, %v4166_v42, %v4170_v11  ;;  %v4148_v21 = vadd.f32 %v4134_v23, %v3404_v0 }
 0x5b2   : > { %4179 = vst [vmem:[%s6194_s9 + $0x1f8] sm:$0xff] %v4171_v31 }
 0x5b3   : > { %v4154_v49 = vmax.f32 %v4148_v21, 0.0 }
 0x5b5   : > { %v4168_v63 = vrot.slane %v4154_v49, 6 }
 0x5b7   : > { %v4169_v59 = vsel %vm3521_vm0, %v4163_v62, %v4168_v63 }
 0x5b8   : > { %4178 = vst [vmem:[%s6194_s9 + $0x1f0] sm:$0xff] %v4169_v59 }
 0x5b9   : > { %5164 = shalt.err (!%p5161_p10)
}
 0x5ba   : > { %s5224_s20 = smov 256   ;;  %s5225_s9 = smov 16  }
 0x5bb   : > { %4878 = dma.vmem_to_hbm [thread:$0]  (%p5349_p7), %s4194_s28, 8192, %s4196_s22, %s4181_s30, %s5224_s20, %s5224_s20, %s5225_s9  }
 0x5bc PF: > { %s4210_s15 = sand.u32 1, %s5199_s24   ;;  %p6811_p12 = scmp.ge.s32.totalorder %s5211_s27, 2 }
 0x5bd   : > { %s4211_s13 = scalar_lea.sflag [#allocation5], %s4210_s15 }
 0x5be   : > { %p4895_p13 = pnand %p6811_p12, %p5301_p6 }
 0x5c0   : > { %p4896_p0 = pneg %p4895_p13 }
 0x5c2   : > { %5194 = dma.done.wait (%p4896_p0), %s4211_s13, 8192  }
 0x5c3   : > { %5196 = vsyncadd (%p4896_p0), %s4211_s13, 4294959104  ;;  %p22_p3 = scmp.ge.s32.totalorder %s5335_s16, 4   ;;  %s6812_s24 = smov %s5203_s25 }
 0x5c4   : > { %s6813_s25 = smov %s5207_s26  ;;  %s6814_s26 = smov %s5345_s18 }
 0x5c5   : > { %s6815_s27 = smov %s5335_s16  ;;  %24 = sbr.rel (!%p22_p3) target bundleno = 9 (0x9), region = 113 }
 0x5ca   :  { %4217 = vsyncpa [#allocation4], 1 }
 0x5cb   :  { %4219 = vsyncpa [#allocation4 + $0x1], 1 }
 0x5cc   :  { %4220 = vsyncpa [#allocation7], 1 }
 0x5cd   :  { %4221 = vsyncpa [#allocation10], 1 }
 0x5ce   :  { %4222 = vsyncpa [#allocation5], 1 }
 0x5cf   :  { %4224 = vsyncpa [#allocation5 + $0x1], 1 }

</bundles_post_ra>
